<compile_context>
chip_gen: v5e
topology: v5e:2x2
jax: 0.10.0
libtpu: 0.0.40
codegen_flags: <defaults>
</compile_context>

<pallas_src>
import functools
import math

import jax
import jax.numpy as jnp
from jax.experimental import pallas as pl
from jax.experimental.pallas import tpu as pltpu

TM = 512            # row tile for large-M matmuls (sweep 256..1024)
HIDDEN = 512
STRIDES = (4, 4, 2, 1)


def _round_up(n, m):
    return ((n + m - 1) // m) * m


# ----------------------------- Pallas kernels ------------------------------ #
def _glinear_kernel(x_ref, w_ref, b_ref, o_ref, *, apply_relu):
    """One (bm, K) x (K, N) tile: bf16 matmul, f32 accumulate, bias (+ReLU)."""
    y = jnp.dot(x_ref[...], w_ref[...], preferred_element_type=jnp.float32)
    y = y + b_ref[...]
    if apply_relu:
        y = jnp.maximum(y, 0.0)
    o_ref[...] = y.astype(o_ref.dtype)


def _head_kernel(x_ref, w1_ref, b1_ref, w2_ref, b2_ref, o_ref):
    """Fused Linear(K->H) + ReLU + Linear(H->A); H-wide intermediate stays in VMEM."""
    h = jnp.dot(x_ref[...], w1_ref[...], preferred_element_type=jnp.float32)
    h = jnp.maximum(h + b1_ref[...], 0.0)
    y = jnp.dot(h.astype(w2_ref.dtype), w2_ref[...],
                preferred_element_type=jnp.float32)
    o_ref[...] = (y + b2_ref[...]).astype(o_ref.dtype)


# --------------------------- Pallas call wrappers --------------------------- #
def grouped_linear(x, w, b, *, apply_relu, out_dtype):
    """y[g] = relu?(x[g or 0] @ w[g] + b[g]) for g in range(G), one pallas_call.

    x: [Gx, M, K] with Gx in {1, G} (Gx=1 -> input shared by both twins)
    w: [G, K, N], b: [G, N]  ->  out: [G, M, N]
    """
    Gx, M, K = x.shape
    G, K2, N = w.shape
    assert K == K2 and Gx in (1, G)

    bm = min(TM, _round_up(M, 8))
    Mp = _round_up(M, bm)
    if Mp != M:
        x = jnp.pad(x, ((0, 0), (0, Mp - M), (0, 0)))

    xb = x.astype(jnp.bfloat16)
    wb = w.astype(jnp.bfloat16)
    b3 = b.reshape(G, 1, N).astype(jnp.float32)

    x_index = (lambda g, i: (0, i, 0)) if Gx == 1 else (lambda g, i: (g, i, 0))

    out = pl.pallas_call(
        functools.partial(_glinear_kernel, apply_relu=apply_relu),
        out_shape=jax.ShapeDtypeStruct((G, Mp, N), out_dtype),
        grid_spec=pltpu.PrefetchScalarGridSpec(
            num_scalar_prefetch=0,
            grid=(G, Mp // bm),
            in_specs=[
                pl.BlockSpec((None, bm, K), x_index),           # x row tile
                pl.BlockSpec((None, K, N), lambda g, i: (g, 0, 0)),  # w[g]
                pl.BlockSpec((None, 1, N), lambda g, i: (g, 0, 0)),  # b[g]
            ],
            out_specs=pl.BlockSpec((None, bm, N), lambda g, i: (g, i, 0)),
        ),
        compiler_params=pltpu.CompilerParams(
            dimension_semantics=("parallel", "parallel")),
    )(xb, wb, b3)
    return out[:, :M]


def grouped_head(x, w1, b1, w2, b2):
    """Fused two-layer head for both twins: [G, M, K] -> [G, M, A] (f32)."""
    G, M, K = x.shape
    H = w1.shape[2]
    A = w2.shape[2]

    bm = min(TM, _round_up(M, 8))
    Mp = _round_up(M, bm)
    if Mp != M:
        x = jnp.pad(x, ((0, 0), (0, Mp - M), (0, 0)))

    xb = x.astype(jnp.bfloat16)
    w1b = w1.astype(jnp.bfloat16)
    w2b = w2.astype(jnp.bfloat16)
    b1r = b1.reshape(G, 1, H).astype(jnp.float32)
    b2r = b2.reshape(G, 1, A).astype(jnp.float32)

    out = pl.pallas_call(
        _head_kernel,
        out_shape=jax.ShapeDtypeStruct((G, Mp, A), jnp.float32),
        grid_spec=pltpu.PrefetchScalarGridSpec(
            num_scalar_prefetch=0,
            grid=(G, Mp // bm),
            in_specs=[
                pl.BlockSpec((None, bm, K), lambda g, i: (g, i, 0)),
                pl.BlockSpec((None, K, H), lambda g, i: (g, 0, 0)),
                pl.BlockSpec((None, 1, H), lambda g, i: (g, 0, 0)),
                pl.BlockSpec((None, H, A), lambda g, i: (g, 0, 0)),
                pl.BlockSpec((None, 1, A), lambda g, i: (g, 0, 0)),
            ],
            out_specs=pl.BlockSpec((None, bm, A), lambda g, i: (g, i, 0)),
        ),
        compiler_params=pltpu.CompilerParams(
            dimension_semantics=("parallel", "parallel")),
    )(xb, w1b, b1r, w2b, b2r)
    return out[:, :M]


# ------------------------------- conv glue ---------------------------------- #
def conv_out_dim(n, k, s):
    return (n - k) // s + 1


def im2col(x, kh, kw, stride):
    """NHWC -> [B, Ho, Wo, kh*kw*C] patches ((kh, kw, C) ordering)."""
    B, H, W, C = x.shape
    Ho = conv_out_dim(H, kh, stride)
    Wo = conv_out_dim(W, kw, stride)
    cols = []
    for i in range(kh):
        for j in range(kw):
            patch = jax.lax.slice(
                x, (0, i, j, 0),
                (B, i + (Ho - 1) * stride + 1, j + (Wo - 1) * stride + 1, C),
                (1, stride, stride, 1))
            cols.append(patch)
    patches = jnp.stack(cols, axis=3)  # [B, Ho, Wo, kh*kw, C]
    return patches.reshape(B, Ho, Wo, kh * kw * C), Ho, Wo


# ------------------------------ parameters ----------------------------------- #
def _he_uniform(key, shape, fan_in):
    # kaiming_uniform_(a=0): bound = sqrt(6 / fan_in); biases zeroed (per spec).
    bound = math.sqrt(6.0 / fan_in)
    return jax.random.uniform(key, shape, jnp.float32, -bound, bound)


def _torch_linear_init(kw, kb, in_f, out_f):
    # PyTorch default nn.Linear init (head is NOT covered by initialize_weights_he).
    bound = 1.0 / math.sqrt(in_f)
    w = jax.random.uniform(kw, (in_f, out_f), jnp.float32, -bound, bound)
    b = jax.random.uniform(kb, (out_f,), jnp.float32, -bound, bound)
    return w, b


def _init_single_qnet(key, num_channels, num_actions, ho, wo):
    ks = jax.random.split(key, 8)
    cfg = [(num_channels, 32, 8), (32, 32, 8), (32, 64, 4), (64, 64, 3)]
    conv_w, conv_b = [], []
    for i, (cin, cout, k) in enumerate(cfg):
        conv_w.append(_he_uniform(ks[i], (k, k, cin, cout), k * k * cin))
        conv_b.append(jnp.zeros((cout,), jnp.float32))

    feat = 64 * ho * wo
    # TODO(synk): PyTorch's head hardcodes in_features = 4096 + 6 while feeding
    # it the raw conv features; we use the actual flattened conv dim so the
    # forward is well-defined.
    w1, b1 = _torch_linear_init(ks[4], ks[5], feat, HIDDEN)
    # Fold the NCHW Flatten into w1: the NHWC-flattened feature at position
    # (h, w, c) must pick up the weight row PyTorch applies to NCHW index
    # (c, h, w). Runtime flatten is then a plain NHWC reshape (no transpose).
    nchw_rows = jnp.arange(feat).reshape(64, ho, wo)
    perm = jnp.transpose(nchw_rows, (1, 2, 0)).reshape(-1)
    w1 = w1[perm]
    w2, b2 = _torch_linear_init(ks[6], ks[7], HIDDEN, num_actions)
    return conv_w, conv_b, (w1, b1, w2, b2)


def init_twinned_q(key, num_channels, num_actions, ho, wo):
    k1, k2 = jax.random.split(key)
    c1w, c1b, h1 = _init_single_qnet(k1, num_channels, num_actions, ho, wo)
    c2w, c2b, h2 = _init_single_qnet(k2, num_channels, num_actions, ho, wo)
    return {
        "conv_w": [jnp.stack([a, b]) for a, b in zip(c1w, c2w)],   # [2,k,k,ci,co]
        "conv_b": [jnp.stack([a, b]) for a, b in zip(c1b, c2b)],   # [2,co]
        "head": tuple(jnp.stack([a, b]) for a, b in zip(h1, h2)),  # [2,...]
    }


# -------------------------------- forward ------------------------------------ #
def twinned_q_forward(params, states):
    """states: NHWC [B, H, W, C] f32 -> (q1, q2) each [B, num_actions] f32."""
    B = states.shape[0]
    G = params["conv_w"][0].shape[0]      # = 2 twins
    x = states.astype(jnp.bfloat16)       # shared conv1 input
    act = None

    for l, stride in enumerate(STRIDES):
        w = params["conv_w"][l]           # [G, k, k, cin, cout]
        b = params["conv_b"][l]           # [G, cout]
        _, KH, KW, Cin, Cout = w.shape
        if l == 0:
            patches, Ho, Wo = im2col(x, KH, KW, stride)               # shared
            px = patches.reshape(1, B * Ho * Wo, KH * KW * Cin)
        else:
            _, _, Hi, Wi, Ci = act.shape
            patches, Ho, Wo = im2col(act.reshape(G * B, Hi, Wi, Ci), KH, KW, stride)
            px = patches.reshape(G, B * Ho * Wo, KH * KW * Cin)
        y = grouped_linear(px, w.reshape(G, KH * KW * Cin, Cout), b,
                           apply_relu=True, out_dtype=jnp.bfloat16)   # [G, M, Cout]
        act = y.reshape(G, B, Ho, Wo, Cout)

    _, _, Ho, Wo, Cf = act.shape
    feats = act.reshape(G, B, Ho * Wo * Cf)   # NHWC flatten (w1 rows pre-permuted)
    w1, b1, w2, b2 = params["head"]
    q = grouped_head(feats, w1, b1, w2, b2)   # [G, B, A] f32
    return q[0], q[1]


# ----------------------------- pure-XLA reference ----------------------------- #
def _reference_qnet(params, states, twin):
    x = states
    for l, s in enumerate(STRIDES):
        w = params["conv_w"][l][twin]
        b = params["conv_b"][l][twin]
        x = jax.lax.conv_general_dilated(
            x, w, window_strides=(s, s), padding="VALID",
            dimension_numbers=("NHWC", "HWIO", "NHWC"))
        x = jnp.maximum(x + b, 0.0)
    feats = x.reshape(x.shape[0], -1)
    w1, b1, w2, b2 = (p[twin] for p in params["head"])
    h = jnp.maximum(feats @ w1 + b1, 0.0)
    return h @ w2 + b2


# ---------------------------------- main -------------------------------------- #
if __name__ == "__main__":
    key = jax.random.PRNGKey(0)
    # 148 is the smallest spatial size the (8/4, 8/4, 4/2, 3/1) valid conv
    # stack admits.
    B, H, W, C = 2, 148, 148, 4
    num_actions = 6

    kx, kp = jax.random.split(key)
    states = jax.random.normal(kx, (B, H, W, C), jnp.float32)  # NHWC

    h, w_ = H, W
    for (k, s) in [(8, 4), (8, 4), (4, 2), (3, 1)]:
        h, w_ = conv_out_dim(h, k, s), conv_out_dim(w_, k, s)

    params = init_twinned_q(kp, C, num_actions, h, w_)

    q1, q2 = jax.jit(twinned_q_forward)(params, states)
    jax.block_until_ready((q1, q2))

    assert q1.shape == (B, num_actions) and q2.shape == (B, num_actions)
    assert q1.dtype == jnp.float32 and q2.dtype == jnp.float32

    # Loose tolerance: kernel path runs bf16 matmuls with f32 accumulation.
    r1 = _reference_qnet(params, states, 0)
    r2 = _reference_qnet(params, states, 1)
    assert jnp.allclose(q1, r1, rtol=5e-2, atol=5e-2), (q1, r1)
    assert jnp.allclose(q2, r2, rtol=5e-2, atol=5e-2), (q2, r2)

    print("KERNEL_OK")
</pallas_src>

<mosaic_0001>
module attributes {stable_mosaic.version = 11 : i64} {
  func.func @_glinear_kernel(%arg0: i32, %arg1: i32, %arg2: memref<1x512x256xbf16, #tpu.memory_space<vmem>>, %arg3: memref<1x256x32xbf16, #tpu.memory_space<vmem>>, %arg4: memref<1x1x32xf32, #tpu.memory_space<vmem>>, %arg5: memref<1x512x32xbf16, #tpu.memory_space<vmem>>) attributes {dimension_semantics = [#tpu.dimension_semantics<parallel>, #tpu.dimension_semantics<parallel>], iteration_bounds = array<i64: 2, 6>, scalar_prefetch = 0 : i64, scratch_operands = 0 : i64, tpu.core_type = #tpu.core_type<tc>, window_params = [{transform_indices = @transform_0, window_bounds = array<i64: 1, 512, 256>}, {transform_indices = @transform_1, window_bounds = array<i64: 1, 256, 32>}, {transform_indices = @transform_2, window_bounds = array<i64: 1, 1, 32>}, {transform_indices = @transform_3, window_bounds = array<i64: 1, 512, 32>}]} {
    %c0 = arith.constant 0 : index
    %c0_0 = arith.constant 0 : index
    %c0_1 = arith.constant 0 : index
    %0 = vector.load %arg2[%c0, %c0_0, %c0_1] : memref<1x512x256xbf16, #tpu.memory_space<vmem>>, vector<1x512x256xbf16>
    %1 = vector.shape_cast %0 : vector<1x512x256xbf16> to vector<512x256xbf16>
    %c0_2 = arith.constant 0 : index
    %c0_3 = arith.constant 0 : index
    %c0_4 = arith.constant 0 : index
    %2 = vector.load %arg3[%c0_2, %c0_3, %c0_4] : memref<1x256x32xbf16, #tpu.memory_space<vmem>>, vector<1x256x32xbf16>
    %3 = vector.shape_cast %2 : vector<1x256x32xbf16> to vector<256x32xbf16>
    %cst = arith.constant dense<0.000000e+00> : vector<512x32xf32>
    %4 = tpu.matmul %1, %3, %cst {dimension_numbers = #tpu.dot_dimension_numbers<[1], [0], [0], [1], [0, 0, 1, 1], [], []>} : vector<512x256xbf16>, vector<256x32xbf16>, vector<512x32xf32> -> vector<512x32xf32>
    %c0_5 = arith.constant 0 : index
    %c0_6 = arith.constant 0 : index
    %c0_7 = arith.constant 0 : index
    %5 = vector.load %arg4[%c0_5, %c0_6, %c0_7] : memref<1x1x32xf32, #tpu.memory_space<vmem>>, vector<1x1x32xf32>
    %6 = vector.shape_cast %5 : vector<1x1x32xf32> to vector<1x32xf32>
    %7 = vector.broadcast %6 : vector<1x32xf32> to vector<512x32xf32>
    %8 = arith.addf %4, %7 : vector<512x32xf32>
    %cst_8 = arith.constant 0.000000e+00 : f32
    %9 = vector.broadcast %cst_8 : f32 to vector<512x32xf32>
    %10 = arith.maximumf %8, %9 : vector<512x32xf32>
    %11 = arith.truncf %10 : vector<512x32xf32> to vector<512x32xbf16>
    %c0_9 = arith.constant 0 : index
    %c0_10 = arith.constant 0 : index
    %c0_11 = arith.constant 0 : index
    %12 = vector.load %arg5[%c0_9, %c0_10, %c0_11] : memref<1x512x32xbf16, #tpu.memory_space<vmem>>, vector<1x512x32xbf16>
    %13 = vector.shape_cast %12 : vector<1x512x32xbf16> to vector<512x32xbf16>
    %14 = vector.shape_cast %11 : vector<512x32xbf16> to vector<1x512x32xbf16>
    tpu.vector_store %arg5[%c0_9, %c0_10, %c0_11], %14 {strides = array<i32>} : memref<1x512x32xbf16, #tpu.memory_space<vmem>>, vector<1x512x32xbf16>,
    return
  }
  func.func @transform_0(%arg0: i32, %arg1: i32) -> (i32, i32, i32) {
    %c0_i32 = arith.constant 0 : i32
    %c0_i32_0 = arith.constant 0 : i32
    %c0_i32_1 = arith.constant 0 : i32
    return %c0_i32, %arg1, %c0_i32_0 : i32, i32, i32
  }
  func.func @transform_1(%arg0: i32, %arg1: i32) -> (i32, i32, i32) {
    %c0_i32 = arith.constant 0 : i32
    %c0_i32_0 = arith.constant 0 : i32
    %c0_i32_1 = arith.constant 0 : i32
    return %arg0, %c0_i32, %c0_i32_0 : i32, i32, i32
  }
  func.func @transform_2(%arg0: i32, %arg1: i32) -> (i32, i32, i32) {
    %c0_i32 = arith.constant 0 : i32
    %c0_i32_0 = arith.constant 0 : i32
    %c0_i32_1 = arith.constant 0 : i32
    return %arg0, %c0_i32, %c0_i32_0 : i32, i32, i32
  }
  func.func @transform_3(%arg0: i32, %arg1: i32) -> (i32, i32, i32) {
    %c0_i32 = arith.constant 0 : i32
    %c0_i32_0 = arith.constant 0 : i32
    return %arg0, %arg1, %c0_i32 : i32, i32, i32
  }
}

module attributes {stable_mosaic.version = 11 : i64} {
  func.func @_glinear_kernel(%arg0: i32, %arg1: i32, %arg2: memref<1x128x2048xbf16, #tpu.memory_space<vmem>>, %arg3: memref<1x2048x32xbf16, #tpu.memory_space<vmem>>, %arg4: memref<1x1x32xf32, #tpu.memory_space<vmem>>, %arg5: memref<1x128x32xbf16, #tpu.memory_space<vmem>>) attributes {dimension_semantics = [#tpu.dimension_semantics<parallel>, #tpu.dimension_semantics<parallel>], iteration_bounds = array<i64: 2, 1>, scalar_prefetch = 0 : i64, scratch_operands = 0 : i64, tpu.core_type = #tpu.core_type<tc>, window_params = [{transform_indices = @transform_0, window_bounds = array<i64: 1, 128, 2048>}, {transform_indices = @transform_1, window_bounds = array<i64: 1, 2048, 32>}, {transform_indices = @transform_2, window_bounds = array<i64: 1, 1, 32>}, {transform_indices = @transform_3, window_bounds = array<i64: 1, 128, 32>}]} {
    %c0 = arith.constant 0 : index
    %c0_0 = arith.constant 0 : index
    %c0_1 = arith.constant 0 : index
    %0 = vector.load %arg2[%c0, %c0_0, %c0_1] : memref<1x128x2048xbf16, #tpu.memory_space<vmem>>, vector<1x128x2048xbf16>
    %1 = vector.shape_cast %0 : vector<1x128x2048xbf16> to vector<128x2048xbf16>
    %c0_2 = arith.constant 0 : index
    %c0_3 = arith.constant 0 : index
    %c0_4 = arith.constant 0 : index
    %2 = vector.load %arg3[%c0_2, %c0_3, %c0_4] : memref<1x2048x32xbf16, #tpu.memory_space<vmem>>, vector<1x2048x32xbf16>
    %3 = vector.shape_cast %2 : vector<1x2048x32xbf16> to vector<2048x32xbf16>
    %cst = arith.constant dense<0.000000e+00> : vector<128x32xf32>
    %4 = tpu.matmul %1, %3, %cst {dimension_numbers = #tpu.dot_dimension_numbers<[1], [0], [0], [1], [0, 0, 1, 1], [], []>} : vector<128x2048xbf16>, vector<2048x32xbf16>, vector<128x32xf32> -> vector<128x32xf32>
    %c0_5 = arith.constant 0 : index
    %c0_6 = arith.constant 0 : index
    %c0_7 = arith.constant 0 : index
    %5 = vector.load %arg4[%c0_5, %c0_6, %c0_7] : memref<1x1x32xf32, #tpu.memory_space<vmem>>, vector<1x1x32xf32>
    %6 = vector.shape_cast %5 : vector<1x1x32xf32> to vector<1x32xf32>
    %7 = vector.broadcast %6 : vector<1x32xf32> to vector<128x32xf32>
    %8 = arith.addf %4, %7 : vector<128x32xf32>
    %cst_8 = arith.constant 0.000000e+00 : f32
    %9 = vector.broadcast %cst_8 : f32 to vector<128x32xf32>
    %10 = arith.maximumf %8, %9 : vector<128x32xf32>
    %11 = arith.truncf %10 : vector<128x32xf32> to vector<128x32xbf16>
    %c0_9 = arith.constant 0 : index
    %c0_10 = arith.constant 0 : index
    %c0_11 = arith.constant 0 : index
    %12 = vector.load %arg5[%c0_9, %c0_10, %c0_11] : memref<1x128x32xbf16, #tpu.memory_space<vmem>>, vector<1x128x32xbf16>
    %13 = vector.shape_cast %12 : vector<1x128x32xbf16> to vector<128x32xbf16>
    %14 = vector.shape_cast %11 : vector<128x32xbf16> to vector<1x128x32xbf16>
    tpu.vector_store %arg5[%c0_9, %c0_10, %c0_11], %14 {strides = array<i32>} : memref<1x128x32xbf16, #tpu.memory_space<vmem>>, vector<1x128x32xbf16>,
    return
  }
  func.func @transform_0(%arg0: i32, %arg1: i32) -> (i32, i32, i32) {
    %c0_i32 = arith.constant 0 : i32
    %c0_i32_0 = arith.constant 0 : i32
    return %arg0, %arg1, %c0_i32 : i32, i32, i32
  }
  func.func @transform_1(%arg0: i32, %arg1: i32) -> (i32, i32, i32) {
    %c0_i32 = arith.constant 0 : i32
    %c0_i32_0 = arith.constant 0 : i32
    %c0_i32_1 = arith.constant 0 : i32
    return %arg0, %c0_i32, %c0_i32_0 : i32, i32, i32
  }
  func.func @transform_2(%arg0: i32, %arg1: i32) -> (i32, i32, i32) {
    %c0_i32 = arith.constant 0 : i32
    %c0_i32_0 = arith.constant 0 : i32
    %c0_i32_1 = arith.constant 0 : i32
    return %arg0, %c0_i32, %c0_i32_0 : i32, i32, i32
  }
  func.func @transform_3(%arg0: i32, %arg1: i32) -> (i32, i32, i32) {
    %c0_i32 = arith.constant 0 : i32
    %c0_i32_0 = arith.constant 0 : i32
    return %arg0, %arg1, %c0_i32 : i32, i32, i32
  }
}

module attributes {stable_mosaic.version = 11 : i64} {
  func.func @_glinear_kernel(%arg0: i32, %arg1: i32, %arg2: memref<1x24x512xbf16, #tpu.memory_space<vmem>>, %arg3: memref<1x512x64xbf16, #tpu.memory_space<vmem>>, %arg4: memref<1x1x64xf32, #tpu.memory_space<vmem>>, %arg5: memref<1x24x64xbf16, #tpu.memory_space<vmem>>) attributes {dimension_semantics = [#tpu.dimension_semantics<parallel>, #tpu.dimension_semantics<parallel>], iteration_bounds = array<i64: 2, 1>, scalar_prefetch = 0 : i64, scratch_operands = 0 : i64, tpu.core_type = #tpu.core_type<tc>, window_params = [{transform_indices = @transform_0, window_bounds = array<i64: 1, 24, 512>}, {transform_indices = @transform_1, window_bounds = array<i64: 1, 512, 64>}, {transform_indices = @transform_2, window_bounds = array<i64: 1, 1, 64>}, {transform_indices = @transform_3, window_bounds = array<i64: 1, 24, 64>}]} {
    %c0 = arith.constant 0 : index
    %c0_0 = arith.constant 0 : index
    %c0_1 = arith.constant 0 : index
    %0 = vector.load %arg2[%c0, %c0_0, %c0_1] : memref<1x24x512xbf16, #tpu.memory_space<vmem>>, vector<1x24x512xbf16>
    %1 = vector.shape_cast %0 : vector<1x24x512xbf16> to vector<24x512xbf16>
    %c0_2 = arith.constant 0 : index
    %c0_3 = arith.constant 0 : index
    %c0_4 = arith.constant 0 : index
    %2 = vector.load %arg3[%c0_2, %c0_3, %c0_4] : memref<1x512x64xbf16, #tpu.memory_space<vmem>>, vector<1x512x64xbf16>
    %3 = vector.shape_cast %2 : vector<1x512x64xbf16> to vector<512x64xbf16>
    %cst = arith.constant dense<0.000000e+00> : vector<24x64xf32>
    %4 = tpu.matmul %1, %3, %cst {dimension_numbers = #tpu.dot_dimension_numbers<[1], [0], [0], [1], [0, 0, 1, 1], [], []>} : vector<24x512xbf16>, vector<512x64xbf16>, vector<24x64xf32> -> vector<24x64xf32>
    %c0_5 = arith.constant 0 : index
    %c0_6 = arith.constant 0 : index
    %c0_7 = arith.constant 0 : index
    %5 = vector.load %arg4[%c0_5, %c0_6, %c0_7] : memref<1x1x64xf32, #tpu.memory_space<vmem>>, vector<1x1x64xf32>
    %6 = vector.shape_cast %5 : vector<1x1x64xf32> to vector<1x64xf32>
    %7 = vector.broadcast %6 : vector<1x64xf32> to vector<24x64xf32>
    %8 = arith.addf %4, %7 : vector<24x64xf32>
    %cst_8 = arith.constant 0.000000e+00 : f32
    %9 = vector.broadcast %cst_8 : f32 to vector<24x64xf32>
    %10 = arith.maximumf %8, %9 : vector<24x64xf32>
    %11 = arith.truncf %10 : vector<24x64xf32> to vector<24x64xbf16>
    %c0_9 = arith.constant 0 : index
    %c0_10 = arith.constant 0 : index
    %c0_11 = arith.constant 0 : index
    %12 = vector.load %arg5[%c0_9, %c0_10, %c0_11] : memref<1x24x64xbf16, #tpu.memory_space<vmem>>, vector<1x24x64xbf16>
    %13 = vector.shape_cast %12 : vector<1x24x64xbf16> to vector<24x64xbf16>
    %14 = vector.shape_cast %11 : vector<24x64xbf16> to vector<1x24x64xbf16>
    tpu.vector_store %arg5[%c0_9, %c0_10, %c0_11], %14 {strides = array<i32>} : memref<1x24x64xbf16, #tpu.memory_space<vmem>>, vector<1x24x64xbf16>,
    return
  }
  func.func @transform_0(%arg0: i32, %arg1: i32) -> (i32, i32, i32) {
    %c0_i32 = arith.constant 0 : i32
    %c0_i32_0 = arith.constant 0 : i32
    return %arg0, %arg1, %c0_i32 : i32, i32, i32
  }
  func.func @transform_1(%arg0: i32, %arg1: i32) -> (i32, i32, i32) {
    %c0_i32 = arith.constant 0 : i32
    %c0_i32_0 = arith.constant 0 : i32
    %c0_i32_1 = arith.constant 0 : i32
    return %arg0, %c0_i32, %c0_i32_0 : i32, i32, i32
  }
  func.func @transform_2(%arg0: i32, %arg1: i32) -> (i32, i32, i32) {
    %c0_i32 = arith.constant 0 : i32
    %c0_i32_0 = arith.constant 0 : i32
    %c0_i32_1 = arith.constant 0 : i32
    return %arg0, %c0_i32, %c0_i32_0 : i32, i32, i32
  }
  func.func @transform_3(%arg0: i32, %arg1: i32) -> (i32, i32, i32) {
    %c0_i32 = arith.constant 0 : i32
    %c0_i32_0 = arith.constant 0 : i32
    return %arg0, %arg1, %c0_i32 : i32, i32, i32
  }
}

module attributes {stable_mosaic.version = 11 : i64} {
  func.func @_glinear_kernel(%arg0: i32, %arg1: i32, %arg2: memref<1x8x576xbf16, #tpu.memory_space<vmem>>, %arg3: memref<1x576x64xbf16, #tpu.memory_space<vmem>>, %arg4: memref<1x1x64xf32, #tpu.memory_space<vmem>>, %arg5: memref<1x8x64xbf16, #tpu.memory_space<vmem>>) attributes {dimension_semantics = [#tpu.dimension_semantics<parallel>, #tpu.dimension_semantics<parallel>], iteration_bounds = array<i64: 2, 1>, scalar_prefetch = 0 : i64, scratch_operands = 0 : i64, tpu.core_type = #tpu.core_type<tc>, window_params = [{transform_indices = @transform_0, window_bounds = array<i64: 1, 8, 576>}, {transform_indices = @transform_1, window_bounds = array<i64: 1, 576, 64>}, {transform_indices = @transform_2, window_bounds = array<i64: 1, 1, 64>}, {transform_indices = @transform_3, window_bounds = array<i64: 1, 8, 64>}]} {
    %c0 = arith.constant 0 : index
    %c0_0 = arith.constant 0 : index
    %c0_1 = arith.constant 0 : index
    %0 = vector.load %arg2[%c0, %c0_0, %c0_1] : memref<1x8x576xbf16, #tpu.memory_space<vmem>>, vector<1x8x576xbf16>
    %1 = vector.shape_cast %0 : vector<1x8x576xbf16> to vector<8x576xbf16>
    %c0_2 = arith.constant 0 : index
    %c0_3 = arith.constant 0 : index
    %c0_4 = arith.constant 0 : index
    %2 = vector.load %arg3[%c0_2, %c0_3, %c0_4] : memref<1x576x64xbf16, #tpu.memory_space<vmem>>, vector<1x576x64xbf16>
    %3 = vector.shape_cast %2 : vector<1x576x64xbf16> to vector<576x64xbf16>
    %cst = arith.constant dense<0.000000e+00> : vector<8x64xf32>
    %4 = tpu.matmul %1, %3, %cst {dimension_numbers = #tpu.dot_dimension_numbers<[1], [0], [0], [1], [0, 0, 1, 1], [], []>} : vector<8x576xbf16>, vector<576x64xbf16>, vector<8x64xf32> -> vector<8x64xf32>
    %c0_5 = arith.constant 0 : index
    %c0_6 = arith.constant 0 : index
    %c0_7 = arith.constant 0 : index
    %5 = vector.load %arg4[%c0_5, %c0_6, %c0_7] : memref<1x1x64xf32, #tpu.memory_space<vmem>>, vector<1x1x64xf32>
    %6 = vector.shape_cast %5 : vector<1x1x64xf32> to vector<1x64xf32>
    %7 = vector.broadcast %6 : vector<1x64xf32> to vector<8x64xf32>
    %8 = arith.addf %4, %7 : vector<8x64xf32>
    %cst_8 = arith.constant 0.000000e+00 : f32
    %9 = vector.broadcast %cst_8 : f32 to vector<8x64xf32>
    %10 = arith.maximumf %8, %9 : vector<8x64xf32>
    %11 = arith.truncf %10 : vector<8x64xf32> to vector<8x64xbf16>
    %c0_9 = arith.constant 0 : index
    %c0_10 = arith.constant 0 : index
    %c0_11 = arith.constant 0 : index
    %12 = vector.load %arg5[%c0_9, %c0_10, %c0_11] : memref<1x8x64xbf16, #tpu.memory_space<vmem>>, vector<1x8x64xbf16>
    %13 = vector.shape_cast %12 : vector<1x8x64xbf16> to vector<8x64xbf16>
    %14 = vector.shape_cast %11 : vector<8x64xbf16> to vector<1x8x64xbf16>
    tpu.vector_store %arg5[%c0_9, %c0_10, %c0_11], %14 {strides = array<i32>} : memref<1x8x64xbf16, #tpu.memory_space<vmem>>, vector<1x8x64xbf16>,
    return
  }
  func.func @transform_0(%arg0: i32, %arg1: i32) -> (i32, i32, i32) {
    %c0_i32 = arith.constant 0 : i32
    %c0_i32_0 = arith.constant 0 : i32
    return %arg0, %arg1, %c0_i32 : i32, i32, i32
  }
  func.func @transform_1(%arg0: i32, %arg1: i32) -> (i32, i32, i32) {
    %c0_i32 = arith.constant 0 : i32
    %c0_i32_0 = arith.constant 0 : i32
    %c0_i32_1 = arith.constant 0 : i32
    return %arg0, %c0_i32, %c0_i32_0 : i32, i32, i32
  }
  func.func @transform_2(%arg0: i32, %arg1: i32) -> (i32, i32, i32) {
    %c0_i32 = arith.constant 0 : i32
    %c0_i32_0 = arith.constant 0 : i32
    %c0_i32_1 = arith.constant 0 : i32
    return %arg0, %c0_i32, %c0_i32_0 : i32, i32, i32
  }
  func.func @transform_3(%arg0: i32, %arg1: i32) -> (i32, i32, i32) {
    %c0_i32 = arith.constant 0 : i32
    %c0_i32_0 = arith.constant 0 : i32
    return %arg0, %arg1, %c0_i32 : i32, i32, i32
  }
}

module attributes {stable_mosaic.version = 11 : i64} {
  func.func @_head_kernel(%arg0: i32, %arg1: i32, %arg2: memref<1x8x64xbf16, #tpu.memory_space<vmem>>, %arg3: memref<1x64x512xbf16, #tpu.memory_space<vmem>>, %arg4: memref<1x1x512xf32, #tpu.memory_space<vmem>>, %arg5: memref<1x512x6xbf16, #tpu.memory_space<vmem>>, %arg6: memref<1x1x6xf32, #tpu.memory_space<vmem>>, %arg7: memref<1x8x6xf32, #tpu.memory_space<vmem>>) attributes {dimension_semantics = [#tpu.dimension_semantics<parallel>, #tpu.dimension_semantics<parallel>], iteration_bounds = array<i64: 2, 1>, scalar_prefetch = 0 : i64, scratch_operands = 0 : i64, tpu.core_type = #tpu.core_type<tc>, window_params = [{transform_indices = @transform_0, window_bounds = array<i64: 1, 8, 64>}, {transform_indices = @transform_1, window_bounds = array<i64: 1, 64, 512>}, {transform_indices = @transform_2, window_bounds = array<i64: 1, 1, 512>}, {transform_indices = @transform_3, window_bounds = array<i64: 1, 512, 6>}, {transform_indices = @transform_4, window_bounds = array<i64: 1, 1, 6>}, {transform_indices = @transform_5, window_bounds = array<i64: 1, 8, 6>}]} {
    %c0 = arith.constant 0 : index
    %c0_0 = arith.constant 0 : index
    %c0_1 = arith.constant 0 : index
    %0 = vector.load %arg2[%c0, %c0_0, %c0_1] : memref<1x8x64xbf16, #tpu.memory_space<vmem>>, vector<1x8x64xbf16>
    %1 = vector.shape_cast %0 : vector<1x8x64xbf16> to vector<8x64xbf16>
    %c0_2 = arith.constant 0 : index
    %c0_3 = arith.constant 0 : index
    %c0_4 = arith.constant 0 : index
    %2 = vector.load %arg3[%c0_2, %c0_3, %c0_4] : memref<1x64x512xbf16, #tpu.memory_space<vmem>>, vector<1x64x512xbf16>
    %3 = vector.shape_cast %2 : vector<1x64x512xbf16> to vector<64x512xbf16>
    %cst = arith.constant dense<0.000000e+00> : vector<8x512xf32>
    %4 = tpu.matmul %1, %3, %cst {dimension_numbers = #tpu.dot_dimension_numbers<[1], [0], [0], [1], [0, 0, 1, 1], [], []>} : vector<8x64xbf16>, vector<64x512xbf16>, vector<8x512xf32> -> vector<8x512xf32>
    %c0_5 = arith.constant 0 : index
    %c0_6 = arith.constant 0 : index
    %c0_7 = arith.constant 0 : index
    %5 = vector.load %arg4[%c0_5, %c0_6, %c0_7] : memref<1x1x512xf32, #tpu.memory_space<vmem>>, vector<1x1x512xf32>
    %6 = vector.shape_cast %5 : vector<1x1x512xf32> to vector<1x512xf32>
    %7 = vector.broadcast %6 : vector<1x512xf32> to vector<8x512xf32>
    %8 = arith.addf %4, %7 : vector<8x512xf32>
    %cst_8 = arith.constant 0.000000e+00 : f32
    %9 = vector.broadcast %cst_8 : f32 to vector<8x512xf32>
    %10 = arith.maximumf %8, %9 : vector<8x512xf32>
    %11 = arith.truncf %10 : vector<8x512xf32> to vector<8x512xbf16>
    %c0_9 = arith.constant 0 : index
    %c0_10 = arith.constant 0 : index
    %c0_11 = arith.constant 0 : index
    %12 = vector.load %arg5[%c0_9, %c0_10, %c0_11] : memref<1x512x6xbf16, #tpu.memory_space<vmem>>, vector<1x512x6xbf16>
    %13 = vector.shape_cast %12 : vector<1x512x6xbf16> to vector<512x6xbf16>
    %cst_12 = arith.constant dense<0.000000e+00> : vector<8x6xf32>
    %14 = tpu.matmul %11, %13, %cst_12 {dimension_numbers = #tpu.dot_dimension_numbers<[1], [0], [0], [1], [0, 0, 1, 1], [], []>} : vector<8x512xbf16>, vector<512x6xbf16>, vector<8x6xf32> -> vector<8x6xf32>
    %c0_13 = arith.constant 0 : index
    %c0_14 = arith.constant 0 : index
    %c0_15 = arith.constant 0 : index
    %15 = vector.load %arg6[%c0_13, %c0_14, %c0_15] : memref<1x1x6xf32, #tpu.memory_space<vmem>>, vector<1x1x6xf32>
    %16 = vector.shape_cast %15 : vector<1x1x6xf32> to vector<1x6xf32>
    %17 = vector.broadcast %16 : vector<1x6xf32> to vector<8x6xf32>
    %18 = arith.addf %14, %17 : vector<8x6xf32>
    %c0_16 = arith.constant 0 : index
    %c0_17 = arith.constant 0 : index
    %c0_18 = arith.constant 0 : index
    %19 = vector.load %arg7[%c0_16, %c0_17, %c0_18] : memref<1x8x6xf32, #tpu.memory_space<vmem>>, vector<1x8x6xf32>
    %20 = vector.shape_cast %19 : vector<1x8x6xf32> to vector<8x6xf32>
    %21 = vector.shape_cast %18 : vector<8x6xf32> to vector<1x8x6xf32>
    tpu.vector_store %arg7[%c0_16, %c0_17, %c0_18], %21 {strides = array<i32>} : memref<1x8x6xf32, #tpu.memory_space<vmem>>, vector<1x8x6xf32>,
    return
  }
  func.func @transform_0(%arg0: i32, %arg1: i32) -> (i32, i32, i32) {
    %c0_i32 = arith.constant 0 : i32
    %c0_i32_0 = arith.constant 0 : i32
    return %arg0, %arg1, %c0_i32 : i32, i32, i32
  }
  func.func @transform_1(%arg0: i32, %arg1: i32) -> (i32, i32, i32) {
    %c0_i32 = arith.constant 0 : i32
    %c0_i32_0 = arith.constant 0 : i32
    %c0_i32_1 = arith.constant 0 : i32
    return %arg0, %c0_i32, %c0_i32_0 : i32, i32, i32
  }
  func.func @transform_2(%arg0: i32, %arg1: i32) -> (i32, i32, i32) {
    %c0_i32 = arith.constant 0 : i32
    %c0_i32_0 = arith.constant 0 : i32
    %c0_i32_1 = arith.constant 0 : i32
    return %arg0, %c0_i32, %c0_i32_0 : i32, i32, i32
  }
  func.func @transform_3(%arg0: i32, %arg1: i32) -> (i32, i32, i32) {
    %c0_i32 = arith.constant 0 : i32
    %c0_i32_0 = arith.constant 0 : i32
    %c0_i32_1 = arith.constant 0 : i32
    return %arg0, %c0_i32, %c0_i32_0 : i32, i32, i32
  }
  func.func @transform_4(%arg0: i32, %arg1: i32) -> (i32, i32, i32) {
    %c0_i32 = arith.constant 0 : i32
    %c0_i32_0 = arith.constant 0 : i32
    %c0_i32_1 = arith.constant 0 : i32
    return %arg0, %c0_i32, %c0_i32_0 : i32, i32, i32
  }
  func.func @transform_5(%arg0: i32, %arg1: i32) -> (i32, i32, i32) {
    %c0_i32 = arith.constant 0 : i32
    %c0_i32_0 = arith.constant 0 : i32
    return %arg0, %arg1, %c0_i32 : i32, i32, i32
  }
}

</mosaic_0001>

<bundles_post_ra>
// kernel: twinned_q_forward.5
= control target key start
LH: loop header
LB: loop body
LE: loop exit
PB: predicated region body
PF: predicated region fallthrough
CT: control target
= control target key end

     0   :  { %s1920_s12 = smov 0   ;;  %s1922_s13 = smov 0   ;;  %s2331_s0 = inlined_call_operand.vmem [shape: bf16[1,3072,256], index: 0, kind: input, shape index: {}]   ;;  %s2332_s1 = inlined_call_operand.vmem [shape: bf16[2,256,32], index: 1, kind: input, shape index: {}]   ;;  %s2333_s2 = inlined_call_operand.vmem [shape: f32[2,1,32], index: 2, kind: input, shape index: {}]   ;;  %s2334_s3 = inlined_call_operand.vmem [shape: bf16[2,3072,32], index: 3, kind: output, shape index: {}]  }
   0x1   :  { %s1924_s14 = smov 0   ;;  %s1926_s15 = smov 0  }
   0x2   :  { %s1928_s16 = smov 0  }
   0x3 LB: > { %s22_s17 = sadd.s32 1, %s1890_s14  ;;  %s25_s18 = sadd.s32 1, %s1894_s15  ;;  %s1898_s16 = sphi %s1928_s16, %s13_s16   ;;  %s1894_s15 = sphi %s1926_s15, %s2338_s15   ;;  %s1890_s14 = sphi %s1924_s14, %s2337_s14   ;;  %s1886_s13 = sphi %s1922_s13, %s2336_s13   ;;  %s1882_s12 = sphi %s1920_s12, %s2335_s12  }
   0x4   : > { %p23_p0 = scmp.ge.s32.totalorder %s22_s17, 6  ;;  %p1389_p1 = scmp.ge.s32.totalorder %s1898_s16, 1 }
   0x5   : > { %p171_p2 = scmp.lt.s32.totalorder %s1898_s16, 13 }
   0x6   : > { %s2340_s17 = smov (%p23_p0, %s22_s17), 0  ;;  %s2342_s18 = smov (!%p23_p0, %s25_s18), %s1894_s15 }
   0x7   : > { %p172_p3 = pnand %p1389_p1, %p171_p2  ;;  %p27_p4 = scmp.ge.s32.totalorder %s2342_s18, 2 }
   0x8   : > { %p215_p5 = scmp.lt.s32.totalorder (!%p172_p3), %s1886_s13, 1  ;;  %s1390_s23 = sshll.u32 (!%p172_p3), %s1882_s12, 6 }
   0x9   : > { %s2344_s18 = smov (%p27_p4, %s2342_s18), 0  ;;  %175 = sbr.rel (%p172_p3) target bundleno = 438 (0x1b6), region = 32 }
   0xa   : > { %p209_p6 = scmp.lt.s32.totalorder (!%p172_p3), %s1390_s23, 383 }
   0xe   : > { %s2346_s13 = smov (!%p215_p5, %s1886_s13), 1  ;;  %s2348_s23 = smov (!%p209_p6, %s1390_s23), 383  ;;  %vm1215_vm0 = vcmask 257024  }
   0xf   : > { %s1720_s19 = sshll.u32 %s2346_s13, 7  ;;  %s1978_s26 = scalar_lea.vmem %s2333_s2, %s2346_s13 }
  0x10   : > { %s1958_s22 = scalar_lea.vmem %s2332_s1, %s1720_s19  ;;  %s1719_s27 = sshll.u32 %s2348_s23, 3 }
  0x11   : > { %v1792_v0 = vld [vmem:[%s1958_s22 + $0x38] sm:$0xff]  ;;  %v1791_v2 = vld [vmem:[%s1958_s22 + $0x30] sm:$0xff]  ;;  %v1790_v4 = vld [vmem:[%s1958_s22 + $0x28] sm:$0xff]  ;;  %s1986_s30 = scalar_lea.vmem %s2331_s0, %s1719_s27  ;;  %s1817_s4 = smul.u32 384, %s2346_s13 }
  0x12   : > { %v1800_v1 = vld [vmem:[%s1958_s22 + $0x78] sm:$0xff]  ;;  %749 = vmatpush.bf16.msra.mxu0 %v1792_v0  ;;  %1801 = vmatpush.bf16.msra.mxu2 %v1792_v0  ;;  %v1799_v3 = vld [vmem:[%s1958_s22 + $0x70] sm:$0xff]  ;;  %v1798_v5 = vld [vmem:[%s1958_s22 + $0x68] sm:$0xff] }
  0x13   : > { %918 = vmatpush.bf16.msra.mxu1 %v1800_v1  ;;  %1809 = vmatpush.bf16.msra.mxu3 %v1800_v1  ;;  %v1789_v6 = vld [vmem:[%s1958_s22 + $0x20] sm:$0xff]  ;;  %v1788_v8 = vld [vmem:[%s1958_s22 + $0x18] sm:$0xff]  ;;  %v1787_v10 = vld [vmem:[%s1958_s22 + $0x10] sm:$0xff]  ;;  %s2001_s5 = sadd.s32 %s1817_s4, %s2348_s23 }
  0x14   : > { %v1797_v7 = vld [vmem:[%s1958_s22 + $0x60] sm:$0xff]  ;;  %v1796_v9 = vld [vmem:[%s1958_s22 + $0x58] sm:$0xff]  ;;  %v1795_v11 = vld [vmem:[%s1958_s22 + $0x50] sm:$0xff]  ;;  %s1396_s6 = sshll.u32 %s2001_s5, 2 }
  0x15   : > { %v1786_v12 = vld [vmem:[%s1958_s22 + $0x8] sm:$0xff]  ;;  %v1785_v14 = vld [vmem:[%s1958_s22] sm:$0xff]  ;;  %v1407_v28 = vld [vmem:[%s1986_s30 + $0x10] sm:$0xf]  ;;  %s2075_s9 = scalar_lea.vmem %s2334_s3, %s1396_s6 }
  0x16   : > { %750 = vmatpush.bf16.msra.mxu0 %v1791_v2  ;;  %1802 = vmatpush.bf16.msra.mxu2 %v1791_v2  ;;  %v1794_v13 = vld [vmem:[%s1958_s22 + $0x48] sm:$0xff]  ;;  %v1793_v15 = vld [vmem:[%s1958_s22 + $0x40] sm:$0xff]  ;;  %v1724_v29 = vld [vmem:[%s1986_s30 + $0x14] sm:$0xf0] }
  0x17   : > { %919 = vmatpush.bf16.msra.mxu1 %v1799_v3  ;;  %1810 = vmatpush.bf16.msra.mxu3 %v1799_v3  ;;  %v1399_v16 = vld [vmem:[%s1986_s30] sm:$0xf]  ;;  %v1722_v17 = vld [vmem:[%s1986_s30 + $0x4] sm:$0xf0]  ;;  %v1721_v20 = vld [vmem:[%s1986_s30 + $0x4] sm:$0xf]  ;;  %v1408_v36 = vor.u32 %v1724_v29, %v1407_v28 }
  0x18   : > { %v1527_v18 = vld [vmem:[%s1986_s30 + $0x100] sm:$0xf]  ;;  %v1754_v19 = vld [vmem:[%s1986_s30 + $0x104] sm:$0xf0]  ;;  %v1401_v21 = vld [vmem:[%s1986_s30 + $0x8] sm:$0xf0]  ;;  %v1400_v24 = vor.u32 %v1722_v17, %v1399_v16 }
  0x19   : > { %v1753_v22 = vld [vmem:[%s1986_s30 + $0x104] sm:$0xf]  ;;  %v1529_v23 = vld [vmem:[%s1986_s30 + $0x108] sm:$0xf0]  ;;  %v1528_v25 = vor.u32 %v1754_v19, %v1527_v18  ;;  %v1404_v26 = vor.u32 %v1721_v20, %v1401_v21  ;;  %v1535_v30 = vld [vmem:[%s1986_s30 + $0x110] sm:$0xf] }
  0x1a   : > { %751 = vmatpush.bf16.msra.mxu0 %v1790_v4  ;;  %1803 = vmatpush.bf16.msra.mxu2 %v1790_v4  ;;  %v1532_v27 = vor.u32 %v1753_v22, %v1529_v23  ;;  %v1756_v31 = vld [vmem:[%s1986_s30 + $0x114] sm:$0xf0]  ;;  %v1723_v32 = vld [vmem:[%s1986_s30 + $0x14] sm:$0xf]  ;;  %v1409_v33 = vld [vmem:[%s1986_s30 + $0x18] sm:$0xf0] }
  0x1b   : > { %920 = vmatpush.bf16.msra.mxu1 %v1798_v5  ;;  %1811 = vmatpush.bf16.msra.mxu3 %v1798_v5  ;;  %v1755_v34 = vld [vmem:[%s1986_s30 + $0x114] sm:$0xf]  ;;  %v1537_v35 = vld [vmem:[%s1986_s30 + $0x118] sm:$0xf0]  ;;  %v1536_v37 = vor.u32 %v1756_v31, %v1535_v30  ;;  %v1412_v38 = vor.u32 %v1723_v32, %v1409_v33  ;;  %v1415_v40 = vld [vmem:[%s1986_s30 + $0x20] sm:$0xf] }
  0x1c   : > { %v1540_v39 = vor.u32 %v1755_v34, %v1537_v35  ;;  %v1726_v41 = vld [vmem:[%s1986_s30 + $0x24] sm:$0xf0]  ;;  %v1543_v42 = vld [vmem:[%s1986_s30 + $0x120] sm:$0xf]  ;;  %v1725_v44 = vld [vmem:[%s1986_s30 + $0x24] sm:$0xf] }
  0x1d   : > { %v1758_v43 = vld [vmem:[%s1986_s30 + $0x124] sm:$0xf0]  ;;  %v1417_v45 = vld [vmem:[%s1986_s30 + $0x28] sm:$0xf0]  ;;  %v1757_v46 = vld [vmem:[%s1986_s30 + $0x124] sm:$0xf]  ;;  %v1416_v48 = vor.u32 %v1726_v41, %v1415_v40 }
  0x1e   : > { %752 = vmatpush.bf16.msra.mxu0 %v1789_v6  ;;  %1804 = vmatpush.bf16.msra.mxu2 %v1789_v6  ;;  %v1545_v47 = vld [vmem:[%s1986_s30 + $0x128] sm:$0xf0]  ;;  %v1544_v49 = vor.u32 %v1758_v43, %v1543_v42  ;;  %v1420_v50 = vor.u32 %v1725_v44, %v1417_v45  ;;  %v1423_v52 = vld [vmem:[%s1986_s30 + $0x30] sm:$0xf]  ;;  %v1728_v53 = vld [vmem:[%s1986_s30 + $0x34] sm:$0xf0] }
  0x1f   : > { %921 = vmatpush.bf16.msra.mxu1 %v1797_v7  ;;  %1812 = vmatpush.bf16.msra.mxu3 %v1797_v7  ;;  %v1548_v51 = vor.u32 %v1757_v46, %v1545_v47  ;;  %v1551_v54 = vld [vmem:[%s1986_s30 + $0x130] sm:$0xf]  ;;  %v1760_v55 = vld [vmem:[%s1986_s30 + $0x134] sm:$0xf0]  ;;  %v1727_v56 = vld [vmem:[%s1986_s30 + $0x34] sm:$0xf]  ;;  %v1424_v60 = vor.u32 %v1728_v53, %v1423_v52 }
  0x20   : > { %v1425_v57 = vld [vmem:[%s1986_s30 + $0x38] sm:$0xf0]  ;;  %v1759_v58 = vld [vmem:[%s1986_s30 + $0x134] sm:$0xf]  ;;  %v1552_v61 = vor.u32 %v1760_v55, %v1551_v54  ;;  %v1431_v0 = vld [vmem:[%s1986_s30 + $0x40] sm:$0xf] }
  0x21   : > { %v1553_v59 = vld [vmem:[%s1986_s30 + $0x138] sm:$0xf0]  ;;  %v1428_v62 = vor.u32 %v1727_v56, %v1425_v57  ;;  %v1730_v1 = vld [vmem:[%s1986_s30 + $0x44] sm:$0xf0]  ;;  %v1559_v2 = vld [vmem:[%s1986_s30 + $0x140] sm:$0xf] }
  0x22   : > { %753 = vmatpush.bf16.msra.mxu0 %v1788_v8  ;;  %1805 = vmatpush.bf16.msra.mxu2 %v1788_v8  ;;  %v1556_v63 = vor.u32 %v1759_v58, %v1553_v59  ;;  %v1762_v3 = vld [vmem:[%s1986_s30 + $0x144] sm:$0xf0]  ;;  %v1729_v4 = vld [vmem:[%s1986_s30 + $0x44] sm:$0xf]  ;;  %v1433_v5 = vld [vmem:[%s1986_s30 + $0x48] sm:$0xf0]  ;;  %v1432_v8 = vor.u32 %v1730_v1, %v1431_v0 }
  0x23   : > { %922 = vmatpush.bf16.msra.mxu1 %v1796_v9  ;;  %1813 = vmatpush.bf16.msra.mxu3 %v1796_v9  ;;  %v1761_v6 = vld [vmem:[%s1986_s30 + $0x144] sm:$0xf]  ;;  %v1561_v7 = vld [vmem:[%s1986_s30 + $0x148] sm:$0xf0]  ;;  %v1560_v9 = vor.u32 %v1762_v3, %v1559_v2  ;;  %v1731_v16 = vld [vmem:[%s1986_s30 + $0x54] sm:$0xf] }
  0x24   : > { %v1441_v17 = vld [vmem:[%s1986_s30 + $0x58] sm:$0xf0]  ;;  %v1763_v18 = vld [vmem:[%s1986_s30 + $0x154] sm:$0xf]  ;;  %v1733_v28 = vld [vmem:[%s1986_s30 + $0x64] sm:$0xf] }
  0x25   : > { %v1569_v19 = vld [vmem:[%s1986_s30 + $0x158] sm:$0xf0]  ;;  %v1444_v22 = vor.u32 %v1731_v16, %v1441_v17  ;;  %v1449_v29 = vld [vmem:[%s1986_s30 + $0x68] sm:$0xf0]  ;;  %v1765_v30 = vld [vmem:[%s1986_s30 + $0x164] sm:$0xf] }
  0x26   : > { %754 = vmatpush.bf16.msra.mxu0 %v1787_v10  ;;  %1806 = vmatpush.bf16.msra.mxu2 %v1787_v10  ;;  %v1436_v10 = vor.u32 %v1729_v4, %v1433_v5  ;;  %v1572_v23 = vor.u32 %v1763_v18, %v1569_v19  ;;  %v1577_v31 = vld [vmem:[%s1986_s30 + $0x168] sm:$0xf0]  ;;  %v1452_v34 = vor.u32 %v1733_v28, %v1449_v29  ;;  %v1735_v40 = vld [vmem:[%s1986_s30 + $0x74] sm:$0xf]  ;;  %v1457_v41 = vld [vmem:[%s1986_s30 + $0x78] sm:$0xf0] }
  0x27   : > { %923 = vmatpush.bf16.msra.mxu1 %v1795_v11  ;;  %1814 = vmatpush.bf16.msra.mxu3 %v1795_v11  ;;  %v1564_v11 = vor.u32 %v1761_v6, %v1561_v7  ;;  %v1580_v35 = vor.u32 %v1765_v30, %v1577_v31  ;;  %v1767_v42 = vld [vmem:[%s1986_s30 + $0x174] sm:$0xf]  ;;  %v1585_v43 = vld [vmem:[%s1986_s30 + $0x178] sm:$0xf0]  ;;  %v1460_v46 = vor.u32 %v1735_v40, %v1457_v41  ;;  %v1770_v52 = vld [vmem:[%s1986_s30 + $0x184] sm:$0xf0] }
  0x28   : > { %v1588_v47 = vor.u32 %v1767_v42, %v1585_v43  ;;  %v1737_v53 = vld [vmem:[%s1986_s30 + $0x84] sm:$0xf]  ;;  %v1465_v54 = vld [vmem:[%s1986_s30 + $0x88] sm:$0xf0]  ;;  %v1739_v16 = vld [vmem:[%s1986_s30 + $0x94] sm:$0xf] }
  0x29   : > { %v1769_v55 = vld [vmem:[%s1986_s30 + $0x184] sm:$0xf]  ;;  %v1593_v56 = vld [vmem:[%s1986_s30 + $0x188] sm:$0xf0]  ;;  %v1473_v17 = vld [vmem:[%s1986_s30 + $0x98] sm:$0xf0] }
  0x2a   : > { %755 = vmatpush.bf16.msra.mxu0 %v1786_v12  ;;  %1807 = vmatpush.bf16.msra.mxu2 %v1786_v12  ;;  %v1439_v12 = vld [vmem:[%s1986_s30 + $0x50] sm:$0xf]  ;;  %v1476_v29 = vor.u32 %v1739_v16, %v1473_v17 }
  0x2b   : > { %924 = vmatpush.bf16.msra.mxu1 %v1794_v13  ;;  %1815 = vmatpush.bf16.msra.mxu3 %v1794_v13  ;;  %v1732_v13 = vld [vmem:[%s1986_s30 + $0x54] sm:$0xf0] }
  0x2c   : > { %v1440_v20 = vor.u32 %v1732_v13, %v1439_v12  ;;  %v1740_v13 = vld [vmem:[%s1986_s30 + $0x94] sm:$0xf0] }
  0x2e   : > { %756 = vmatpush.bf16.msra.mxu0 %v1785_v14  ;;  %1808 = vmatpush.bf16.msra.mxu2 %v1785_v14  ;;  %v1567_v14 = vld [vmem:[%s1986_s30 + $0x150] sm:$0xf] }
  0x2f   : > { %925 = vmatpush.bf16.msra.mxu1 %v1793_v15  ;;  %1816 = vmatpush.bf16.msra.mxu3 %v1793_v15  ;;  %v1764_v15 = vld [vmem:[%s1986_s30 + $0x154] sm:$0xf0] }
  0x30   : > { %v1568_v21 = vor.u32 %v1764_v15, %v1567_v14  ;;  %v1599_v14 = vld [vmem:[%s1986_s30 + $0x190] sm:$0xf]  ;;  %v1772_v15 = vld [vmem:[%s1986_s30 + $0x194] sm:$0xf0] }
  0x31   : > { %757 = vmatmul.bf16.vlgmr.msra.gmra.mxu0 %v1400_v24  ;;  %837 = vmatmul.bf16.vlgmr.msra.gmra.mxu2 %v1528_v25  ;;  %v1447_v24 = vld [vmem:[%s1986_s30 + $0x60] sm:$0xf]  ;;  %v1734_v25 = vld [vmem:[%s1986_s30 + $0x64] sm:$0xf0] }
  0x32   : > { %926 = vmatmul.bf16.vlgmr.msra.gmra.mxu1 %v1404_v26  ;;  %1006 = vmatmul.bf16.vlgmr.msra.gmra.mxu3 %v1532_v27  ;;  %v1575_v26 = vld [vmem:[%s1986_s30 + $0x160] sm:$0xf]  ;;  %v1766_v27 = vld [vmem:[%s1986_s30 + $0x164] sm:$0xf0]  ;;  %v1448_v32 = vor.u32 %v1734_v25, %v1447_v24 }
  0x33   : > { %v1576_v33 = vor.u32 %v1766_v27, %v1575_v26  ;;  %v1600_v27 = vor.u32 %v1772_v15, %v1599_v14 }
  0x41   : > { %762 = vmatmul.bf16.gmra.mxu0 %v1408_v36  ;;  %842 = vmatmul.bf16.gmra.mxu2 %v1536_v37  ;;  %v1455_v36 = vld [vmem:[%s1986_s30 + $0x70] sm:$0xf]  ;;  %v1736_v37 = vld [vmem:[%s1986_s30 + $0x74] sm:$0xf0] }
  0x42   : > { %931 = vmatmul.bf16.gmra.mxu1 %v1412_v38  ;;  %1011 = vmatmul.bf16.gmra.mxu3 %v1540_v39  ;;  %v1583_v38 = vld [vmem:[%s1986_s30 + $0x170] sm:$0xf]  ;;  %v1768_v39 = vld [vmem:[%s1986_s30 + $0x174] sm:$0xf0]  ;;  %v1456_v44 = vor.u32 %v1736_v37, %v1455_v36 }
  0x43   : > { %v1584_v45 = vor.u32 %v1768_v39, %v1583_v38 }
  0x51   : > { %767 = vmatmul.bf16.gmra.mxu0 %v1416_v48  ;;  %847 = vmatmul.bf16.gmra.mxu2 %v1544_v49  ;;  %v2060_v48 = vld [vmem:[%s1978_s26] ss:$0 sm:$0xff] }
  0x52   : > { %936 = vmatmul.bf16.gmra.mxu1 %v1420_v50  ;;  %1016 = vmatmul.bf16.gmra.mxu3 %v1548_v51  ;;  %v1463_v49 = vld [vmem:[%s1986_s30 + $0x80] sm:$0xf]  ;;  %v1738_v50 = vld [vmem:[%s1986_s30 + $0x84] sm:$0xf0] }
  0x53   : > { %v1591_v51 = vld [vmem:[%s1986_s30 + $0x180] sm:$0xf]  ;;  %v1464_v57 = vor.u32 %v1738_v50, %v1463_v49  ;;  %v1742_v50 = vld [vmem:[%s1986_s30 + $0xa4] sm:$0xf0] }
  0x54   : > { %v1592_v58 = vor.u32 %v1770_v52, %v1591_v51  ;;  %v1607_v51 = vld [vmem:[%s1986_s30 + $0x1a0] sm:$0xf]  ;;  %v1774_v52 = vld [vmem:[%s1986_s30 + $0x1a4] sm:$0xf0] }
  0x61   : > { %772 = vmatmul.bf16.gmra.mxu0 %v1424_v60  ;;  %852 = vmatmul.bf16.gmra.mxu2 %v1552_v61  ;;  %v1468_v60 = vor.u32 %v1737_v53, %v1465_v54  ;;  %v1596_v61 = vor.u32 %v1769_v55, %v1593_v56  ;;  %v1741_v53 = vld [vmem:[%s1986_s30 + $0xa4] sm:$0xf]  ;;  %v1481_v54 = vld [vmem:[%s1986_s30 + $0xa8] sm:$0xf0] }
  0x62   : > { %941 = vmatmul.bf16.gmra.mxu1 %v1428_v62  ;;  %1021 = vmatmul.bf16.gmra.mxu3 %v1556_v63 }
  0x71   : > { %777 = vmatmul.bf16.gmra.mxu0 %v1432_v8  ;;  %857 = vmatmul.bf16.gmra.mxu2 %v1560_v9 }
  0x72   : > { %946 = vmatmul.bf16.gmra.mxu1 %v1436_v10  ;;  %1026 = vmatmul.bf16.gmra.mxu3 %v1564_v11  ;;  %v1471_v10 = vld [vmem:[%s1986_s30 + $0x90] sm:$0xf] }
  0x73   : > { %v1472_v26 = vor.u32 %v1740_v13, %v1471_v10 }
  0x81   : > { %782 = vmatmul.bf16.gmra.mxu0 %v1440_v20  ;;  %862 = vmatmul.bf16.gmra.mxu2 %v1568_v21  ;;  %v1771_v20 = vld [vmem:[%s1986_s30 + $0x194] sm:$0xf]  ;;  %v1601_v21 = vld [vmem:[%s1986_s30 + $0x198] sm:$0xf0] }
  0x82   : > { %951 = vmatmul.bf16.gmra.mxu1 %v1444_v22  ;;  %1031 = vmatmul.bf16.gmra.mxu3 %v1572_v23  ;;  %v1604_v30 = vor.u32 %v1771_v20, %v1601_v21 }
  0x91   : > { %787 = vmatmul.bf16.gmra.mxu0 %v1448_v32  ;;  %867 = vmatmul.bf16.gmra.mxu2 %v1576_v33 }
  0x92   : > { %956 = vmatmul.bf16.gmra.mxu1 %v1452_v34  ;;  %1036 = vmatmul.bf16.gmra.mxu3 %v1580_v35 }
  0xa1   : > { %792 = vmatmul.bf16.gmra.mxu0 %v1456_v44  ;;  %872 = vmatmul.bf16.gmra.mxu2 %v1584_v45 }
  0xa2   : > { %961 = vmatmul.bf16.gmra.mxu1 %v1460_v46  ;;  %1041 = vmatmul.bf16.gmra.mxu3 %v1588_v47  ;;  %v1479_v46 = vld [vmem:[%s1986_s30 + $0xa0] sm:$0xf] }
  0xae   : > { %v758_v59 = vpop.f32.mrf.mxu0 }
  0xaf   : > { %v759_v62 = vadd.f32 %v2060_v48, %v758_v59  ;;  %v927_v63 = vpop.f32.mrf.mxu1 }
  0xb1   : > { %v928_v0 = vadd.f32 %v927_v63, %v759_v62  ;;  %797 = vmatmul.bf16.gmra.mxu0 %v1464_v57  ;;  %877 = vmatmul.bf16.gmra.mxu2 %v1592_v58  ;;  %v1773_v57 = vld [vmem:[%s1986_s30 + $0x1a4] sm:$0xf]  ;;  %v1609_v58 = vld [vmem:[%s1986_s30 + $0x1a8] sm:$0xf0]  ;;  %v1480_v63 = vor.u32 %v1742_v50, %v1479_v46 }
  0xb2   : > { %966 = vmatmul.bf16.gmra.mxu1 %v1468_v60  ;;  %1046 = vmatmul.bf16.gmra.mxu3 %v1596_v61 }
  0xb3   : > { %v1087_v1 = vmax.f32 %v928_v0, 0.0  ;;  %v1608_v0 = vor.u32 %v1774_v52, %v1607_v51 }
  0xb4   : > { %v838_v2 = vpop.f32.mrf.mxu2 }
  0xb5   : > { %v1151_v3 = vpack.c.bf16 %v1087_v1, %v1087_v1  ;;  %v839_v4 = vadd.f32 %v2060_v48, %v838_v2  ;;  %v1007_v5 = vpop.f32.mrf.mxu3  ;;  %v1484_v2 = vor.u32 %v1741_v53, %v1481_v54 }
  0xb6   : > { %v760_v6 = vpop.f32.mrf.mxu0 }
  0xb7   : > { %1216 = vst.msk [vmem:[%s2075_s9] sm:$0xf] %vm1215_vm0, %v1151_v3  ;;  %v1008_v7 = vadd.f32 %v1007_v5, %v839_v4  ;;  %v761_v8 = vadd.f32 %v2060_v48, %v760_v6  ;;  %v929_v9 = vpop.f32.mrf.mxu1  ;;  %v1612_v3 = vor.u32 %v1773_v57, %v1609_v58 }
  0xb9   : > { %v1119_v11 = vmax.f32 %v1008_v7, 0.0  ;;  %v930_v12 = vadd.f32 %v929_v9, %v761_v8 }
  0xbb   : > { %v1183_v18 = vpack.c.bf16 %v1119_v11, %v1119_v11  ;;  %v1088_v19 = vmax.f32 %v930_v12, 0.0 }
  0xbc   : > { %v840_v22 = vpop.f32.mrf.mxu2 }
  0xbd   : > { %1248 = vst.msk [vmem:[%s2075_s9 + $0x80] sm:$0xf] %vm1215_vm0, %v1183_v18  ;;  %v1152_v23 = vpack.c.bf16 %v1088_v19, %v1088_v19  ;;  %v841_v24 = vadd.f32 %v2060_v48, %v840_v22  ;;  %v1009_v25 = vpop.f32.mrf.mxu3  ;;  %v1487_v19 = vld [vmem:[%s1986_s30 + $0xb0] sm:$0xf]  ;;  %v1744_v22 = vld [vmem:[%s1986_s30 + $0xb4] sm:$0xf0] }
  0xbe   : > { %v763_v28 = vpop.f32.mrf.mxu0 }
  0xbf   : > { %1217 = vst.msk [vmem:[%s2075_s9 + $0x4] sm:$0xf] %vm1215_vm0, %v1152_v23  ;;  %v1010_v31 = vadd.f32 %v1009_v25, %v841_v24  ;;  %v764_v32 = vadd.f32 %v2060_v48, %v763_v28  ;;  %v932_v33 = vpop.f32.mrf.mxu1  ;;  %v1615_v23 = vld [vmem:[%s1986_s30 + $0x1b0] sm:$0xf]  ;;  %v1776_v24 = vld [vmem:[%s1986_s30 + $0x1b4] sm:$0xf0] }
  0xc0   : > { %v1743_v25 = vld [vmem:[%s1986_s30 + $0xb4] sm:$0xf] }
  0xc1   : > { %v1120_v34 = vmax.f32 %v1010_v31, 0.0  ;;  %v933_v35 = vadd.f32 %v932_v33, %v764_v32  ;;  %802 = vmatmul.bf16.gmra.mxu0 %v1472_v26  ;;  %882 = vmatmul.bf16.gmra.mxu2 %v1600_v27  ;;  %v1489_v26 = vld [vmem:[%s1986_s30 + $0xb8] sm:$0xf0] }
  0xc2   : > { %971 = vmatmul.bf16.gmra.mxu1 %v1476_v29  ;;  %1051 = vmatmul.bf16.gmra.mxu3 %v1604_v30  ;;  %v1775_v29 = vld [vmem:[%s1986_s30 + $0x1b4] sm:$0xf]  ;;  %v1617_v30 = vld [vmem:[%s1986_s30 + $0x1b8] sm:$0xf0] }
  0xc3   : > { %v1184_v36 = vpack.c.bf16 %v1120_v34, %v1120_v34  ;;  %v1089_v37 = vmax.f32 %v933_v35, 0.0  ;;  %v1488_v35 = vor.u32 %v1744_v22, %v1487_v19 }
  0xc4   : > { %v843_v38 = vpop.f32.mrf.mxu2 }
  0xc5   : > { %1249 = vst.msk [vmem:[%s2075_s9 + $0x84] sm:$0xf] %vm1215_vm0, %v1184_v36  ;;  %v1153_v39 = vpack.c.bf16 %v1089_v37, %v1089_v37  ;;  %v844_v40 = vadd.f32 %v2060_v48, %v843_v38  ;;  %v1012_v41 = vpop.f32.mrf.mxu3  ;;  %v1616_v36 = vor.u32 %v1776_v24, %v1615_v23  ;;  %v1492_v38 = vor.u32 %v1743_v25, %v1489_v26 }
  0xc6   : > { %v765_v42 = vpop.f32.mrf.mxu0 }
  0xc7   : > { %1218 = vst.msk [vmem:[%s2075_s9 + $0x8] sm:$0xf] %vm1215_vm0, %v1153_v39  ;;  %v1013_v43 = vadd.f32 %v1012_v41, %v844_v40  ;;  %v766_v44 = vadd.f32 %v2060_v48, %v765_v42  ;;  %v934_v45 = vpop.f32.mrf.mxu1  ;;  %v1620_v39 = vor.u32 %v1775_v29, %v1617_v30 }
  0xc9   : > { %v1121_v47 = vmax.f32 %v1013_v43, 0.0  ;;  %v935_v49 = vadd.f32 %v934_v45, %v766_v44 }
  0xcb   : > { %v1185_v55 = vpack.c.bf16 %v1121_v47, %v1121_v47  ;;  %v1090_v56 = vmax.f32 %v935_v49, 0.0 }
  0xcc   : > { %v845_v59 = vpop.f32.mrf.mxu2 }
  0xcd   : > { %1250 = vst.msk [vmem:[%s2075_s9 + $0x88] sm:$0xf] %vm1215_vm0, %v1185_v55  ;;  %v1154_v60 = vpack.c.bf16 %v1090_v56, %v1090_v56  ;;  %v846_v61 = vadd.f32 %v2060_v48, %v845_v59  ;;  %v1014_v62 = vpop.f32.mrf.mxu3  ;;  %v1495_v56 = vld [vmem:[%s1986_s30 + $0xc0] sm:$0xf]  ;;  %v1746_v59 = vld [vmem:[%s1986_s30 + $0xc4] sm:$0xf0] }
  0xce   : > { %v768_v1 = vpop.f32.mrf.mxu0 }
  0xcf   : > { %1219 = vst.msk [vmem:[%s2075_s9 + $0xc] sm:$0xf] %vm1215_vm0, %v1154_v60  ;;  %v1015_v4 = vadd.f32 %v1014_v62, %v846_v61  ;;  %v769_v5 = vadd.f32 %v2060_v48, %v768_v1  ;;  %v937_v6 = vpop.f32.mrf.mxu1  ;;  %v1623_v60 = vld [vmem:[%s1986_s30 + $0x1c0] sm:$0xf]  ;;  %v1778_v61 = vld [vmem:[%s1986_s30 + $0x1c4] sm:$0xf0] }
  0xd0   : > { %v1745_v62 = vld [vmem:[%s1986_s30 + $0xc4] sm:$0xf] }
  0xd1   : > { %v1122_v7 = vmax.f32 %v1015_v4, 0.0  ;;  %v938_v8 = vadd.f32 %v937_v6, %v769_v5  ;;  %807 = vmatmul.bf16.gmra.mxu0 %v1480_v63  ;;  %887 = vmatmul.bf16.gmra.mxu2 %v1608_v0  ;;  %v1497_v63 = vld [vmem:[%s1986_s30 + $0xc8] sm:$0xf0] }
  0xd2   : > { %976 = vmatmul.bf16.gmra.mxu1 %v1484_v2  ;;  %1056 = vmatmul.bf16.gmra.mxu3 %v1612_v3  ;;  %v1777_v2 = vld [vmem:[%s1986_s30 + $0x1c4] sm:$0xf]  ;;  %v1625_v3 = vld [vmem:[%s1986_s30 + $0x1c8] sm:$0xf0] }
  0xd3   : > { %v1186_v9 = vpack.c.bf16 %v1122_v7, %v1122_v7  ;;  %v1091_v10 = vmax.f32 %v938_v8, 0.0  ;;  %v1496_v8 = vor.u32 %v1746_v59, %v1495_v56 }
  0xd4   : > { %v848_v11 = vpop.f32.mrf.mxu2 }
  0xd5   : > { %1251 = vst.msk [vmem:[%s2075_s9 + $0x8c] sm:$0xf] %vm1215_vm0, %v1186_v9  ;;  %v1155_v12 = vpack.c.bf16 %v1091_v10, %v1091_v10  ;;  %v849_v13 = vadd.f32 %v2060_v48, %v848_v11  ;;  %v1017_v14 = vpop.f32.mrf.mxu3  ;;  %v1624_v9 = vor.u32 %v1778_v61, %v1623_v60  ;;  %v1500_v11 = vor.u32 %v1745_v62, %v1497_v63 }
  0xd6   : > { %v770_v15 = vpop.f32.mrf.mxu0 }
  0xd7   : > { %1220 = vst.msk [vmem:[%s2075_s9 + $0x10] sm:$0xf] %vm1215_vm0, %v1155_v12  ;;  %v1018_v16 = vadd.f32 %v1017_v14, %v849_v13  ;;  %v771_v17 = vadd.f32 %v2060_v48, %v770_v15  ;;  %v939_v18 = vpop.f32.mrf.mxu1  ;;  %v1628_v12 = vor.u32 %v1777_v2, %v1625_v3 }
  0xd9   : > { %v1123_v20 = vmax.f32 %v1018_v16, 0.0  ;;  %v940_v21 = vadd.f32 %v939_v18, %v771_v17 }
  0xdb   : > { %v1187_v27 = vpack.c.bf16 %v1123_v20, %v1123_v20  ;;  %v1092_v28 = vmax.f32 %v940_v21, 0.0 }
  0xdc   : > { %v850_v31 = vpop.f32.mrf.mxu2 }
  0xdd   : > { %1252 = vst.msk [vmem:[%s2075_s9 + $0x90] sm:$0xf] %vm1215_vm0, %v1187_v27  ;;  %v1156_v32 = vpack.c.bf16 %v1092_v28, %v1092_v28  ;;  %v851_v33 = vadd.f32 %v2060_v48, %v850_v31  ;;  %v1019_v34 = vpop.f32.mrf.mxu3  ;;  %v1503_v28 = vld [vmem:[%s1986_s30 + $0xd0] sm:$0xf]  ;;  %v1748_v31 = vld [vmem:[%s1986_s30 + $0xd4] sm:$0xf0] }
  0xde   : > { %v773_v37 = vpop.f32.mrf.mxu0 }
  0xdf   : > { %1221 = vst.msk [vmem:[%s2075_s9 + $0x14] sm:$0xf] %vm1215_vm0, %v1156_v32  ;;  %v1020_v40 = vadd.f32 %v1019_v34, %v851_v33  ;;  %v774_v41 = vadd.f32 %v2060_v48, %v773_v37  ;;  %v942_v42 = vpop.f32.mrf.mxu1  ;;  %v1631_v32 = vld [vmem:[%s1986_s30 + $0x1d0] sm:$0xf]  ;;  %v1780_v33 = vld [vmem:[%s1986_s30 + $0x1d4] sm:$0xf0] }
  0xe0   : > { %v1747_v34 = vld [vmem:[%s1986_s30 + $0xd4] sm:$0xf] }
  0xe1   : > { %v1124_v43 = vmax.f32 %v1020_v40, 0.0  ;;  %v943_v44 = vadd.f32 %v942_v42, %v774_v41  ;;  %812 = vmatmul.bf16.gmra.mxu0 %v1488_v35  ;;  %892 = vmatmul.bf16.gmra.mxu2 %v1616_v36  ;;  %v1505_v35 = vld [vmem:[%s1986_s30 + $0xd8] sm:$0xf0] }
  0xe2   : > { %981 = vmatmul.bf16.gmra.mxu1 %v1492_v38  ;;  %1061 = vmatmul.bf16.gmra.mxu3 %v1620_v39  ;;  %v1779_v38 = vld [vmem:[%s1986_s30 + $0x1d4] sm:$0xf]  ;;  %v1633_v39 = vld [vmem:[%s1986_s30 + $0x1d8] sm:$0xf0] }
  0xe3   : > { %v1188_v45 = vpack.c.bf16 %v1124_v43, %v1124_v43  ;;  %v1093_v46 = vmax.f32 %v943_v44, 0.0  ;;  %v1504_v44 = vor.u32 %v1748_v31, %v1503_v28 }
  0xe4   : > { %v853_v47 = vpop.f32.mrf.mxu2 }
  0xe5   : > { %1253 = vst.msk [vmem:[%s2075_s9 + $0x94] sm:$0xf] %vm1215_vm0, %v1188_v45  ;;  %v1157_v49 = vpack.c.bf16 %v1093_v46, %v1093_v46  ;;  %v854_v50 = vadd.f32 %v2060_v48, %v853_v47  ;;  %v1022_v51 = vpop.f32.mrf.mxu3  ;;  %v1632_v45 = vor.u32 %v1780_v33, %v1631_v32  ;;  %v1508_v47 = vor.u32 %v1747_v34, %v1505_v35 }
  0xe6   : > { %v775_v52 = vpop.f32.mrf.mxu0 }
  0xe7   : > { %1222 = vst.msk [vmem:[%s2075_s9 + $0x18] sm:$0xf] %vm1215_vm0, %v1157_v49  ;;  %v1023_v53 = vadd.f32 %v1022_v51, %v854_v50  ;;  %v776_v54 = vadd.f32 %v2060_v48, %v775_v52  ;;  %v944_v55 = vpop.f32.mrf.mxu1  ;;  %v1636_v49 = vor.u32 %v1779_v38, %v1633_v39 }
  0xe9   : > { %v1125_v57 = vmax.f32 %v1023_v53, 0.0  ;;  %v945_v58 = vadd.f32 %v944_v55, %v776_v54 }
  0xeb   : > { %v1189_v0 = vpack.c.bf16 %v1125_v57, %v1125_v57  ;;  %v1094_v1 = vmax.f32 %v945_v58, 0.0 }
  0xec   : > { %v855_v4 = vpop.f32.mrf.mxu2 }
  0xed   : > { %1254 = vst.msk [vmem:[%s2075_s9 + $0x98] sm:$0xf] %vm1215_vm0, %v1189_v0  ;;  %v1158_v5 = vpack.c.bf16 %v1094_v1, %v1094_v1  ;;  %v856_v6 = vadd.f32 %v2060_v48, %v855_v4  ;;  %v1024_v7 = vpop.f32.mrf.mxu3  ;;  %v1511_v1 = vld [vmem:[%s1986_s30 + $0xe0] sm:$0xf]  ;;  %v1750_v4 = vld [vmem:[%s1986_s30 + $0xe4] sm:$0xf0] }
  0xee   : > { %v778_v10 = vpop.f32.mrf.mxu0 }
  0xef   : > { %1223 = vst.msk [vmem:[%s2075_s9 + $0x1c] sm:$0xf] %vm1215_vm0, %v1158_v5  ;;  %v1025_v13 = vadd.f32 %v1024_v7, %v856_v6  ;;  %v779_v14 = vadd.f32 %v2060_v48, %v778_v10  ;;  %v947_v15 = vpop.f32.mrf.mxu1  ;;  %v1639_v5 = vld [vmem:[%s1986_s30 + $0x1e0] sm:$0xf]  ;;  %v1782_v6 = vld [vmem:[%s1986_s30 + $0x1e4] sm:$0xf0] }
  0xf0   : > { %v1749_v7 = vld [vmem:[%s1986_s30 + $0xe4] sm:$0xf] }
  0xf1   : > { %v1126_v16 = vmax.f32 %v1025_v13, 0.0  ;;  %v948_v17 = vadd.f32 %v947_v15, %v779_v14  ;;  %817 = vmatmul.bf16.gmra.mxu0 %v1496_v8  ;;  %897 = vmatmul.bf16.gmra.mxu2 %v1624_v9  ;;  %v1513_v8 = vld [vmem:[%s1986_s30 + $0xe8] sm:$0xf0] }
  0xf2   : > { %986 = vmatmul.bf16.gmra.mxu1 %v1500_v11  ;;  %1066 = vmatmul.bf16.gmra.mxu3 %v1628_v12  ;;  %v1781_v11 = vld [vmem:[%s1986_s30 + $0x1e4] sm:$0xf]  ;;  %v1641_v12 = vld [vmem:[%s1986_s30 + $0x1e8] sm:$0xf0] }
  0xf3   : > { %v1190_v18 = vpack.c.bf16 %v1126_v16, %v1126_v16  ;;  %v1095_v19 = vmax.f32 %v948_v17, 0.0  ;;  %v1512_v17 = vor.u32 %v1750_v4, %v1511_v1 }
  0xf4   : > { %v858_v20 = vpop.f32.mrf.mxu2 }
  0xf5   : > { %1255 = vst.msk [vmem:[%s2075_s9 + $0x9c] sm:$0xf] %vm1215_vm0, %v1190_v18  ;;  %v1159_v21 = vpack.c.bf16 %v1095_v19, %v1095_v19  ;;  %v859_v22 = vadd.f32 %v2060_v48, %v858_v20  ;;  %v1027_v23 = vpop.f32.mrf.mxu3  ;;  %v1640_v18 = vor.u32 %v1782_v6, %v1639_v5  ;;  %v1516_v20 = vor.u32 %v1749_v7, %v1513_v8 }
  0xf6   : > { %v780_v24 = vpop.f32.mrf.mxu0 }
  0xf7   : > { %1224 = vst.msk [vmem:[%s2075_s9 + $0x20] sm:$0xf] %vm1215_vm0, %v1159_v21  ;;  %v1028_v25 = vadd.f32 %v1027_v23, %v859_v22  ;;  %v781_v26 = vadd.f32 %v2060_v48, %v780_v24  ;;  %v949_v27 = vpop.f32.mrf.mxu1  ;;  %v1644_v21 = vor.u32 %v1781_v11, %v1641_v12 }
  0xf9   : > { %v1127_v29 = vmax.f32 %v1028_v25, 0.0  ;;  %v950_v30 = vadd.f32 %v949_v27, %v781_v26 }
  0xfb   : > { %v1191_v36 = vpack.c.bf16 %v1127_v29, %v1127_v29  ;;  %v1096_v37 = vmax.f32 %v950_v30, 0.0 }
  0xfc   : > { %v860_v40 = vpop.f32.mrf.mxu2 }
  0xfd   : > { %1256 = vst.msk [vmem:[%s2075_s9 + $0xa0] sm:$0xf] %vm1215_vm0, %v1191_v36  ;;  %v1160_v41 = vpack.c.bf16 %v1096_v37, %v1096_v37  ;;  %v861_v42 = vadd.f32 %v2060_v48, %v860_v40  ;;  %v1029_v43 = vpop.f32.mrf.mxu3  ;;  %v1519_v37 = vld [vmem:[%s1986_s30 + $0xf0] sm:$0xf]  ;;  %v1752_v40 = vld [vmem:[%s1986_s30 + $0xf4] sm:$0xf0] }
  0xfe   : > { %v783_v46 = vpop.f32.mrf.mxu0 }
  0xff   : > { %1225 = vst.msk [vmem:[%s2075_s9 + $0x24] sm:$0xf] %vm1215_vm0, %v1160_v41  ;;  %v1030_v50 = vadd.f32 %v1029_v43, %v861_v42  ;;  %v784_v51 = vadd.f32 %v2060_v48, %v783_v46  ;;  %v952_v52 = vpop.f32.mrf.mxu1  ;;  %v1647_v41 = vld [vmem:[%s1986_s30 + $0x1f0] sm:$0xf]  ;;  %v1784_v42 = vld [vmem:[%s1986_s30 + $0x1f4] sm:$0xf0] }
 0x100   : > { %v1751_v43 = vld [vmem:[%s1986_s30 + $0xf4] sm:$0xf] }
 0x101   : > { %v1128_v53 = vmax.f32 %v1030_v50, 0.0  ;;  %v953_v54 = vadd.f32 %v952_v52, %v784_v51  ;;  %822 = vmatmul.bf16.gmra.mxu0 %v1504_v44  ;;  %902 = vmatmul.bf16.gmra.mxu2 %v1632_v45  ;;  %v1521_v44 = vld [vmem:[%s1986_s30 + $0xf8] sm:$0xf0] }
 0x102   : > { %991 = vmatmul.bf16.gmra.mxu1 %v1508_v47  ;;  %1071 = vmatmul.bf16.gmra.mxu3 %v1636_v49  ;;  %v1783_v47 = vld [vmem:[%s1986_s30 + $0x1f4] sm:$0xf]  ;;  %v1649_v49 = vld [vmem:[%s1986_s30 + $0x1f8] sm:$0xf0] }
 0x103   : > { %v1192_v55 = vpack.c.bf16 %v1128_v53, %v1128_v53  ;;  %v1097_v56 = vmax.f32 %v953_v54, 0.0  ;;  %v1520_v54 = vor.u32 %v1752_v40, %v1519_v37 }
 0x104   : > { %v863_v57 = vpop.f32.mrf.mxu2 }
 0x105   : > { %1257 = vst.msk [vmem:[%s2075_s9 + $0xa4] sm:$0xf] %vm1215_vm0, %v1192_v55  ;;  %v1161_v58 = vpack.c.bf16 %v1097_v56, %v1097_v56  ;;  %v864_v59 = vadd.f32 %v2060_v48, %v863_v57  ;;  %v1032_v60 = vpop.f32.mrf.mxu3  ;;  %v1648_v55 = vor.u32 %v1784_v42, %v1647_v41  ;;  %v1524_v57 = vor.u32 %v1751_v43, %v1521_v44 }
 0x106   : > { %v785_v61 = vpop.f32.mrf.mxu0 }
 0x107   : > { %1226 = vst.msk [vmem:[%s2075_s9 + $0x28] sm:$0xf] %vm1215_vm0, %v1161_v58  ;;  %v1033_v62 = vadd.f32 %v1032_v60, %v864_v59  ;;  %v786_v63 = vadd.f32 %v2060_v48, %v785_v61  ;;  %v954_v0 = vpop.f32.mrf.mxu1  ;;  %v1652_v58 = vor.u32 %v1783_v47, %v1649_v49 }
 0x109   : > { %v1129_v2 = vmax.f32 %v1033_v62, 0.0  ;;  %v955_v3 = vadd.f32 %v954_v0, %v786_v63 }
 0x10b   : > { %v1193_v9 = vpack.c.bf16 %v1129_v2, %v1129_v2  ;;  %v1098_v10 = vmax.f32 %v955_v3, 0.0 }
 0x10c   : > { %v865_v13 = vpop.f32.mrf.mxu2 }
 0x10d   : > { %1258 = vst.msk [vmem:[%s2075_s9 + $0xa8] sm:$0xf] %vm1215_vm0, %v1193_v9  ;;  %v1162_v14 = vpack.c.bf16 %v1098_v10, %v1098_v10  ;;  %v866_v15 = vadd.f32 %v2060_v48, %v865_v13  ;;  %v1034_v16 = vpop.f32.mrf.mxu3 }
 0x10e   : > { %v788_v19 = vpop.f32.mrf.mxu0 }
 0x10f   : > { %1227 = vst.msk [vmem:[%s2075_s9 + $0x2c] sm:$0xf] %vm1215_vm0, %v1162_v14  ;;  %v1035_v22 = vadd.f32 %v1034_v16, %v866_v15  ;;  %v789_v23 = vadd.f32 %v2060_v48, %v788_v19  ;;  %v957_v24 = vpop.f32.mrf.mxu1 }
 0x111   : > { %v1130_v25 = vmax.f32 %v1035_v22, 0.0  ;;  %v958_v26 = vadd.f32 %v957_v24, %v789_v23  ;;  %827 = vmatmul.bf16.gmra.mxu0 %v1512_v17  ;;  %907 = vmatmul.bf16.gmra.mxu2 %v1640_v18 }
 0x112   : > { %996 = vmatmul.bf16.gmra.mxu1 %v1516_v20  ;;  %1076 = vmatmul.bf16.gmra.mxu3 %v1644_v21 }
 0x113   : > { %v1194_v27 = vpack.c.bf16 %v1130_v25, %v1130_v25  ;;  %v1099_v28 = vmax.f32 %v958_v26, 0.0 }
 0x114   : > { %v868_v29 = vpop.f32.mrf.mxu2 }
 0x115   : > { %1259 = vst.msk [vmem:[%s2075_s9 + $0xac] sm:$0xf] %vm1215_vm0, %v1194_v27  ;;  %v1163_v30 = vpack.c.bf16 %v1099_v28, %v1099_v28  ;;  %v869_v31 = vadd.f32 %v2060_v48, %v868_v29  ;;  %v1037_v32 = vpop.f32.mrf.mxu3 }
 0x116   : > { %v790_v33 = vpop.f32.mrf.mxu0 }
 0x117   : > { %1228 = vst.msk [vmem:[%s2075_s9 + $0x30] sm:$0xf] %vm1215_vm0, %v1163_v30  ;;  %v1038_v34 = vadd.f32 %v1037_v32, %v869_v31  ;;  %v791_v35 = vadd.f32 %v2060_v48, %v790_v33  ;;  %v959_v36 = vpop.f32.mrf.mxu1 }
 0x119   : > { %v1131_v38 = vmax.f32 %v1038_v34, 0.0  ;;  %v960_v39 = vadd.f32 %v959_v36, %v791_v35 }
 0x11b   : > { %v1195_v45 = vpack.c.bf16 %v1131_v38, %v1131_v38  ;;  %v1100_v46 = vmax.f32 %v960_v39, 0.0 }
 0x11c   : > { %v870_v50 = vpop.f32.mrf.mxu2 }
 0x11d   : > { %1260 = vst.msk [vmem:[%s2075_s9 + $0xb0] sm:$0xf] %vm1215_vm0, %v1195_v45  ;;  %v1164_v51 = vpack.c.bf16 %v1100_v46, %v1100_v46  ;;  %v871_v52 = vadd.f32 %v2060_v48, %v870_v50  ;;  %v1039_v53 = vpop.f32.mrf.mxu3 }
 0x11e   : > { %v793_v56 = vpop.f32.mrf.mxu0 }
 0x11f   : > { %1229 = vst.msk [vmem:[%s2075_s9 + $0x34] sm:$0xf] %vm1215_vm0, %v1164_v51  ;;  %v1040_v59 = vadd.f32 %v1039_v53, %v871_v52  ;;  %v794_v60 = vadd.f32 %v2060_v48, %v793_v56  ;;  %v962_v61 = vpop.f32.mrf.mxu1 }
 0x121   : > { %v1132_v62 = vmax.f32 %v1040_v59, 0.0  ;;  %v963_v63 = vadd.f32 %v962_v61, %v794_v60  ;;  %832 = vmatmul.bf16.gmra.mxu0 %v1520_v54  ;;  %912 = vmatmul.bf16.gmra.mxu2 %v1648_v55 }
 0x122   : > { %1001 = vmatmul.bf16.gmra.mxu1 %v1524_v57  ;;  %1081 = vmatmul.bf16.gmra.mxu3 %v1652_v58 }
 0x123   : > { %v1196_v0 = vpack.c.bf16 %v1132_v62, %v1132_v62  ;;  %v1101_v1 = vmax.f32 %v963_v63, 0.0 }
 0x124   : > { %v873_v2 = vpop.f32.mrf.mxu2 }
 0x125   : > { %1261 = vst.msk [vmem:[%s2075_s9 + $0xb4] sm:$0xf] %vm1215_vm0, %v1196_v0  ;;  %v1165_v3 = vpack.c.bf16 %v1101_v1, %v1101_v1  ;;  %v874_v4 = vadd.f32 %v2060_v48, %v873_v2  ;;  %v1042_v5 = vpop.f32.mrf.mxu3 }
 0x126   : > { %v795_v6 = vpop.f32.mrf.mxu0 }
 0x127   : > { %1230 = vst.msk [vmem:[%s2075_s9 + $0x38] sm:$0xf] %vm1215_vm0, %v1165_v3  ;;  %v1043_v7 = vadd.f32 %v1042_v5, %v874_v4  ;;  %v796_v8 = vadd.f32 %v2060_v48, %v795_v6  ;;  %v964_v9 = vpop.f32.mrf.mxu1 }
 0x129   : > { %v1133_v10 = vmax.f32 %v1043_v7, 0.0  ;;  %v965_v11 = vadd.f32 %v964_v9, %v796_v8 }
 0x12b   : > { %v1197_v12 = vpack.c.bf16 %v1133_v10, %v1133_v10  ;;  %v1102_v13 = vmax.f32 %v965_v11, 0.0 }
 0x12c   : > { %v875_v14 = vpop.f32.mrf.mxu2 }
 0x12d   : > { %1262 = vst.msk [vmem:[%s2075_s9 + $0xb8] sm:$0xf] %vm1215_vm0, %v1197_v12  ;;  %v1166_v15 = vpack.c.bf16 %v1102_v13, %v1102_v13  ;;  %v876_v16 = vadd.f32 %v2060_v48, %v875_v14  ;;  %v1044_v17 = vpop.f32.mrf.mxu3 }
 0x12e   : > { %v798_v18 = vpop.f32.mrf.mxu0 }
 0x12f   : > { %1231 = vst.msk [vmem:[%s2075_s9 + $0x3c] sm:$0xf] %vm1215_vm0, %v1166_v15  ;;  %v1045_v19 = vadd.f32 %v1044_v17, %v876_v16  ;;  %v799_v20 = vadd.f32 %v2060_v48, %v798_v18  ;;  %v967_v21 = vpop.f32.mrf.mxu1 }
 0x131   : > { %v1134_v22 = vmax.f32 %v1045_v19, 0.0  ;;  %v968_v23 = vadd.f32 %v967_v21, %v799_v20 }
 0x133   : > { %v1198_v24 = vpack.c.bf16 %v1134_v22, %v1134_v22  ;;  %v1103_v25 = vmax.f32 %v968_v23, 0.0 }
 0x134   : > { %v878_v26 = vpop.f32.mrf.mxu2 }
 0x135   : > { %1263 = vst.msk [vmem:[%s2075_s9 + $0xbc] sm:$0xf] %vm1215_vm0, %v1198_v24  ;;  %v1167_v27 = vpack.c.bf16 %v1103_v25, %v1103_v25  ;;  %v879_v28 = vadd.f32 %v2060_v48, %v878_v26  ;;  %v1047_v29 = vpop.f32.mrf.mxu3 }
 0x136   : > { %v800_v30 = vpop.f32.mrf.mxu0 }
 0x137   : > { %1232 = vst.msk [vmem:[%s2075_s9 + $0x40] sm:$0xf] %vm1215_vm0, %v1167_v27  ;;  %v1048_v31 = vadd.f32 %v1047_v29, %v879_v28  ;;  %v801_v32 = vadd.f32 %v2060_v48, %v800_v30  ;;  %v969_v33 = vpop.f32.mrf.mxu1 }
 0x139   : > { %v1135_v34 = vmax.f32 %v1048_v31, 0.0  ;;  %v970_v35 = vadd.f32 %v969_v33, %v801_v32 }
 0x13b   : > { %v1199_v36 = vpack.c.bf16 %v1135_v34, %v1135_v34  ;;  %v1104_v37 = vmax.f32 %v970_v35, 0.0 }
 0x13c   : > { %v880_v38 = vpop.f32.mrf.mxu2 }
 0x13d   : > { %1264 = vst.msk [vmem:[%s2075_s9 + $0xc0] sm:$0xf] %vm1215_vm0, %v1199_v36  ;;  %v1168_v39 = vpack.c.bf16 %v1104_v37, %v1104_v37  ;;  %v881_v40 = vadd.f32 %v2060_v48, %v880_v38  ;;  %v1049_v41 = vpop.f32.mrf.mxu3 }
 0x13e   : > { %v803_v42 = vpop.f32.mrf.mxu0 }
 0x13f   : > { %1233 = vst.msk [vmem:[%s2075_s9 + $0x44] sm:$0xf] %vm1215_vm0, %v1168_v39  ;;  %v1050_v43 = vadd.f32 %v1049_v41, %v881_v40  ;;  %v804_v44 = vadd.f32 %v2060_v48, %v803_v42  ;;  %v972_v45 = vpop.f32.mrf.mxu1 }
 0x141   : > { %v1136_v46 = vmax.f32 %v1050_v43, 0.0  ;;  %v973_v47 = vadd.f32 %v972_v45, %v804_v44 }
 0x143   : > { %v1200_v49 = vpack.c.bf16 %v1136_v46, %v1136_v46  ;;  %v1105_v50 = vmax.f32 %v973_v47, 0.0 }
 0x144   : > { %v883_v51 = vpop.f32.mrf.mxu2 }
 0x145   : > { %1265 = vst.msk [vmem:[%s2075_s9 + $0xc4] sm:$0xf] %vm1215_vm0, %v1200_v49  ;;  %v1169_v52 = vpack.c.bf16 %v1105_v50, %v1105_v50  ;;  %v884_v53 = vadd.f32 %v2060_v48, %v883_v51  ;;  %v1052_v54 = vpop.f32.mrf.mxu3 }
 0x146   : > { %v805_v55 = vpop.f32.mrf.mxu0 }
 0x147   : > { %1234 = vst.msk [vmem:[%s2075_s9 + $0x48] sm:$0xf] %vm1215_vm0, %v1169_v52  ;;  %v1053_v56 = vadd.f32 %v1052_v54, %v884_v53  ;;  %v806_v57 = vadd.f32 %v2060_v48, %v805_v55  ;;  %v974_v58 = vpop.f32.mrf.mxu1 }
 0x149   : > { %v1137_v59 = vmax.f32 %v1053_v56, 0.0  ;;  %v975_v60 = vadd.f32 %v974_v58, %v806_v57 }
 0x14b   : > { %v1201_v61 = vpack.c.bf16 %v1137_v59, %v1137_v59  ;;  %v1106_v62 = vmax.f32 %v975_v60, 0.0 }
 0x14c   : > { %v885_v63 = vpop.f32.mrf.mxu2 }
 0x14d   : > { %1266 = vst.msk [vmem:[%s2075_s9 + $0xc8] sm:$0xf] %vm1215_vm0, %v1201_v61  ;;  %v1170_v0 = vpack.c.bf16 %v1106_v62, %v1106_v62  ;;  %v886_v1 = vadd.f32 %v2060_v48, %v885_v63  ;;  %v1054_v2 = vpop.f32.mrf.mxu3 }
 0x14e   : > { %v808_v3 = vpop.f32.mrf.mxu0 }
 0x14f   : > { %1235 = vst.msk [vmem:[%s2075_s9 + $0x4c] sm:$0xf] %vm1215_vm0, %v1170_v0  ;;  %v1055_v4 = vadd.f32 %v1054_v2, %v886_v1  ;;  %v809_v5 = vadd.f32 %v2060_v48, %v808_v3  ;;  %v977_v6 = vpop.f32.mrf.mxu1 }
 0x151   : > { %v1138_v7 = vmax.f32 %v1055_v4, 0.0  ;;  %v978_v8 = vadd.f32 %v977_v6, %v809_v5 }
 0x153   : > { %v1202_v9 = vpack.c.bf16 %v1138_v7, %v1138_v7  ;;  %v1107_v10 = vmax.f32 %v978_v8, 0.0 }
 0x154   : > { %v888_v11 = vpop.f32.mrf.mxu2 }
 0x155   : > { %1267 = vst.msk [vmem:[%s2075_s9 + $0xcc] sm:$0xf] %vm1215_vm0, %v1202_v9  ;;  %v1171_v12 = vpack.c.bf16 %v1107_v10, %v1107_v10  ;;  %v889_v13 = vadd.f32 %v2060_v48, %v888_v11  ;;  %v1057_v14 = vpop.f32.mrf.mxu3 }
 0x156   : > { %v810_v15 = vpop.f32.mrf.mxu0 }
 0x157   : > { %1236 = vst.msk [vmem:[%s2075_s9 + $0x50] sm:$0xf] %vm1215_vm0, %v1171_v12  ;;  %v1058_v16 = vadd.f32 %v1057_v14, %v889_v13  ;;  %v811_v17 = vadd.f32 %v2060_v48, %v810_v15  ;;  %v979_v18 = vpop.f32.mrf.mxu1 }
 0x159   : > { %v1139_v19 = vmax.f32 %v1058_v16, 0.0  ;;  %v980_v20 = vadd.f32 %v979_v18, %v811_v17 }
 0x15b   : > { %v1203_v21 = vpack.c.bf16 %v1139_v19, %v1139_v19  ;;  %v1108_v22 = vmax.f32 %v980_v20, 0.0 }
 0x15c   : > { %v890_v23 = vpop.f32.mrf.mxu2 }
 0x15d   : > { %1268 = vst.msk [vmem:[%s2075_s9 + $0xd0] sm:$0xf] %vm1215_vm0, %v1203_v21  ;;  %v1172_v24 = vpack.c.bf16 %v1108_v22, %v1108_v22  ;;  %v891_v25 = vadd.f32 %v2060_v48, %v890_v23  ;;  %v1059_v26 = vpop.f32.mrf.mxu3 }
 0x15e   : > { %v813_v27 = vpop.f32.mrf.mxu0 }
 0x15f   : > { %1237 = vst.msk [vmem:[%s2075_s9 + $0x54] sm:$0xf] %vm1215_vm0, %v1172_v24  ;;  %v1060_v28 = vadd.f32 %v1059_v26, %v891_v25  ;;  %v814_v29 = vadd.f32 %v2060_v48, %v813_v27  ;;  %v982_v30 = vpop.f32.mrf.mxu1 }
 0x161   : > { %v1140_v31 = vmax.f32 %v1060_v28, 0.0  ;;  %v983_v32 = vadd.f32 %v982_v30, %v814_v29 }
 0x163   : > { %v1204_v33 = vpack.c.bf16 %v1140_v31, %v1140_v31  ;;  %v1109_v34 = vmax.f32 %v983_v32, 0.0 }
 0x164   : > { %v893_v35 = vpop.f32.mrf.mxu2 }
 0x165   : > { %1269 = vst.msk [vmem:[%s2075_s9 + $0xd4] sm:$0xf] %vm1215_vm0, %v1204_v33  ;;  %v1173_v36 = vpack.c.bf16 %v1109_v34, %v1109_v34  ;;  %v894_v37 = vadd.f32 %v2060_v48, %v893_v35  ;;  %v1062_v38 = vpop.f32.mrf.mxu3  ;;  %v1859_v34 = vld [vmem:[%s1978_s26] ss:$0 sm:$0xff] }
 0x166   : > { %v815_v39 = vpop.f32.mrf.mxu0 }
 0x167   : > { %1238 = vst.msk [vmem:[%s2075_s9 + $0x58] sm:$0xf] %vm1215_vm0, %v1173_v36  ;;  %v1063_v40 = vadd.f32 %v1062_v38, %v894_v37  ;;  %v816_v41 = vadd.f32 %v2060_v48, %v815_v39  ;;  %v984_v42 = vpop.f32.mrf.mxu1 }
 0x169   : > { %v1141_v43 = vmax.f32 %v1063_v40, 0.0  ;;  %v985_v44 = vadd.f32 %v984_v42, %v816_v41 }
 0x16b   : > { %v1205_v45 = vpack.c.bf16 %v1141_v43, %v1141_v43  ;;  %v1110_v46 = vmax.f32 %v985_v44, 0.0 }
 0x16c   : > { %v895_v47 = vpop.f32.mrf.mxu2 }
 0x16d   : > { %1270 = vst.msk [vmem:[%s2075_s9 + $0xd8] sm:$0xf] %vm1215_vm0, %v1205_v45  ;;  %v1174_v49 = vpack.c.bf16 %v1110_v46, %v1110_v46  ;;  %v896_v50 = vadd.f32 %v2060_v48, %v895_v47  ;;  %v1064_v51 = vpop.f32.mrf.mxu3 }
 0x16e   : > { %v818_v52 = vpop.f32.mrf.mxu0 }
 0x16f   : > { %1239 = vst.msk [vmem:[%s2075_s9 + $0x5c] sm:$0xf] %vm1215_vm0, %v1174_v49  ;;  %v1065_v53 = vadd.f32 %v1064_v51, %v896_v50  ;;  %v819_v54 = vadd.f32 %v2060_v48, %v818_v52  ;;  %v987_v55 = vpop.f32.mrf.mxu1 }
 0x171   : > { %v1142_v56 = vmax.f32 %v1065_v53, 0.0  ;;  %v988_v57 = vadd.f32 %v987_v55, %v819_v54 }
 0x173   : > { %v1206_v58 = vpack.c.bf16 %v1142_v56, %v1142_v56  ;;  %v1111_v59 = vmax.f32 %v988_v57, 0.0 }
 0x174   : > { %v898_v60 = vpop.f32.mrf.mxu2 }
 0x175   : > { %1271 = vst.msk [vmem:[%s2075_s9 + $0xdc] sm:$0xf] %vm1215_vm0, %v1206_v58  ;;  %v1175_v61 = vpack.c.bf16 %v1111_v59, %v1111_v59  ;;  %v899_v62 = vadd.f32 %v2060_v48, %v898_v60  ;;  %v1067_v63 = vpop.f32.mrf.mxu3 }
 0x176   : > { %v820_v0 = vpop.f32.mrf.mxu0 }
 0x177   : > { %1240 = vst.msk [vmem:[%s2075_s9 + $0x60] sm:$0xf] %vm1215_vm0, %v1175_v61  ;;  %v1068_v1 = vadd.f32 %v1067_v63, %v899_v62  ;;  %v821_v2 = vadd.f32 %v2060_v48, %v820_v0  ;;  %v989_v3 = vpop.f32.mrf.mxu1 }
 0x179   : > { %v1143_v4 = vmax.f32 %v1068_v1, 0.0  ;;  %v990_v5 = vadd.f32 %v989_v3, %v821_v2 }
 0x17b   : > { %v1207_v6 = vpack.c.bf16 %v1143_v4, %v1143_v4  ;;  %v1112_v7 = vmax.f32 %v990_v5, 0.0 }
 0x17c   : > { %v900_v8 = vpop.f32.mrf.mxu2 }
 0x17d   : > { %1272 = vst.msk [vmem:[%s2075_s9 + $0xe0] sm:$0xf] %vm1215_vm0, %v1207_v6  ;;  %v1176_v9 = vpack.c.bf16 %v1112_v7, %v1112_v7  ;;  %v901_v10 = vadd.f32 %v2060_v48, %v900_v8  ;;  %v1069_v11 = vpop.f32.mrf.mxu3 }
 0x17e   : > { %v823_v12 = vpop.f32.mrf.mxu0 }
 0x17f   : > { %1241 = vst.msk [vmem:[%s2075_s9 + $0x64] sm:$0xf] %vm1215_vm0, %v1176_v9  ;;  %v1070_v13 = vadd.f32 %v1069_v11, %v901_v10  ;;  %v824_v14 = vadd.f32 %v2060_v48, %v823_v12  ;;  %v992_v15 = vpop.f32.mrf.mxu1 }
 0x181   : > { %v1144_v16 = vmax.f32 %v1070_v13, 0.0  ;;  %v993_v17 = vadd.f32 %v992_v15, %v824_v14 }
 0x183   : > { %v1208_v18 = vpack.c.bf16 %v1144_v16, %v1144_v16  ;;  %v1113_v19 = vmax.f32 %v993_v17, 0.0 }
 0x184   : > { %v903_v20 = vpop.f32.mrf.mxu2 }
 0x185   : > { %1273 = vst.msk [vmem:[%s2075_s9 + $0xe4] sm:$0xf] %vm1215_vm0, %v1208_v18  ;;  %v1177_v21 = vpack.c.bf16 %v1113_v19, %v1113_v19  ;;  %v904_v22 = vadd.f32 %v2060_v48, %v903_v20  ;;  %v1072_v23 = vpop.f32.mrf.mxu3 }
 0x186   : > { %v825_v24 = vpop.f32.mrf.mxu0 }
 0x187   : > { %1242 = vst.msk [vmem:[%s2075_s9 + $0x68] sm:$0xf] %vm1215_vm0, %v1177_v21  ;;  %v1073_v25 = vadd.f32 %v1072_v23, %v904_v22  ;;  %v826_v26 = vadd.f32 %v2060_v48, %v825_v24  ;;  %v994_v27 = vpop.f32.mrf.mxu1 }
 0x189   : > { %v1145_v28 = vmax.f32 %v1073_v25, 0.0  ;;  %v995_v29 = vadd.f32 %v994_v27, %v826_v26 }
 0x18b   : > { %v1209_v30 = vpack.c.bf16 %v1145_v28, %v1145_v28  ;;  %v1114_v31 = vmax.f32 %v995_v29, 0.0 }
 0x18c   : > { %v905_v32 = vpop.f32.mrf.mxu2 }
 0x18d   : > { %1274 = vst.msk [vmem:[%s2075_s9 + $0xe8] sm:$0xf] %vm1215_vm0, %v1209_v30  ;;  %v1178_v33 = vpack.c.bf16 %v1114_v31, %v1114_v31  ;;  %v906_v35 = vadd.f32 %v1859_v34, %v905_v32  ;;  %v1074_v36 = vpop.f32.mrf.mxu3 }
 0x18e   : > { %v828_v37 = vpop.f32.mrf.mxu0 }
 0x18f   : > { %1243 = vst.msk [vmem:[%s2075_s9 + $0x6c] sm:$0xf] %vm1215_vm0, %v1178_v33  ;;  %v1075_v38 = vadd.f32 %v1074_v36, %v906_v35  ;;  %v829_v39 = vadd.f32 %v1859_v34, %v828_v37  ;;  %v997_v48 = vpop.f32.mrf.mxu1 }
 0x191   : > { %v1146_v40 = vmax.f32 %v1075_v38, 0.0  ;;  %v998_v41 = vadd.f32 %v997_v48, %v829_v39 }
 0x193   : > { %v1210_v42 = vpack.c.bf16 %v1146_v40, %v1146_v40  ;;  %v1115_v43 = vmax.f32 %v998_v41, 0.0 }
 0x194   : > { %v908_v44 = vpop.f32.mrf.mxu2 }
 0x195   : > { %1275 = vst.msk [vmem:[%s2075_s9 + $0xec] sm:$0xf] %vm1215_vm0, %v1210_v42  ;;  %v1179_v45 = vpack.c.bf16 %v1115_v43, %v1115_v43  ;;  %v909_v46 = vadd.f32 %v1859_v34, %v908_v44  ;;  %v1077_v47 = vpop.f32.mrf.mxu3 }
 0x196   : > { %v830_v49 = vpop.f32.mrf.mxu0 }
 0x197   : > { %1244 = vst.msk [vmem:[%s2075_s9 + $0x70] sm:$0xf] %vm1215_vm0, %v1179_v45  ;;  %v1078_v50 = vadd.f32 %v1077_v47, %v909_v46  ;;  %v831_v51 = vadd.f32 %v1859_v34, %v830_v49  ;;  %v999_v52 = vpop.f32.mrf.mxu1 }
 0x199   : > { %v1147_v53 = vmax.f32 %v1078_v50, 0.0  ;;  %v1000_v54 = vadd.f32 %v999_v52, %v831_v51 }
 0x19b   : > { %v1211_v55 = vpack.c.bf16 %v1147_v53, %v1147_v53  ;;  %v1116_v56 = vmax.f32 %v1000_v54, 0.0 }
 0x19c   : > { %v910_v57 = vpop.f32.mrf.mxu2 }
 0x19d   : > { %1276 = vst.msk [vmem:[%s2075_s9 + $0xf0] sm:$0xf] %vm1215_vm0, %v1211_v55  ;;  %v1180_v58 = vpack.c.bf16 %v1116_v56, %v1116_v56  ;;  %v911_v59 = vadd.f32 %v1859_v34, %v910_v57  ;;  %v1079_v60 = vpop.f32.mrf.mxu3 }
 0x19e   : > { %v833_v61 = vpop.f32.mrf.mxu0 }
 0x19f   : > { %1245 = vst.msk [vmem:[%s2075_s9 + $0x74] sm:$0xf] %vm1215_vm0, %v1180_v58  ;;  %v1080_v62 = vadd.f32 %v1079_v60, %v911_v59  ;;  %v834_v63 = vadd.f32 %v1859_v34, %v833_v61  ;;  %v1002_v0 = vpop.f32.mrf.mxu1 }
 0x1a1   : > { %v1148_v1 = vmax.f32 %v1080_v62, 0.0  ;;  %v1003_v2 = vadd.f32 %v1002_v0, %v834_v63 }
 0x1a3   : > { %v1212_v3 = vpack.c.bf16 %v1148_v1, %v1148_v1  ;;  %v1117_v4 = vmax.f32 %v1003_v2, 0.0 }
 0x1a4   : > { %v913_v5 = vpop.f32.mrf.mxu2 }
 0x1a5   : > { %1277 = vst.msk [vmem:[%s2075_s9 + $0xf4] sm:$0xf] %vm1215_vm0, %v1212_v3  ;;  %v1181_v6 = vpack.c.bf16 %v1117_v4, %v1117_v4  ;;  %v914_v7 = vadd.f32 %v1859_v34, %v913_v5  ;;  %v1082_v8 = vpop.f32.mrf.mxu3 }
 0x1a6   : > { %v835_v9 = vpop.f32.mrf.mxu0 }
 0x1a7   : > { %1246 = vst.msk [vmem:[%s2075_s9 + $0x78] sm:$0xf] %vm1215_vm0, %v1181_v6  ;;  %v1083_v10 = vadd.f32 %v1082_v8, %v914_v7  ;;  %v836_v11 = vadd.f32 %v1859_v34, %v835_v9  ;;  %v1004_v12 = vpop.f32.mrf.mxu1 }
 0x1a9   : > { %v1149_v13 = vmax.f32 %v1083_v10, 0.0  ;;  %v1005_v14 = vadd.f32 %v1004_v12, %v836_v11 }
 0x1ab   : > { %v1213_v15 = vpack.c.bf16 %v1149_v13, %v1149_v13  ;;  %v1118_v16 = vmax.f32 %v1005_v14, 0.0 }
 0x1ac   : > { %v915_v17 = vpop.f32.mrf.mxu2 }
 0x1ad   : > { %1278 = vst.msk [vmem:[%s2075_s9 + $0xf8] sm:$0xf] %vm1215_vm0, %v1213_v15  ;;  %v1182_v18 = vpack.c.bf16 %v1118_v16, %v1118_v16  ;;  %v916_v19 = vadd.f32 %v1859_v34, %v915_v17  ;;  %v1084_v20 = vpop.f32.mrf.mxu3 }
 0x1af   : > { %1247 = vst.msk [vmem:[%s2075_s9 + $0x7c] sm:$0xf] %vm1215_vm0, %v1182_v18  ;;  %v1085_v21 = vadd.f32 %v1084_v20, %v916_v19 }
 0x1b1   : > { %v1150_v22 = vmax.f32 %v1085_v21, 0.0 }
 0x1b3   : > { %v1214_v23 = vpack.c.bf16 %v1150_v22, %v1150_v22 }
 0x1b5   : > { %1279 = vst.msk [vmem:[%s2075_s9 + $0xfc] sm:$0xf] %vm1215_vm0, %v1214_v23 }
 0x1b6 PF: > { %s13_s16 = sadd.s32 1, %s1898_s16   ;;  %s2335_s12 = smov %s1890_s14 }
 0x1b7   : > { %p10_p7 = scmp.ge.s32.totalorder %s13_s16, 14   ;;  %s2336_s13 = smov %s1894_s15 }
 0x1b8   : > { %s2337_s14 = smov %s2340_s17  ;;  %s2338_s15 = smov %s2344_s18 }
 0x1b9   :  { %12 = sbr.rel (!%p10_p7) target bundleno = 3 (0x3), region = 68 }

// kernel: twinned_q_forward.6
= control target key start
LH: loop header
LB: loop body
LE: loop exit
PB: predicated region body
PF: predicated region fallthrough
CT: control target
= control target key end

     0   :  { %s4352_s12 = smov 0   ;;  %s4354_s13 = smov 0   ;;  %s4989_s0 = inlined_call_operand.vmem [shape: bf16[2,128,2048], index: 0, kind: input, shape index: {}]   ;;  %s4990_s1 = inlined_call_operand.vmem [shape: bf16[2,2048,32], index: 1, kind: input, shape index: {}]   ;;  %s4991_s2 = inlined_call_operand.vmem [shape: f32[2,1,32], index: 2, kind: input, shape index: {}]   ;;  %s4992_s3 = inlined_call_operand.vmem [shape: bf16[2,128,32], index: 3, kind: output, shape index: {}]  }
   0x1   :  { %s4356_s14 = smov 0  }
   0x2 LB: > { %s25_s15 = sadd.s32 1, %s4326_s13  ;;  %p2991_p0 = scmp.ge.s32.totalorder %s4330_s14, 1  ;;  %s4330_s14 = sphi %s4356_s14, %s13_s14   ;;  %s4326_s13 = sphi %s4354_s13, %s4994_s13   ;;  %s4322_s12 = sphi %s4352_s12, %s4993_s12  }
   0x3   : > { %p27_p1 = scmp.ge.s32.totalorder %s25_s15, 2  ;;  %p177_p2 = scmp.lt.s32.totalorder %s4330_s14, 3 }
   0x5   : > { %s4996_s15 = smov (%p27_p1, %s25_s15), 0  ;;  %p178_p3 = pnand %p2991_p0, %p177_p2 }
   0x6   : > { %p219_p4 = scmp.lt.s32.totalorder (!%p178_p3), %s4322_s12, 1 }
   0x7   : > { %181 = sbr.rel (%p178_p3) target bundleno = 694 (0x2b6), region = 32 }
   0xc   : > { %s4998_s12 = smov (!%p219_p4, %s4322_s12), 1  ;;  %vm2859_vm0 = vcmask 257024  }
   0xd   : > { %s4024_s16 = sshll.u32 %s4998_s12, 10  ;;  %s236_s22 = scalar_lea.vmem %s4991_s2, %s4998_s12 }
   0xe   : > { %s4378_s19 = scalar_lea.vmem %s4990_s1, %s4024_s16  ;;  %s4415_s25 = scalar_lea.vmem %s4989_s0, %s4024_s16 }
   0xf   : > { %v4162_v0 = vld [vmem:[%s4378_s19 + $0x38] sm:$0xff]  ;;  %v4161_v4 = vld [vmem:[%s4378_s19 + $0x30] sm:$0xff]  ;;  %v4160_v8 = vld [vmem:[%s4378_s19 + $0x28] sm:$0xff]  ;;  %s4026_s28 = sshll.u32 %s4998_s12, 6 }
  0x10   : > { %v4170_v1 = vld [vmem:[%s4378_s19 + $0x78] sm:$0xff]  ;;  %2043 = vmatpush.bf16.msra.mxu0 %v4162_v0  ;;  %v4169_v5 = vld [vmem:[%s4378_s19 + $0x70] sm:$0xff]  ;;  %v4168_v9 = vld [vmem:[%s4378_s19 + $0x68] sm:$0xff]  ;;  %s4932_s4 = scalar_lea.vmem %s4992_s3, %s4026_s28 }
  0x11   : > { %v4178_v2 = vld [vmem:[%s4378_s19 + $0xb8] sm:$0xff]  ;;  %2092 = vmatpush.bf16.msra.mxu1 %v4170_v1  ;;  %v4177_v6 = vld [vmem:[%s4378_s19 + $0xb0] sm:$0xff]  ;;  %v4176_v10 = vld [vmem:[%s4378_s19 + $0xa8] sm:$0xff] }
  0x12   : > { %v4186_v3 = vld [vmem:[%s4378_s19 + $0xf8] sm:$0xff]  ;;  %2141 = vmatpush.bf16.msra.mxu2 %v4178_v2  ;;  %v4185_v7 = vld [vmem:[%s4378_s19 + $0xf0] sm:$0xff]  ;;  %v4184_v11 = vld [vmem:[%s4378_s19 + $0xe8] sm:$0xff] }
  0x13   : > { %2190 = vmatpush.bf16.msra.mxu3 %v4186_v3  ;;  %v4159_v12 = vld [vmem:[%s4378_s19 + $0x20] sm:$0xff]  ;;  %v4158_v16 = vld [vmem:[%s4378_s19 + $0x18] sm:$0xff]  ;;  %v4157_v20 = vld [vmem:[%s4378_s19 + $0x10] sm:$0xff] }
  0x14   : > { %2044 = vmatpush.bf16.msra.mxu0 %v4161_v4  ;;  %v4167_v13 = vld [vmem:[%s4378_s19 + $0x60] sm:$0xff]  ;;  %v4166_v17 = vld [vmem:[%s4378_s19 + $0x58] sm:$0xff]  ;;  %v4165_v21 = vld [vmem:[%s4378_s19 + $0x50] sm:$0xff] }
  0x15   : > { %2093 = vmatpush.bf16.msra.mxu1 %v4169_v5  ;;  %v4175_v14 = vld [vmem:[%s4378_s19 + $0xa0] sm:$0xff]  ;;  %v4174_v18 = vld [vmem:[%s4378_s19 + $0x98] sm:$0xff]  ;;  %v4173_v22 = vld [vmem:[%s4378_s19 + $0x90] sm:$0xff] }
  0x16   : > { %2142 = vmatpush.bf16.msra.mxu2 %v4177_v6  ;;  %v4183_v15 = vld [vmem:[%s4378_s19 + $0xe0] sm:$0xff]  ;;  %v4182_v19 = vld [vmem:[%s4378_s19 + $0xd8] sm:$0xff]  ;;  %v4181_v23 = vld [vmem:[%s4378_s19 + $0xd0] sm:$0xff] }
  0x17   : > { %2191 = vmatpush.bf16.msra.mxu3 %v4185_v7  ;;  %v4156_v24 = vld [vmem:[%s4378_s19 + $0x8] sm:$0xff]  ;;  %v4155_v28 = vld [vmem:[%s4378_s19] sm:$0xff]  ;;  %v4210_v40 = vld [vmem:[%s4378_s19 + $0x1b8] sm:$0xff] }
  0x18   : > { %2045 = vmatpush.bf16.msra.mxu0 %v4160_v8  ;;  %v4164_v25 = vld [vmem:[%s4378_s19 + $0x48] sm:$0xff]  ;;  %v4163_v29 = vld [vmem:[%s4378_s19 + $0x40] sm:$0xff]  ;;  %v4194_v41 = vld [vmem:[%s4378_s19 + $0x138] sm:$0xff] }
  0x19   : > { %2094 = vmatpush.bf16.msra.mxu1 %v4168_v9  ;;  %v4172_v26 = vld [vmem:[%s4378_s19 + $0x88] sm:$0xff]  ;;  %v4171_v30 = vld [vmem:[%s4378_s19 + $0x80] sm:$0xff]  ;;  %v4218_v46 = vld [vmem:[%s4378_s19 + $0x1f8] sm:$0xff] }
  0x1a   : > { %2143 = vmatpush.bf16.msra.mxu2 %v4176_v10  ;;  %v4180_v27 = vld [vmem:[%s4378_s19 + $0xc8] sm:$0xff]  ;;  %v4179_v31 = vld [vmem:[%s4378_s19 + $0xc0] sm:$0xff]  ;;  %v4202_v47 = vld [vmem:[%s4378_s19 + $0x178] sm:$0xff] }
  0x1b   : > { %2192 = vmatpush.bf16.msra.mxu3 %v4184_v11  ;;  %v3000_v32 = vld [vmem:[%s4415_s25] sm:$0xf]  ;;  %v4027_v34 = vld [vmem:[%s4415_s25 + $0x4] sm:$0xf]  ;;  %v3008_v36 = vld [vmem:[%s4415_s25 + $0x8] sm:$0xf] }
  0x1c   : > { %2046 = vmatpush.bf16.msra.mxu0 %v4159_v12  ;;  %v4035_v33 = vld [vmem:[%s4415_s25 + $0x3c] sm:$0xf0]  ;;  %v3002_v35 = vld [vmem:[%s4415_s25 + $0x40] sm:$0xf0]  ;;  %v4036_v37 = vld [vmem:[%s4415_s25 + $0x44] sm:$0xf0] }
  0x1d   : > { %2095 = vmatpush.bf16.msra.mxu1 %v4167_v13  ;;  %v4028_v38 = vld [vmem:[%s4415_s25 + $0xc] sm:$0xf]  ;;  %v3001_v42 = vor.u32 %v4035_v33, %v3000_v32  ;;  %v3005_v43 = vor.u32 %v4027_v34, %v3002_v35  ;;  %v3009_v44 = vor.u32 %v4036_v37, %v3008_v36  ;;  %v4209_v48 = vld [vmem:[%s4378_s19 + $0x1b0] sm:$0xff]  ;;  %v3064_v56 = vld [vmem:[%s4415_s25 + $0x80] sm:$0xf] }
  0x1e   : > { %2144 = vmatpush.bf16.msra.mxu2 %v4175_v14  ;;  %v3010_v39 = vld [vmem:[%s4415_s25 + $0x48] sm:$0xf0]  ;;  %v4193_v49 = vld [vmem:[%s4378_s19 + $0x130] sm:$0xff]  ;;  %v4051_v57 = vld [vmem:[%s4415_s25 + $0xbc] sm:$0xf0] }
  0x1f   : > { %2193 = vmatpush.bf16.msra.mxu3 %v4183_v15  ;;  %v3013_v45 = vor.u32 %v4028_v38, %v3010_v39  ;;  %v4217_v50 = vld [vmem:[%s4378_s19 + $0x1f0] sm:$0xff]  ;;  %v4208_v52 = vld [vmem:[%s4378_s19 + $0x1a8] sm:$0xff]  ;;  %v4043_v58 = vld [vmem:[%s4415_s25 + $0x84] sm:$0xf]  ;;  %v3065_v0 = vor.u32 %v4051_v57, %v3064_v56 }
  0x20   : > { %2047 = vmatpush.bf16.msra.mxu0 %v4158_v16  ;;  %v4201_v51 = vld [vmem:[%s4378_s19 + $0x170] sm:$0xff]  ;;  %v4192_v53 = vld [vmem:[%s4378_s19 + $0x128] sm:$0xff]  ;;  %v3066_v59 = vld [vmem:[%s4415_s25 + $0xc0] sm:$0xf0] }
  0x21   : > { %2096 = vmatpush.bf16.msra.mxu1 %v4166_v17  ;;  %v4216_v54 = vld [vmem:[%s4378_s19 + $0x1e8] sm:$0xff]  ;;  %v3069_v1 = vor.u32 %v4043_v58, %v3066_v59  ;;  %v4207_v4 = vld [vmem:[%s4378_s19 + $0x1a0] sm:$0xff]  ;;  %v4205_v36 = vld [vmem:[%s4378_s19 + $0x190] sm:$0xff] }
  0x22   : > { %2145 = vmatpush.bf16.msra.mxu2 %v4174_v18  ;;  %v4200_v55 = vld [vmem:[%s4378_s19 + $0x168] sm:$0xff]  ;;  %v4191_v5 = vld [vmem:[%s4378_s19 + $0x120] sm:$0xff]  ;;  %v4189_v37 = vld [vmem:[%s4378_s19 + $0x110] sm:$0xff] }
  0x23   : > { %2194 = vmatpush.bf16.msra.mxu3 %v4182_v19  ;;  %v3072_v60 = vld [vmem:[%s4415_s25 + $0x88] sm:$0xf]  ;;  %v4044_v62 = vld [vmem:[%s4415_s25 + $0x8c] sm:$0xf]  ;;  %v4215_v6 = vld [vmem:[%s4378_s19 + $0x1e0] sm:$0xff] }
  0x24   : > { %2048 = vmatpush.bf16.msra.mxu0 %v4157_v20  ;;  %v4052_v61 = vld [vmem:[%s4415_s25 + $0xc4] sm:$0xf0]  ;;  %v3074_v63 = vld [vmem:[%s4415_s25 + $0xc8] sm:$0xf0]  ;;  %v4199_v7 = vld [vmem:[%s4378_s19 + $0x160] sm:$0xff] }
  0x25   : > { %2097 = vmatpush.bf16.msra.mxu1 %v4165_v21  ;;  %v3073_v2 = vor.u32 %v4052_v61, %v3072_v60  ;;  %v3077_v3 = vor.u32 %v4044_v62, %v3074_v63  ;;  %v3128_v8 = vld [vmem:[%s4415_s25 + $0x100] sm:$0xf]  ;;  %v4059_v10 = vld [vmem:[%s4415_s25 + $0x104] sm:$0xf]  ;;  %v3136_v12 = vld [vmem:[%s4415_s25 + $0x108] sm:$0xf] }
  0x26   : > { %2146 = vmatpush.bf16.msra.mxu2 %v4173_v22  ;;  %v4067_v9 = vld [vmem:[%s4415_s25 + $0x13c] sm:$0xf0]  ;;  %v3130_v11 = vld [vmem:[%s4415_s25 + $0x140] sm:$0xf0]  ;;  %v4068_v13 = vld [vmem:[%s4415_s25 + $0x144] sm:$0xf0] }
  0x27   : > { %2195 = vmatpush.bf16.msra.mxu3 %v4181_v23  ;;  %v4060_v14 = vld [vmem:[%s4415_s25 + $0x10c] sm:$0xf]  ;;  %v3129_v16 = vor.u32 %v4067_v9, %v3128_v8  ;;  %v3133_v17 = vor.u32 %v4059_v10, %v3130_v11  ;;  %v3137_v18 = vor.u32 %v4068_v13, %v3136_v12  ;;  %v4206_v20 = vld [vmem:[%s4378_s19 + $0x198] sm:$0xff]  ;;  %v4213_v38 = vld [vmem:[%s4378_s19 + $0x1d0] sm:$0xff] }
  0x28   : > { %2049 = vmatpush.bf16.msra.mxu0 %v4156_v24  ;;  %v3138_v15 = vld [vmem:[%s4415_s25 + $0x148] sm:$0xf0]  ;;  %v4190_v21 = vld [vmem:[%s4378_s19 + $0x118] sm:$0xff]  ;;  %v3192_v24 = vld [vmem:[%s4415_s25 + $0x180] sm:$0xf] }
  0x29   : > { %2098 = vmatpush.bf16.msra.mxu1 %v4164_v25  ;;  %v3141_v19 = vor.u32 %v4060_v14, %v3138_v15  ;;  %v4214_v22 = vld [vmem:[%s4378_s19 + $0x1d8] sm:$0xff]  ;;  %v4083_v25 = vld [vmem:[%s4415_s25 + $0x1bc] sm:$0xf0]  ;;  %v4197_v39 = vld [vmem:[%s4378_s19 + $0x150] sm:$0xff] }
  0x2a   : > { %2147 = vmatpush.bf16.msra.mxu2 %v4172_v26  ;;  %v4198_v23 = vld [vmem:[%s4378_s19 + $0x158] sm:$0xff]  ;;  %v4075_v26 = vld [vmem:[%s4415_s25 + $0x184] sm:$0xf]  ;;  %v3193_v32 = vor.u32 %v4083_v25, %v3192_v24  ;;  %v3320_v56 = vld [vmem:[%s4415_s25 + $0x280] sm:$0xf] }
  0x2b   : > { %2196 = vmatpush.bf16.msra.mxu3 %v4180_v27  ;;  %v3194_v27 = vld [vmem:[%s4415_s25 + $0x1c0] sm:$0xf0]  ;;  %v4115_v57 = vld [vmem:[%s4415_s25 + $0x2bc] sm:$0xf0]  ;;  %v3328_v60 = vld [vmem:[%s4415_s25 + $0x288] sm:$0xf] }
  0x2c   : > { %2050 = vmatpush.bf16.msra.mxu0 %v4155_v28  ;;  %v3200_v28 = vld [vmem:[%s4415_s25 + $0x188] sm:$0xf]  ;;  %v3197_v33 = vor.u32 %v4075_v26, %v3194_v27  ;;  %v4107_v58 = vld [vmem:[%s4415_s25 + $0x284] sm:$0xf]  ;;  %v4108_v62 = vld [vmem:[%s4415_s25 + $0x28c] sm:$0xf] }
  0x2d   : > { %2099 = vmatpush.bf16.msra.mxu1 %v4163_v29  ;;  %v4084_v29 = vld [vmem:[%s4415_s25 + $0x1c4] sm:$0xf0]  ;;  %v3322_v59 = vld [vmem:[%s4415_s25 + $0x2c0] sm:$0xf0]  ;;  %v3330_v63 = vld [vmem:[%s4415_s25 + $0x2c8] sm:$0xf0] }
  0x2e   : > { %2148 = vmatpush.bf16.msra.mxu2 %v4171_v30  ;;  %v4076_v30 = vld [vmem:[%s4415_s25 + $0x18c] sm:$0xf]  ;;  %v3201_v34 = vor.u32 %v4084_v29, %v3200_v28  ;;  %v4116_v61 = vld [vmem:[%s4415_s25 + $0x2c4] sm:$0xf0]  ;;  %v3384_v8 = vld [vmem:[%s4415_s25 + $0x300] sm:$0xf] }
  0x2f   : > { %2197 = vmatpush.bf16.msra.mxu3 %v4179_v31  ;;  %2051 = vmatmul.bf16.vlgmr.msra.gmra.mxu0 %v3001_v42  ;;  %v3202_v31 = vld [vmem:[%s4415_s25 + $0x1c8] sm:$0xf0]  ;;  %v4091_v42 = vld [vmem:[%s4415_s25 + $0x204] sm:$0xf]  ;;  %v4131_v9 = vld [vmem:[%s4415_s25 + $0x33c] sm:$0xf0] }
  0x30   : > { %2239 = vmatpush.bf16.msrb.mxu0 %v4194_v41  ;;  %2100 = vmatmul.bf16.vlgmr.msra.gmra.mxu1 %v3005_v43  ;;  %v3205_v35 = vor.u32 %v4076_v30, %v3202_v31  ;;  %v4099_v41 = vld [vmem:[%s4415_s25 + $0x23c] sm:$0xf0]  ;;  %v3258_v43 = vld [vmem:[%s4415_s25 + $0x240] sm:$0xf0]  ;;  %v3392_v12 = vld [vmem:[%s4415_s25 + $0x308] sm:$0xf] }
  0x31   : > { %2149 = vmatmul.bf16.vlgmr.msra.gmra.mxu2 %v3009_v44  ;;  %2288 = vmatpush.bf16.msrb.mxu1 %v4202_v47  ;;  %v3264_v44 = vld [vmem:[%s4415_s25 + $0x208] sm:$0xf]  ;;  %v3266_v47 = vld [vmem:[%s4415_s25 + $0x248] sm:$0xf0]  ;;  %v4123_v10 = vld [vmem:[%s4415_s25 + $0x304] sm:$0xf] }
  0x32   : > { %2337 = vmatpush.bf16.msrb.mxu2 %v4210_v40  ;;  %2198 = vmatmul.bf16.vlgmr.msra.gmra.mxu3 %v3013_v45  ;;  %v3256_v40 = vld [vmem:[%s4415_s25 + $0x200] sm:$0xf]  ;;  %v4100_v45 = vld [vmem:[%s4415_s25 + $0x244] sm:$0xf0]  ;;  %v3386_v11 = vld [vmem:[%s4415_s25 + $0x340] sm:$0xf0] }
  0x33   : > { %2386 = vmatpush.bf16.msrb.mxu3 %v4218_v46  ;;  %v4092_v46 = vld [vmem:[%s4415_s25 + $0x20c] sm:$0xf]  ;;  %v4132_v13 = vld [vmem:[%s4415_s25 + $0x344] sm:$0xf0]  ;;  %v3448_v24 = vld [vmem:[%s4415_s25 + $0x380] sm:$0xf] }
  0x34   : > { %2240 = vmatpush.bf16.msrb.mxu0 %v4193_v49  ;;  %v3261_v49 = vor.u32 %v4091_v42, %v3258_v43  ;;  %v4124_v14 = vld [vmem:[%s4415_s25 + $0x30c] sm:$0xf]  ;;  %v4147_v25 = vld [vmem:[%s4415_s25 + $0x3bc] sm:$0xf0]  ;;  %v4139_v26 = vld [vmem:[%s4415_s25 + $0x384] sm:$0xf] }
  0x35   : > { %2289 = vmatpush.bf16.msrb.mxu1 %v4201_v51  ;;  %v3269_v51 = vor.u32 %v4092_v46, %v3266_v47  ;;  %v3394_v15 = vld [vmem:[%s4415_s25 + $0x348] sm:$0xf0]  ;;  %v3450_v27 = vld [vmem:[%s4415_s25 + $0x3c0] sm:$0xf0]  ;;  %v3456_v28 = vld [vmem:[%s4415_s25 + $0x388] sm:$0xf] }
  0x36   : > { %2338 = vmatpush.bf16.msrb.mxu2 %v4209_v48  ;;  %v3257_v48 = vor.u32 %v4099_v41, %v3256_v40  ;;  %v4148_v29 = vld [vmem:[%s4415_s25 + $0x3c4] sm:$0xf0]  ;;  %v4140_v30 = vld [vmem:[%s4415_s25 + $0x38c] sm:$0xf]  ;;  %v4532_v40 = vld [vmem:[%s236_s22] ss:$0 sm:$0xff] }
  0x37   : > { %2387 = vmatpush.bf16.msrb.mxu3 %v4217_v50  ;;  %v3265_v50 = vor.u32 %v4100_v45, %v3264_v44  ;;  %v3458_v31 = vld [vmem:[%s4415_s25 + $0x3c8] sm:$0xf0]  ;;  %v3016_v41 = vld [vmem:[%s4415_s25 + $0x10] sm:$0xf]  ;;  %v4029_v43 = vld [vmem:[%s4415_s25 + $0x14] sm:$0xf] }
  0x38   : > { %2241 = vmatpush.bf16.msrb.mxu0 %v4192_v53  ;;  %v4188_v53 = vld [vmem:[%s4378_s19 + $0x108] sm:$0xff]  ;;  %v4037_v42 = vld [vmem:[%s4415_s25 + $0x4c] sm:$0xf0]  ;;  %v3018_v44 = vld [vmem:[%s4415_s25 + $0x50] sm:$0xf0] }
  0x39   : > { %2290 = vmatpush.bf16.msrb.mxu1 %v4200_v55  ;;  %v4196_v55 = vld [vmem:[%s4378_s19 + $0x148] sm:$0xff]  ;;  %v3024_v45 = vld [vmem:[%s4415_s25 + $0x18] sm:$0xf]  ;;  %v4030_v47 = vld [vmem:[%s4415_s25 + $0x1c] sm:$0xf] }
  0x3a   : > { %2339 = vmatpush.bf16.msrb.mxu2 %v4208_v52  ;;  %v4204_v52 = vld [vmem:[%s4378_s19 + $0x188] sm:$0xff]  ;;  %v4038_v46 = vld [vmem:[%s4415_s25 + $0x54] sm:$0xf0] }
  0x3b   : > { %2388 = vmatpush.bf16.msrb.mxu3 %v4216_v54  ;;  %v4212_v54 = vld [vmem:[%s4378_s19 + $0x1c8] sm:$0xff] }
  0x3c   : > { %2242 = vmatpush.bf16.msrb.mxu0 %v4191_v5  ;;  %v4187_v5 = vld [vmem:[%s4378_s19 + $0x100] sm:$0xff] }
  0x3d   : > { %2291 = vmatpush.bf16.msrb.mxu1 %v4199_v7  ;;  %v4195_v7 = vld [vmem:[%s4378_s19 + $0x140] sm:$0xff] }
  0x3e   : > { %2340 = vmatpush.bf16.msrb.mxu2 %v4207_v4  ;;  %v4203_v4 = vld [vmem:[%s4378_s19 + $0x180] sm:$0xff] }
  0x3f   : > { %2056 = vmatmul.bf16.gmra.mxu0 %v3065_v0  ;;  %2389 = vmatpush.bf16.msrb.mxu3 %v4215_v6  ;;  %v3321_v0 = vor.u32 %v4115_v57, %v3320_v56  ;;  %v4211_v6 = vld [vmem:[%s4378_s19 + $0x1c0] sm:$0xff]  ;;  %v4240_v57 = vld [vmem:[%s4378_s19 + $0x2a8] sm:$0xff] }
  0x40   : > { %2105 = vmatmul.bf16.gmra.mxu1 %v3069_v1  ;;  %2243 = vmatpush.bf16.msrb.mxu0 %v4190_v21  ;;  %v3325_v1 = vor.u32 %v4107_v58, %v3322_v59  ;;  %v4226_v21 = vld [vmem:[%s4378_s19 + $0x238] sm:$0xff]  ;;  %v4224_v58 = vld [vmem:[%s4378_s19 + $0x228] sm:$0xff] }
  0x41   : > { %2154 = vmatmul.bf16.gmra.mxu2 %v3073_v2  ;;  %2292 = vmatpush.bf16.msrb.mxu1 %v4198_v23  ;;  %v3329_v2 = vor.u32 %v4116_v61, %v3328_v60  ;;  %v4234_v23 = vld [vmem:[%s4378_s19 + $0x278] sm:$0xff]  ;;  %v4248_v59 = vld [vmem:[%s4378_s19 + $0x2e8] sm:$0xff] }
  0x42   : > { %2203 = vmatmul.bf16.gmra.mxu3 %v3077_v3  ;;  %2341 = vmatpush.bf16.msrb.mxu2 %v4206_v20  ;;  %v3333_v3 = vor.u32 %v4108_v62, %v3330_v63  ;;  %v4242_v20 = vld [vmem:[%s4378_s19 + $0x2b8] sm:$0xff] }
  0x43   : > { %2390 = vmatpush.bf16.msrb.mxu3 %v4214_v22  ;;  %v4250_v22 = vld [vmem:[%s4378_s19 + $0x2f8] sm:$0xff] }
  0x44   : > { %2244 = vmatpush.bf16.msrb.mxu0 %v4189_v37  ;;  %v4225_v37 = vld [vmem:[%s4378_s19 + $0x230] sm:$0xff] }
  0x45   : > { %2293 = vmatpush.bf16.msrb.mxu1 %v4197_v39  ;;  %v4233_v39 = vld [vmem:[%s4378_s19 + $0x270] sm:$0xff] }
  0x46   : > { %2342 = vmatpush.bf16.msrb.mxu2 %v4205_v36  ;;  %v4241_v36 = vld [vmem:[%s4378_s19 + $0x2b0] sm:$0xff] }
  0x47   : > { %2391 = vmatpush.bf16.msrb.mxu3 %v4213_v38  ;;  %v4249_v38 = vld [vmem:[%s4378_s19 + $0x2f0] sm:$0xff] }
  0x48   : > { %2245 = vmatpush.bf16.msrb.mxu0 %v4188_v53  ;;  %v3025_v53 = vor.u32 %v4038_v46, %v3024_v45  ;;  %v3154_v45 = vld [vmem:[%s4415_s25 + $0x158] sm:$0xf0] }
  0x49   : > { %2294 = vmatpush.bf16.msrb.mxu1 %v4196_v55 }
  0x4a   : > { %2343 = vmatpush.bf16.msrb.mxu2 %v4204_v52 }
  0x4b   : > { %2392 = vmatpush.bf16.msrb.mxu3 %v4212_v54 }
  0x4c   : > { %2246 = vmatpush.bf16.msrb.mxu0 %v4187_v5  ;;  %v3080_v5 = vld [vmem:[%s4415_s25 + $0x90] sm:$0xf] }
  0x4d   : > { %2295 = vmatpush.bf16.msrb.mxu1 %v4195_v7  ;;  %v4045_v7 = vld [vmem:[%s4415_s25 + $0x94] sm:$0xf] }
  0x4e   : > { %2344 = vmatpush.bf16.msrb.mxu2 %v4203_v4 }
  0x4f   : > { %2061 = vmatmul.bf16.gmra.mxu0 %v3129_v16  ;;  %2393 = vmatpush.bf16.msrb.mxu3 %v4211_v6  ;;  %v3385_v16 = vor.u32 %v4131_v9, %v3384_v8  ;;  %v4053_v6 = vld [vmem:[%s4415_s25 + $0xcc] sm:$0xf0]  ;;  %v3082_v8 = vld [vmem:[%s4415_s25 + $0xd0] sm:$0xf0]  ;;  %v3088_v9 = vld [vmem:[%s4415_s25 + $0x98] sm:$0xf] }
  0x50   : > { %2110 = vmatmul.bf16.gmra.mxu1 %v3133_v17  ;;  %v3389_v17 = vor.u32 %v4123_v10, %v3386_v11  ;;  %2435 = vmatpush.bf16.msra.mxu0 %v4226_v21  ;;  %v4054_v10 = vld [vmem:[%s4415_s25 + $0xd4] sm:$0xf0]  ;;  %v4046_v11 = vld [vmem:[%s4415_s25 + $0x9c] sm:$0xf] }
  0x51   : > { %2159 = vmatmul.bf16.gmra.mxu2 %v3137_v18  ;;  %v3393_v18 = vor.u32 %v4132_v13, %v3392_v12  ;;  %2484 = vmatpush.bf16.msra.mxu1 %v4234_v23  ;;  %v3090_v12 = vld [vmem:[%s4415_s25 + $0xd8] sm:$0xf0] }
  0x52   : > { %2208 = vmatmul.bf16.gmra.mxu3 %v3141_v19  ;;  %v3397_v19 = vor.u32 %v4124_v14, %v3394_v15  ;;  %2533 = vmatpush.bf16.msra.mxu2 %v4242_v20  ;;  %v3081_v15 = vor.u32 %v4053_v6, %v3080_v5  ;;  %v3089_v20 = vor.u32 %v4054_v10, %v3088_v9  ;;  %v4230_v5 = vld [vmem:[%s4378_s19 + $0x258] sm:$0xff]  ;;  %v4077_v9 = vld [vmem:[%s4415_s25 + $0x194] sm:$0xf] }
  0x53   : > { %2582 = vmatpush.bf16.msra.mxu3 %v4250_v22  ;;  %v3093_v21 = vor.u32 %v4046_v11, %v3090_v12  ;;  %v3210_v10 = vld [vmem:[%s4415_s25 + $0x1d0] sm:$0xf0]  ;;  %v3216_v11 = vld [vmem:[%s4415_s25 + $0x198] sm:$0xf] }
  0x54   : > { %2436 = vmatpush.bf16.msra.mxu0 %v4225_v37  ;;  %v3144_v37 = vld [vmem:[%s4415_s25 + $0x110] sm:$0xf]  ;;  %v4086_v12 = vld [vmem:[%s4415_s25 + $0x1d4] sm:$0xf0] }
  0x55   : > { %2485 = vmatpush.bf16.msra.mxu1 %v4233_v39  ;;  %v4061_v39 = vld [vmem:[%s4415_s25 + $0x114] sm:$0xf] }
  0x56   : > { %2534 = vmatpush.bf16.msra.mxu2 %v4241_v36 }
  0x57   : > { %2583 = vmatpush.bf16.msra.mxu3 %v4249_v38  ;;  %v4069_v38 = vld [vmem:[%s4415_s25 + $0x14c] sm:$0xf0] }
  0x58   : > { %2437 = vmatpush.bf16.msra.mxu0 %v4224_v58  ;;  %v4238_v58 = vld [vmem:[%s4378_s19 + $0x298] sm:$0xff] }
  0x5a   : > { %2535 = vmatpush.bf16.msra.mxu2 %v4240_v57 }
  0x5b   : > { %2584 = vmatpush.bf16.msra.mxu3 %v4248_v59  ;;  %v4222_v59 = vld [vmem:[%s4378_s19 + $0x218] sm:$0xff] }
  0x5f   : > { %2066 = vmatmul.bf16.gmra.mxu0 %v3193_v32  ;;  %v3449_v32 = vor.u32 %v4147_v25, %v3448_v24  ;;  %v4239_v25 = vld [vmem:[%s4378_s19 + $0x2a0] sm:$0xff] }
  0x60   : > { %2115 = vmatmul.bf16.gmra.mxu1 %v3197_v33  ;;  %v3453_v33 = vor.u32 %v4139_v26, %v3450_v27  ;;  %v4223_v26 = vld [vmem:[%s4378_s19 + $0x220] sm:$0xff]  ;;  %2536 = vmatpush.bf16.msra.mxu2 %v4239_v25 }
  0x61   : > { %2164 = vmatmul.bf16.gmra.mxu2 %v3201_v34  ;;  %v3457_v34 = vor.u32 %v4148_v29, %v3456_v28  ;;  %v4247_v27 = vld [vmem:[%s4378_s19 + $0x2e0] sm:$0xff]  ;;  %2438 = vmatpush.bf16.msra.mxu0 %v4223_v26 }
  0x62   : > { %2213 = vmatmul.bf16.gmra.mxu3 %v3205_v35  ;;  %v3461_v35 = vor.u32 %v4140_v30, %v3458_v31 }
  0x63   : > { %2585 = vmatpush.bf16.msra.mxu3 %v4247_v27 }
  0x64   : > { %2537 = vmatpush.bf16.msra.mxu2 %v4238_v58 }
  0x65   : > { %2439 = vmatpush.bf16.msra.mxu0 %v4222_v59 }
  0x6f   : > { %2071 = vmatmul.bf16.gmra.mxu0 %v3257_v48  ;;  %v3026_v48 = vld [vmem:[%s4415_s25 + $0x58] sm:$0xf0] }
  0x70   : > { %2120 = vmatmul.bf16.gmra.mxu1 %v3261_v49  ;;  %v3017_v49 = vor.u32 %v4037_v42, %v3016_v41  ;;  %v3029_v54 = vor.u32 %v4030_v47, %v3026_v48  ;;  %v3146_v41 = vld [vmem:[%s4415_s25 + $0x150] sm:$0xf0]  ;;  %v3152_v42 = vld [vmem:[%s4415_s25 + $0x118] sm:$0xf]  ;;  %v3145_v48 = vor.u32 %v4069_v38, %v3144_v37 }
  0x71   : > { %2169 = vmatmul.bf16.gmra.mxu2 %v3265_v50  ;;  %v3021_v50 = vor.u32 %v4029_v43, %v3018_v44  ;;  %v4070_v43 = vld [vmem:[%s4415_s25 + $0x154] sm:$0xf0]  ;;  %v4062_v44 = vld [vmem:[%s4415_s25 + $0x11c] sm:$0xf] }
  0x72   : > { %2218 = vmatmul.bf16.gmra.mxu3 %v3269_v51 }
  0x7f   : > { %2076 = vmatmul.bf16.gmra.mxu0 %v3321_v0 }
  0x80   : > { %2125 = vmatmul.bf16.gmra.mxu1 %v3325_v1 }
  0x81   : > { %2174 = vmatmul.bf16.gmra.mxu2 %v3329_v2 }
  0x82   : > { %2223 = vmatmul.bf16.gmra.mxu3 %v3333_v3  ;;  %v4232_v3 = vld [vmem:[%s4378_s19 + $0x268] sm:$0xff] }
  0x83   : > { %2486 = vmatpush.bf16.msra.mxu1 %v4232_v3 }
  0x8f   : > { %2081 = vmatmul.bf16.gmra.mxu0 %v3385_v16  ;;  %v3085_v16 = vor.u32 %v4045_v7, %v3082_v8  ;;  %v3208_v7 = vld [vmem:[%s4415_s25 + $0x190] sm:$0xf] }
  0x90   : > { %2130 = vmatmul.bf16.gmra.mxu1 %v3389_v17  ;;  %v4085_v8 = vld [vmem:[%s4415_s25 + $0x1cc] sm:$0xf0] }
  0x91   : > { %2179 = vmatmul.bf16.gmra.mxu2 %v3393_v18 }
  0x92   : > { %2228 = vmatmul.bf16.gmra.mxu3 %v3397_v19 }
  0x9f   : > { %2086 = vmatmul.bf16.gmra.mxu0 %v3449_v32 }
  0xa0   : > { %2135 = vmatmul.bf16.gmra.mxu1 %v3453_v33 }
  0xa1   : > { %2184 = vmatmul.bf16.gmra.mxu2 %v3457_v34 }
  0xa2   : > { %2233 = vmatmul.bf16.gmra.mxu3 %v3461_v35  ;;  %v4231_v35 = vld [vmem:[%s4378_s19 + $0x260] sm:$0xff] }
  0xa3   : > { %2487 = vmatpush.bf16.msra.mxu1 %v4231_v35 }
  0xa7   : > { %2488 = vmatpush.bf16.msra.mxu1 %v4230_v5 }
  0xac   : > { %v2052_v51 = vpop.f32.mrf.mxu0 }
  0xad   : > { %v2101_v52 = vpop.f32.mrf.mxu1  ;;  %v2053_v55 = vadd.f32 %v4532_v40, %v2052_v51 }
  0xaf   : > { %v2102_v56 = vadd.f32 %v2101_v52, %v2053_v55  ;;  %2247 = vmatmul.bf16.vlgmr.msrb.gmra.mxu0 %v3017_v49  ;;  %v3149_v49 = vor.u32 %v4061_v39, %v3146_v41  ;;  %v4229_v39 = vld [vmem:[%s4378_s19 + $0x250] sm:$0xff] }
  0xb0   : > { %2296 = vmatmul.bf16.vlgmr.msrb.gmra.mxu1 %v3021_v50 }
  0xb1   : > { %2345 = vmatmul.bf16.vlgmr.msrb.gmra.mxu2 %v3025_v53  ;;  %v3153_v53 = vor.u32 %v4070_v43, %v3152_v42  ;;  %v3272_v42 = vld [vmem:[%s4415_s25 + $0x210] sm:$0xf]  ;;  %2489 = vmatpush.bf16.msra.mxu1 %v4229_v39  ;;  %v4243_v39 = vld [vmem:[%s4378_s19 + $0x2c0] sm:$0xff] }
  0xb2   : > { %2394 = vmatmul.bf16.vlgmr.msrb.gmra.mxu3 %v3029_v54  ;;  %v3157_v54 = vor.u32 %v4062_v44, %v3154_v45  ;;  %v4101_v43 = vld [vmem:[%s4415_s25 + $0x24c] sm:$0xf0]  ;;  %v4093_v44 = vld [vmem:[%s4415_s25 + $0x214] sm:$0xf] }
  0xb3   : > { %v3274_v45 = vld [vmem:[%s4415_s25 + $0x250] sm:$0xf0] }
  0xb4   : > { %v2150_v60 = vpop.f32.mrf.mxu2  ;;  %v2054_v63 = vpop.f32.mrf.mxu0 }
  0xb5   : > { %v2199_v61 = vpop.f32.mrf.mxu3  ;;  %v2151_v62 = vadd.f32 %v2150_v60, %v2102_v56  ;;  %v2103_v0 = vpop.f32.mrf.mxu1  ;;  %v2055_v1 = vadd.f32 %v4532_v40, %v2054_v63  ;;  %v4246_v60 = vld [vmem:[%s4378_s19 + $0x2d8] sm:$0xff] }
  0xb6   : > { %2586 = vmatpush.bf16.msra.mxu3 %v4246_v60 }
  0xb7   : > { %v4547_v2 = vadd.f32 %v2199_v61, %v2151_v62  ;;  %v2104_v4 = vadd.f32 %v2103_v0, %v2055_v1 }
  0xbc   : > { %v2152_v13 = vpop.f32.mrf.mxu2  ;;  %v2057_v18 = vpop.f32.mrf.mxu0 }
  0xbd   : > { %v2201_v14 = vpop.f32.mrf.mxu3  ;;  %v2153_v17 = vadd.f32 %v2152_v13, %v2104_v4  ;;  %v2106_v19 = vpop.f32.mrf.mxu1  ;;  %v2058_v22 = vadd.f32 %v4532_v40, %v2057_v18  ;;  %v4078_v13 = vld [vmem:[%s4415_s25 + $0x19c] sm:$0xf]  ;;  %v3213_v18 = vor.u32 %v4077_v9, %v3210_v10 }
  0xbf   : > { %v4559_v23 = vadd.f32 %v2201_v14, %v2153_v17  ;;  %v2107_v24 = vadd.f32 %v2106_v19, %v2058_v22  ;;  %2252 = vmatmul.bf16.gmra.mxu0 %v3081_v15  ;;  %v3218_v14 = vld [vmem:[%s4415_s25 + $0x1d8] sm:$0xf0]  ;;  %v3209_v17 = vor.u32 %v4085_v8, %v3208_v7  ;;  %v3217_v22 = vor.u32 %v4086_v12, %v3216_v11  ;;  %v4228_v11 = vld [vmem:[%s4378_s19 + $0x248] sm:$0xff] }
  0xc0   : > { %2301 = vmatmul.bf16.gmra.mxu1 %v3085_v16 }
  0xc1   : > { %2350 = vmatmul.bf16.gmra.mxu2 %v3089_v20  ;;  %2490 = vmatpush.bf16.msra.mxu1 %v4228_v11  ;;  %v4274_v11 = vld [vmem:[%s4378_s19 + $0x3b8] sm:$0xff] }
  0xc2   : > { %2399 = vmatmul.bf16.gmra.mxu3 %v3093_v21 }
  0xc4   : > { %v2155_v28 = vpop.f32.mrf.mxu2  ;;  %v2059_v31 = vpop.f32.mrf.mxu0 }
  0xc5   : > { %v2204_v29 = vpop.f32.mrf.mxu3  ;;  %v2156_v30 = vadd.f32 %v2155_v28, %v2107_v24  ;;  %v2108_v32 = vpop.f32.mrf.mxu1  ;;  %v2060_v33 = vadd.f32 %v4532_v40, %v2059_v31  ;;  %v3221_v24 = vor.u32 %v4078_v13, %v3218_v14  ;;  %v4237_v28 = vld [vmem:[%s4378_s19 + $0x290] sm:$0xff] }
  0xc6   : > { %2538 = vmatpush.bf16.msra.mxu2 %v4237_v28  ;;  %v3336_v13 = vld [vmem:[%s4415_s25 + $0x290] sm:$0xf] }
  0xc7   : > { %v4565_v34 = vadd.f32 %v2204_v29, %v2156_v30  ;;  %v2109_v36 = vadd.f32 %v2108_v32, %v2060_v33  ;;  %v4221_v29 = vld [vmem:[%s4378_s19 + $0x210] sm:$0xff] }
  0xc8   : > { %v4245_v30 = vld [vmem:[%s4378_s19 + $0x2d0] sm:$0xff]  ;;  %2440 = vmatpush.bf16.msra.mxu0 %v4221_v29 }
  0xc9   : > { %2587 = vmatpush.bf16.msra.mxu3 %v4245_v30  ;;  %v4117_v14 = vld [vmem:[%s4415_s25 + $0x2cc] sm:$0xf0] }
  0xcc   : > { %v2157_v46 = vpop.f32.mrf.mxu2  ;;  %v2062_v51 = vpop.f32.mrf.mxu0 }
  0xcd   : > { %v2206_v47 = vpop.f32.mrf.mxu3  ;;  %v2158_v50 = vadd.f32 %v2157_v46, %v2109_v36  ;;  %v2111_v52 = vpop.f32.mrf.mxu1  ;;  %v2063_v55 = vadd.f32 %v4532_v40, %v2062_v51  ;;  %v3280_v46 = vld [vmem:[%s4415_s25 + $0x218] sm:$0xf] }
  0xcf   : > { %v4577_v56 = vadd.f32 %v2206_v47, %v2158_v50  ;;  %v2112_v57 = vadd.f32 %v2111_v52, %v2063_v55  ;;  %2257 = vmatmul.bf16.gmra.mxu0 %v3145_v48  ;;  %v4102_v47 = vld [vmem:[%s4415_s25 + $0x254] sm:$0xf0]  ;;  %v4094_v48 = vld [vmem:[%s4415_s25 + $0x21c] sm:$0xf]  ;;  %v3273_v52 = vor.u32 %v4101_v43, %v3272_v42 }
  0xd0   : > { %2306 = vmatmul.bf16.gmra.mxu1 %v3149_v49  ;;  %v3282_v49 = vld [vmem:[%s4415_s25 + $0x258] sm:$0xf0]  ;;  %v3281_v58 = vor.u32 %v4102_v47, %v3280_v46 }
  0xd1   : > { %2355 = vmatmul.bf16.gmra.mxu2 %v3153_v53  ;;  %v3277_v53 = vor.u32 %v4093_v44, %v3274_v45  ;;  %v3285_v59 = vor.u32 %v4094_v48, %v3282_v49  ;;  %v4227_v48 = vld [vmem:[%s4378_s19 + $0x240] sm:$0xff] }
  0xd2   : > { %2404 = vmatmul.bf16.gmra.mxu3 %v3157_v54  ;;  %2491 = vmatpush.bf16.msra.mxu1 %v4227_v48 }
  0xd4   : > { %v2160_v61 = vpop.f32.mrf.mxu2  ;;  %v2064_v0 = vpop.f32.mrf.mxu0 }
  0xd5   : > { %v2209_v62 = vpop.f32.mrf.mxu3  ;;  %v2161_v63 = vadd.f32 %v2160_v61, %v2112_v57  ;;  %v2113_v1 = vpop.f32.mrf.mxu1  ;;  %v2065_v3 = vadd.f32 %v4532_v40, %v2064_v0  ;;  %v4220_v0 = vld [vmem:[%s4378_s19 + $0x208] sm:$0xff] }
  0xd6   : > { %2441 = vmatpush.bf16.msra.mxu0 %v4220_v0 }
  0xd7   : > { %v4583_v4 = vadd.f32 %v2209_v62, %v2161_v63  ;;  %v2114_v6 = vadd.f32 %v2113_v1, %v2065_v3  ;;  %v4236_v63 = vld [vmem:[%s4378_s19 + $0x288] sm:$0xff] }
  0xd8   : > { %v4244_v1 = vld [vmem:[%s4378_s19 + $0x2c8] sm:$0xff]  ;;  %2539 = vmatpush.bf16.msra.mxu2 %v4236_v63 }
  0xd9   : > { %2588 = vmatpush.bf16.msra.mxu3 %v4244_v1 }
  0xdc   : > { %v2162_v15 = vpop.f32.mrf.mxu2  ;;  %v2067_v20 = vpop.f32.mrf.mxu0 }
  0xdd   : > { %v2211_v16 = vpop.f32.mrf.mxu3  ;;  %v2163_v19 = vadd.f32 %v2162_v15, %v2114_v6  ;;  %v2116_v21 = vpop.f32.mrf.mxu1  ;;  %v2068_v25 = vadd.f32 %v4532_v40, %v2067_v20  ;;  %v4109_v15 = vld [vmem:[%s4415_s25 + $0x294] sm:$0xf]  ;;  %v3346_v20 = vld [vmem:[%s4415_s25 + $0x2d8] sm:$0xf0]  ;;  %2589 = vmatpush.bf16.msra.mxu3 %v4243_v39 }
  0xdf   : > { %v4595_v26 = vadd.f32 %v2211_v16, %v2163_v19  ;;  %v2117_v27 = vadd.f32 %v2116_v21, %v2068_v25  ;;  %2262 = vmatmul.bf16.gmra.mxu0 %v3209_v17  ;;  %v3338_v16 = vld [vmem:[%s4415_s25 + $0x2d0] sm:$0xf0]  ;;  %v3344_v17 = vld [vmem:[%s4415_s25 + $0x298] sm:$0xf]  ;;  %v4110_v19 = vld [vmem:[%s4415_s25 + $0x29c] sm:$0xf] }
  0xe0   : > { %2311 = vmatmul.bf16.gmra.mxu1 %v3213_v18  ;;  %v4118_v18 = vld [vmem:[%s4415_s25 + $0x2d4] sm:$0xf0]  ;;  %v3341_v25 = vor.u32 %v4109_v15, %v3338_v16 }
  0xe1   : > { %2360 = vmatmul.bf16.gmra.mxu2 %v3217_v22  ;;  %v3345_v30 = vor.u32 %v4118_v18, %v3344_v17 }
  0xe2   : > { %2409 = vmatmul.bf16.gmra.mxu3 %v3221_v24  ;;  %v3337_v24 = vor.u32 %v4117_v14, %v3336_v13  ;;  %v4282_v13 = vld [vmem:[%s4378_s19 + $0x3f8] sm:$0xff] }
  0xe3   : > { %2778 = vmatpush.bf16.msrb.mxu3 %v4282_v13 }
  0xe4   : > { %v2165_v31 = vpop.f32.mrf.mxu2  ;;  %v2069_v35 = vpop.f32.mrf.mxu0 }
  0xe5   : > { %v2214_v32 = vpop.f32.mrf.mxu3  ;;  %v2166_v33 = vadd.f32 %v2165_v31, %v2117_v27  ;;  %v2118_v36 = vpop.f32.mrf.mxu1  ;;  %v2070_v37 = vadd.f32 %v4532_v40, %v2069_v35  ;;  %v3349_v31 = vor.u32 %v4110_v19, %v3346_v20 }
  0xe7   : > { %v4601_v38 = vadd.f32 %v2214_v32, %v2166_v33  ;;  %v2119_v41 = vadd.f32 %v2118_v36, %v2070_v37  ;;  %v4235_v36 = vld [vmem:[%s4378_s19 + $0x280] sm:$0xff] }
  0xe8   : > { %v4219_v37 = vld [vmem:[%s4378_s19 + $0x200] sm:$0xff]  ;;  %2540 = vmatpush.bf16.msra.mxu2 %v4235_v36 }
  0xe9   : > { %2442 = vmatpush.bf16.msra.mxu0 %v4219_v37 }
  0xec   : > { %v2167_v50 = vpop.f32.mrf.mxu2  ;;  %v2072_v55 = vpop.f32.mrf.mxu0  ;;  %2729 = vmatpush.bf16.msrb.mxu2 %v4274_v11  ;;  %v3042_v11 = vld [vmem:[%s4415_s25 + $0x68] sm:$0xf0] }
  0xed   : > { %v2216_v51 = vpop.f32.mrf.mxu3  ;;  %v2168_v54 = vadd.f32 %v2167_v50, %v2119_v41  ;;  %v2121_v57 = vpop.f32.mrf.mxu1  ;;  %v2073_v60 = vadd.f32 %v4532_v40, %v2072_v55  ;;  %v3400_v50 = vld [vmem:[%s4415_s25 + $0x310] sm:$0xf]  ;;  %v4134_v55 = vld [vmem:[%s4415_s25 + $0x354] sm:$0xf0] }
  0xef   : > { %v4613_v61 = vadd.f32 %v2216_v51, %v2168_v54  ;;  %v2122_v62 = vadd.f32 %v2121_v57, %v2073_v60  ;;  %2267 = vmatmul.bf16.gmra.mxu0 %v3273_v52  ;;  %v4133_v51 = vld [vmem:[%s4415_s25 + $0x34c] sm:$0xf0]  ;;  %v4125_v52 = vld [vmem:[%s4415_s25 + $0x314] sm:$0xf]  ;;  %v3408_v54 = vld [vmem:[%s4415_s25 + $0x318] sm:$0xf] }
  0xf0   : > { %2316 = vmatmul.bf16.gmra.mxu1 %v3277_v53  ;;  %v3402_v53 = vld [vmem:[%s4415_s25 + $0x350] sm:$0xf0]  ;;  %v4126_v57 = vld [vmem:[%s4415_s25 + $0x31c] sm:$0xf] }
  0xf1   : > { %2365 = vmatmul.bf16.gmra.mxu2 %v3281_v58  ;;  %v3410_v58 = vld [vmem:[%s4415_s25 + $0x358] sm:$0xf0]  ;;  %v3405_v63 = vor.u32 %v4125_v52, %v3402_v53  ;;  %v4281_v52 = vld [vmem:[%s4378_s19 + $0x3f0] sm:$0xff] }
  0xf2   : > { %2414 = vmatmul.bf16.gmra.mxu3 %v3285_v59 }
  0xf3   : > { %2779 = vmatpush.bf16.msrb.mxu3 %v4281_v52 }
  0xf4   : > { %v2170_v3 = vpop.f32.mrf.mxu2  ;;  %v2074_v7 = vpop.f32.mrf.mxu0 }
  0xf5   : > { %v2219_v5 = vpop.f32.mrf.mxu3  ;;  %v2171_v6 = vadd.f32 %v2170_v3, %v2122_v62  ;;  %v2123_v8 = vpop.f32.mrf.mxu1  ;;  %v2075_v9 = vadd.f32 %v4532_v40, %v2074_v7  ;;  %v3401_v62 = vor.u32 %v4133_v51, %v3400_v50  ;;  %v4273_v50 = vld [vmem:[%s4378_s19 + $0x3b0] sm:$0xff] }
  0xf6   : > { %v4257_v51 = vld [vmem:[%s4378_s19 + $0x330] sm:$0xff]  ;;  %2730 = vmatpush.bf16.msrb.mxu2 %v4273_v50  ;;  %v3106_v50 = vld [vmem:[%s4415_s25 + $0xe8] sm:$0xf0] }
  0xf7   : > { %v4619_v10 = vadd.f32 %v2219_v5, %v2171_v6  ;;  %v2124_v12 = vadd.f32 %v2123_v8, %v2075_v9  ;;  %v3409_v5 = vor.u32 %v4134_v55, %v3408_v54  ;;  %v3413_v6 = vor.u32 %v4126_v57, %v3410_v58 }
  0xfc   : > { %v2172_v21 = vpop.f32.mrf.mxu2  ;;  %v2077_v28 = vpop.f32.mrf.mxu0 }
  0xfd   : > { %v2221_v22 = vpop.f32.mrf.mxu3  ;;  %v2173_v27 = vadd.f32 %v2172_v21, %v2124_v12  ;;  %v2126_v29 = vpop.f32.mrf.mxu1  ;;  %v2078_v32 = vadd.f32 %v4532_v40, %v2077_v28  ;;  %v4258_v12 = vld [vmem:[%s4378_s19 + $0x338] sm:$0xff]  ;;  %v3466_v28 = vld [vmem:[%s4415_s25 + $0x3d0] sm:$0xf0] }
  0xfe   : > { %2631 = vmatpush.bf16.msrb.mxu0 %v4258_v12  ;;  %v4266_v21 = vld [vmem:[%s4378_s19 + $0x378] sm:$0xff] }
  0xff   : > { %v4631_v33 = vadd.f32 %v2221_v22, %v2173_v27  ;;  %v2127_v35 = vadd.f32 %v2126_v29, %v2078_v32  ;;  %2272 = vmatmul.bf16.gmra.mxu0 %v3337_v24  ;;  %v3464_v24 = vld [vmem:[%s4415_s25 + $0x390] sm:$0xf]  ;;  %v4141_v27 = vld [vmem:[%s4415_s25 + $0x394] sm:$0xf]  ;;  %v3472_v29 = vld [vmem:[%s4415_s25 + $0x398] sm:$0xf]  ;;  %2680 = vmatpush.bf16.msrb.mxu1 %v4266_v21 }
 0x100   : > { %2321 = vmatmul.bf16.gmra.mxu1 %v3341_v25  ;;  %v4149_v25 = vld [vmem:[%s4415_s25 + $0x3cc] sm:$0xf0]  ;;  %v3474_v32 = vld [vmem:[%s4415_s25 + $0x3d8] sm:$0xf0]  ;;  %v3469_v39 = vor.u32 %v4141_v27, %v3466_v28  ;;  %v4256_v27 = vld [vmem:[%s4378_s19 + $0x328] sm:$0xff] }
 0x101   : > { %2370 = vmatmul.bf16.gmra.mxu2 %v3345_v30  ;;  %v4150_v30 = vld [vmem:[%s4415_s25 + $0x3d4] sm:$0xf0]  ;;  %v3465_v37 = vor.u32 %v4149_v25, %v3464_v24  ;;  %v4272_v25 = vld [vmem:[%s4378_s19 + $0x3a8] sm:$0xff] }
 0x102   : > { %2419 = vmatmul.bf16.gmra.mxu3 %v3349_v31  ;;  %v4142_v31 = vld [vmem:[%s4415_s25 + $0x39c] sm:$0xf]  ;;  %2632 = vmatpush.bf16.msrb.mxu0 %v4257_v51  ;;  %v4280_v28 = vld [vmem:[%s4378_s19 + $0x3e8] sm:$0xff] }
 0x103   : > { %2731 = vmatpush.bf16.msrb.mxu2 %v4272_v25  ;;  %2780 = vmatpush.bf16.msrb.mxu3 %v4280_v28  ;;  %v3170_v25 = vld [vmem:[%s4415_s25 + $0x168] sm:$0xf0] }
 0x104   : > { %v2175_v41 = vpop.f32.mrf.mxu2  ;;  %v2079_v44 = vpop.f32.mrf.mxu0 }
 0x105   : > { %v2224_v42 = vpop.f32.mrf.mxu3  ;;  %v2176_v43 = vadd.f32 %v2175_v41, %v2127_v35  ;;  %v2128_v45 = vpop.f32.mrf.mxu1  ;;  %v2080_v46 = vadd.f32 %v4532_v40, %v2079_v44  ;;  %v3473_v44 = vor.u32 %v4150_v30, %v3472_v29 }
 0x106   : > { %2633 = vmatpush.bf16.msrb.mxu0 %v4256_v27 }
 0x107   : > { %v4637_v47 = vadd.f32 %v2224_v42, %v2176_v43  ;;  %v2129_v49 = vadd.f32 %v2128_v45, %v2080_v46  ;;  %v3477_v45 = vor.u32 %v4142_v31, %v3474_v32 }
 0x10c   : > { %v2177_v59 = vpop.f32.mrf.mxu2  ;;  %v2082_v1 = vpop.f32.mrf.mxu0 }
 0x10d   : > { %v2226_v60 = vpop.f32.mrf.mxu3  ;;  %v2178_v0 = vadd.f32 %v2177_v59, %v2129_v49  ;;  %v2131_v3 = vpop.f32.mrf.mxu1  ;;  %v2083_v7 = vadd.f32 %v4532_v40, %v2082_v1  ;;  %v4039_v1 = vld [vmem:[%s4415_s25 + $0x5c] sm:$0xf0] }
 0x10f   : > { %v4649_v8 = vadd.f32 %v2226_v60, %v2178_v0  ;;  %v2132_v9 = vadd.f32 %v2131_v3, %v2083_v7  ;;  %2277 = vmatmul.bf16.gmra.mxu0 %v3401_v62  ;;  %v4265_v62 = vld [vmem:[%s4378_s19 + $0x370] sm:$0xff]  ;;  %v3032_v0 = vld [vmem:[%s4415_s25 + $0x20] sm:$0xf]  ;;  %v4031_v3 = vld [vmem:[%s4415_s25 + $0x24] sm:$0xf] }
 0x110   : > { %2326 = vmatmul.bf16.gmra.mxu1 %v3405_v63  ;;  %v4040_v7 = vld [vmem:[%s4415_s25 + $0x64] sm:$0xf0] }
 0x111   : > { %2375 = vmatmul.bf16.gmra.mxu2 %v3409_v5  ;;  %v3034_v5 = vld [vmem:[%s4415_s25 + $0x60] sm:$0xf0]  ;;  %2681 = vmatpush.bf16.msrb.mxu1 %v4265_v62 }
 0x112   : > { %2424 = vmatmul.bf16.gmra.mxu3 %v3413_v6  ;;  %v3040_v6 = vld [vmem:[%s4415_s25 + $0x28] sm:$0xf] }
 0x114   : > { %v2180_v14 = vpop.f32.mrf.mxu2  ;;  %v2084_v17 = vpop.f32.mrf.mxu0 }
 0x115   : > { %v2229_v15 = vpop.f32.mrf.mxu3  ;;  %v2181_v16 = vadd.f32 %v2180_v14, %v2132_v9  ;;  %v2133_v18 = vpop.f32.mrf.mxu1  ;;  %v2085_v19 = vadd.f32 %v4532_v40, %v2084_v17  ;;  %v4032_v9 = vld [vmem:[%s4415_s25 + $0x2c] sm:$0xf]  ;;  %v3033_v14 = vor.u32 %v4039_v1, %v3032_v0  ;;  %v4271_v1 = vld [vmem:[%s4378_s19 + $0x3a0] sm:$0xff] }
 0x116   : > { %2732 = vmatpush.bf16.msrb.mxu2 %v4271_v1  ;;  %v3234_v1 = vld [vmem:[%s4415_s25 + $0x1e8] sm:$0xf0] }
 0x117   : > { %v4655_v20 = vadd.f32 %v2229_v15, %v2181_v16  ;;  %v2134_v22 = vadd.f32 %v2133_v18, %v2085_v19  ;;  %v3041_v18 = vor.u32 %v4040_v7, %v3040_v6  ;;  %v3045_v19 = vor.u32 %v4032_v9, %v3042_v11 }
 0x11c   : > { %v2182_v35 = vpop.f32.mrf.mxu2  ;;  %v2087_v42 = vpop.f32.mrf.mxu0 }
 0x11d   : > { %v2231_v36 = vpop.f32.mrf.mxu3  ;;  %v2183_v41 = vadd.f32 %v2182_v35, %v2134_v22  ;;  %v2136_v43 = vpop.f32.mrf.mxu1  ;;  %v2088_v46 = vadd.f32 %v4532_v40, %v2087_v42  ;;  %v4055_v42 = vld [vmem:[%s4415_s25 + $0xdc] sm:$0xf0] }
 0x11f   : > { %v4667_v48 = vadd.f32 %v2231_v36, %v2183_v41  ;;  %v2137_v49 = vadd.f32 %v2136_v43, %v2088_v46  ;;  %2282 = vmatmul.bf16.gmra.mxu0 %v3465_v37  ;;  %v4264_v37 = vld [vmem:[%s4378_s19 + $0x368] sm:$0xff]  ;;  %v3096_v41 = vld [vmem:[%s4415_s25 + $0xa0] sm:$0xf]  ;;  %v4047_v43 = vld [vmem:[%s4415_s25 + $0xa4] sm:$0xf] }
 0x120   : > { %2331 = vmatmul.bf16.gmra.mxu1 %v3469_v39  ;;  %v4056_v46 = vld [vmem:[%s4415_s25 + $0xe4] sm:$0xf0] }
 0x121   : > { %2380 = vmatmul.bf16.gmra.mxu2 %v3473_v44  ;;  %v3098_v44 = vld [vmem:[%s4415_s25 + $0xe0] sm:$0xf0]  ;;  %2682 = vmatpush.bf16.msrb.mxu1 %v4264_v37 }
 0x122   : > { %2429 = vmatmul.bf16.gmra.mxu3 %v3477_v45  ;;  %v3104_v45 = vld [vmem:[%s4415_s25 + $0xa8] sm:$0xf] }
 0x124   : > { %v2185_v53 = vpop.f32.mrf.mxu2  ;;  %v2089_v57 = vpop.f32.mrf.mxu0 }
 0x125   : > { %v2234_v54 = vpop.f32.mrf.mxu3  ;;  %v2186_v55 = vadd.f32 %v2185_v53, %v2137_v49  ;;  %v2138_v58 = vpop.f32.mrf.mxu1  ;;  %v2090_v59 = vadd.f32 %v4532_v40, %v2089_v57  ;;  %v3037_v40 = vor.u32 %v4031_v3, %v3034_v5  ;;  %v4048_v49 = vld [vmem:[%s4415_s25 + $0xac] sm:$0xf]  ;;  %v3097_v53 = vor.u32 %v4055_v42, %v3096_v41  ;;  %v4255_v3 = vld [vmem:[%s4378_s19 + $0x320] sm:$0xff]  ;;  %v4270_v42 = vld [vmem:[%s4378_s19 + $0x398] sm:$0xff] }
 0x126   : > { %v4279_v5 = vld [vmem:[%s4378_s19 + $0x3e0] sm:$0xff]  ;;  %2634 = vmatpush.bf16.msrb.mxu0 %v4255_v3  ;;  %2733 = vmatpush.bf16.msrb.mxu2 %v4270_v42  ;;  %v3298_v42 = vld [vmem:[%s4415_s25 + $0x268] sm:$0xf0] }
 0x127   : > { %v4673_v60 = vadd.f32 %v2234_v54, %v2186_v55  ;;  %v2139_v63 = vadd.f32 %v2138_v58, %v2090_v59  ;;  %v3105_v58 = vor.u32 %v4056_v46, %v3104_v45  ;;  %v3109_v59 = vor.u32 %v4048_v49, %v3106_v50  ;;  %2781 = vmatpush.bf16.msrb.mxu3 %v4279_v5 }
 0x12c   : > { %v2187_v12 = vpop.f32.mrf.mxu2  ;;  %v2248_v16 = vpop.f32.mrf.mxu0 }
 0x12d   : > { %v2236_v13 = vpop.f32.mrf.mxu3  ;;  %v2188_v15 = vadd.f32 %v2187_v12, %v2139_v63  ;;  %v2297_v17 = vpop.f32.mrf.mxu1  ;;  %v2249_v21 = vadd.f32 %v2248_v16, %v4547_v2  ;;  %v4071_v16 = vld [vmem:[%s4415_s25 + $0x15c] sm:$0xf0] }
 0x12f   : > { %v4685_v22 = vadd.f32 %v2236_v13, %v2188_v15  ;;  %v2298_v24 = vadd.f32 %v2297_v17, %v2249_v21  ;;  %2443 = vmatmul.bf16.vlgmr.msra.gmra.mxu0 %v3033_v14  ;;  %v4263_v14 = vld [vmem:[%s4378_s19 + $0x360] sm:$0xff]  ;;  %v4072_v21 = vld [vmem:[%s4415_s25 + $0x164] sm:$0xf0] }
 0x130   : > { %2492 = vmatmul.bf16.vlgmr.msra.gmra.mxu1 %v3037_v40  ;;  %v3160_v15 = vld [vmem:[%s4415_s25 + $0x120] sm:$0xf]  ;;  %v4063_v17 = vld [vmem:[%s4415_s25 + $0x124] sm:$0xf] }
 0x131   : > { %2541 = vmatmul.bf16.vlgmr.msra.gmra.mxu2 %v3041_v18  ;;  %v3162_v18 = vld [vmem:[%s4415_s25 + $0x160] sm:$0xf0]  ;;  %2683 = vmatpush.bf16.msrb.mxu1 %v4263_v14 }
 0x132   : > { %2590 = vmatmul.bf16.vlgmr.msra.gmra.mxu3 %v3045_v19  ;;  %v3168_v19 = vld [vmem:[%s4415_s25 + $0x128] sm:$0xf] }
 0x134   : > { %v2346_v29 = vpop.f32.mrf.mxu2  ;;  %v2250_v31 = vpop.f32.mrf.mxu0 }
 0x135   : > { %v2395_v2 = vpop.f32.mrf.mxu3  ;;  %v2347_v30 = vadd.f32 %v2346_v29, %v2298_v24  ;;  %v2299_v32 = vpop.f32.mrf.mxu1  ;;  %v2251_v35 = vadd.f32 %v2250_v31, %v4559_v23  ;;  %v3101_v23 = vor.u32 %v4047_v43, %v3098_v44  ;;  %v4064_v24 = vld [vmem:[%s4415_s25 + $0x12c] sm:$0xf]  ;;  %v3161_v29 = vor.u32 %v4071_v16, %v3160_v15  ;;  %v4254_v43 = vld [vmem:[%s4378_s19 + $0x318] sm:$0xff]  ;;  %v4269_v16 = vld [vmem:[%s4378_s19 + $0x390] sm:$0xff] }
 0x136   : > { %v4278_v44 = vld [vmem:[%s4378_s19 + $0x3d8] sm:$0xff]  ;;  %2635 = vmatpush.bf16.msrb.mxu0 %v4254_v43  ;;  %2734 = vmatpush.bf16.msrb.mxu2 %v4269_v16  ;;  %v3362_v16 = vld [vmem:[%s4415_s25 + $0x2e8] sm:$0xf0] }
 0x137   : > { %v4691_v36 = vadd.f32 %v2395_v2, %v2347_v30  ;;  %v2300_v39 = vadd.f32 %v2299_v32, %v2251_v35  ;;  %v3169_v32 = vor.u32 %v4072_v21, %v3168_v19  ;;  %v3173_v35 = vor.u32 %v4064_v24, %v3170_v25  ;;  %2782 = vmatpush.bf16.msrb.mxu3 %v4278_v44 }
 0x13c   : > { %v2348_v51 = vpop.f32.mrf.mxu2  ;;  %v2253_v55 = vpop.f32.mrf.mxu0 }
 0x13d   : > { %v2397_v52 = vpop.f32.mrf.mxu3  ;;  %v2349_v54 = vadd.f32 %v2348_v51, %v2300_v39  ;;  %v2302_v57 = vpop.f32.mrf.mxu1  ;;  %v2254_v62 = vadd.f32 %v2253_v55, %v4565_v34  ;;  %v4087_v55 = vld [vmem:[%s4415_s25 + $0x1dc] sm:$0xf0] }
 0x13f   : > { %v4703_v63 = vadd.f32 %v2397_v52, %v2349_v54  ;;  %v2303_v0 = vadd.f32 %v2302_v57, %v2254_v62  ;;  %2448 = vmatmul.bf16.gmra.mxu0 %v3097_v53  ;;  %v4262_v53 = vld [vmem:[%s4378_s19 + $0x358] sm:$0xff]  ;;  %v3224_v54 = vld [vmem:[%s4415_s25 + $0x1a0] sm:$0xf]  ;;  %v4079_v57 = vld [vmem:[%s4415_s25 + $0x1a4] sm:$0xf] }
 0x140   : > { %2497 = vmatmul.bf16.gmra.mxu1 %v3101_v23  ;;  %v4088_v62 = vld [vmem:[%s4415_s25 + $0x1e4] sm:$0xf0] }
 0x141   : > { %2546 = vmatmul.bf16.gmra.mxu2 %v3105_v58  ;;  %v3226_v58 = vld [vmem:[%s4415_s25 + $0x1e0] sm:$0xf0]  ;;  %2684 = vmatpush.bf16.msrb.mxu1 %v4262_v53 }
 0x142   : > { %2595 = vmatmul.bf16.gmra.mxu3 %v3109_v59  ;;  %v3232_v59 = vld [vmem:[%s4415_s25 + $0x1a8] sm:$0xf] }
 0x144   : > { %v2351_v6 = vpop.f32.mrf.mxu2  ;;  %v2255_v9 = vpop.f32.mrf.mxu0 }
 0x145   : > { %v2400_v34 = vpop.f32.mrf.mxu3  ;;  %v2352_v7 = vadd.f32 %v2351_v6, %v2303_v0  ;;  %v2304_v11 = vpop.f32.mrf.mxu1  ;;  %v2256_v12 = vadd.f32 %v2255_v9, %v4577_v56  ;;  %v3165_v56 = vor.u32 %v4063_v17, %v3162_v18  ;;  %v4080_v0 = vld [vmem:[%s4415_s25 + $0x1ac] sm:$0xf]  ;;  %v3225_v6 = vor.u32 %v4087_v55, %v3224_v54  ;;  %v4253_v17 = vld [vmem:[%s4378_s19 + $0x310] sm:$0xff] }
 0x146   : > { %v4277_v18 = vld [vmem:[%s4378_s19 + $0x3d0] sm:$0xff]  ;;  %2636 = vmatpush.bf16.msrb.mxu0 %v4253_v17  ;;  %v4268_v55 = vld [vmem:[%s4378_s19 + $0x388] sm:$0xff] }
 0x147   : > { %v4709_v13 = vadd.f32 %v2400_v34, %v2352_v7  ;;  %v2305_v40 = vadd.f32 %v2304_v11, %v2256_v12  ;;  %v3233_v11 = vor.u32 %v4088_v62, %v3232_v59  ;;  %v3237_v12 = vor.u32 %v4080_v0, %v3234_v1  ;;  %2783 = vmatpush.bf16.msrb.mxu3 %v4277_v18 }
 0x148   : > { %2735 = vmatpush.bf16.msrb.mxu2 %v4268_v55  ;;  %v3426_v55 = vld [vmem:[%s4415_s25 + $0x368] sm:$0xf0] }
 0x14c   : > { %v2353_v27 = vpop.f32.mrf.mxu2  ;;  %v2258_v30 = vpop.f32.mrf.mxu0 }
 0x14d   : > { %v2402_v28 = vpop.f32.mrf.mxu3  ;;  %v2354_v2 = vadd.f32 %v2353_v27, %v2305_v40  ;;  %v2307_v31 = vpop.f32.mrf.mxu1  ;;  %v2259_v37 = vadd.f32 %v2258_v30, %v4583_v4  ;;  %v4103_v30 = vld [vmem:[%s4415_s25 + $0x25c] sm:$0xf0] }
 0x14f   : > { %v4721_v39 = vadd.f32 %v2402_v28, %v2354_v2  ;;  %v2308_v41 = vadd.f32 %v2307_v31, %v2259_v37  ;;  %2453 = vmatmul.bf16.gmra.mxu0 %v3161_v29  ;;  %v4261_v29 = vld [vmem:[%s4378_s19 + $0x350] sm:$0xff]  ;;  %v3288_v2 = vld [vmem:[%s4415_s25 + $0x220] sm:$0xf]  ;;  %v4095_v31 = vld [vmem:[%s4415_s25 + $0x224] sm:$0xf] }
 0x150   : > { %2502 = vmatmul.bf16.gmra.mxu1 %v3165_v56  ;;  %v4104_v37 = vld [vmem:[%s4415_s25 + $0x264] sm:$0xf0] }
 0x151   : > { %2551 = vmatmul.bf16.gmra.mxu2 %v3169_v32  ;;  %v3290_v32 = vld [vmem:[%s4415_s25 + $0x260] sm:$0xf0]  ;;  %2685 = vmatpush.bf16.msrb.mxu1 %v4261_v29 }
 0x152   : > { %2600 = vmatmul.bf16.gmra.mxu3 %v3173_v35  ;;  %v3296_v35 = vld [vmem:[%s4415_s25 + $0x228] sm:$0xf] }
 0x154   : > { %v2356_v45 = vpop.f32.mrf.mxu2  ;;  %v2260_v49 = vpop.f32.mrf.mxu0 }
 0x155   : > { %v2405_v4 = vpop.f32.mrf.mxu3  ;;  %v2357_v46 = vadd.f32 %v2356_v45, %v2308_v41  ;;  %v2309_v50 = vpop.f32.mrf.mxu1  ;;  %v2261_v51 = vadd.f32 %v2260_v49, %v4595_v26  ;;  %v3229_v26 = vor.u32 %v4079_v57, %v3226_v58  ;;  %v4096_v41 = vld [vmem:[%s4415_s25 + $0x22c] sm:$0xf]  ;;  %v3289_v45 = vor.u32 %v4103_v30, %v3288_v2  ;;  %v4267_v30 = vld [vmem:[%s4378_s19 + $0x380] sm:$0xff] }
 0x156   : > { %v4252_v57 = vld [vmem:[%s4378_s19 + $0x308] sm:$0xff]  ;;  %2736 = vmatpush.bf16.msrb.mxu2 %v4267_v30 }
 0x157   : > { %v4727_v52 = vadd.f32 %v2405_v4, %v2357_v46  ;;  %v2310_v23 = vadd.f32 %v2309_v50, %v2261_v51  ;;  %v3297_v50 = vor.u32 %v4104_v37, %v3296_v35  ;;  %v3301_v51 = vor.u32 %v4096_v41, %v3298_v42  ;;  %v4276_v58 = vld [vmem:[%s4378_s19 + $0x3c8] sm:$0xff]  ;;  %2637 = vmatpush.bf16.msrb.mxu0 %v4252_v57 }
 0x158   : > { %2784 = vmatpush.bf16.msrb.mxu3 %v4276_v58 }
 0x15c   : > { %v2358_v3 = vpop.f32.mrf.mxu2  ;;  %v2263_v7 = vpop.f32.mrf.mxu0 }
 0x15d   : > { %v2407_v5 = vpop.f32.mrf.mxu3  ;;  %v2359_v34 = vadd.f32 %v2358_v3, %v2310_v23  ;;  %v2312_v9 = vpop.f32.mrf.mxu1  ;;  %v2264_v14 = vadd.f32 %v2263_v7, %v4601_v38  ;;  %v4119_v7 = vld [vmem:[%s4415_s25 + $0x2dc] sm:$0xf0] }
 0x15f   : > { %v4739_v40 = vadd.f32 %v2407_v5, %v2359_v34  ;;  %v2313_v15 = vadd.f32 %v2312_v9, %v2264_v14  ;;  %2458 = vmatmul.bf16.gmra.mxu0 %v3225_v6  ;;  %v4260_v6 = vld [vmem:[%s4378_s19 + $0x348] sm:$0xff]  ;;  %v3352_v34 = vld [vmem:[%s4415_s25 + $0x2a0] sm:$0xf]  ;;  %v4111_v9 = vld [vmem:[%s4415_s25 + $0x2a4] sm:$0xf] }
 0x160   : > { %2507 = vmatmul.bf16.gmra.mxu1 %v3229_v26  ;;  %v4120_v14 = vld [vmem:[%s4415_s25 + $0x2e4] sm:$0xf0] }
 0x161   : > { %2556 = vmatmul.bf16.gmra.mxu2 %v3233_v11  ;;  %v3354_v11 = vld [vmem:[%s4415_s25 + $0x2e0] sm:$0xf0]  ;;  %2686 = vmatpush.bf16.msrb.mxu1 %v4260_v6 }
 0x162   : > { %2605 = vmatmul.bf16.gmra.mxu3 %v3237_v12  ;;  %v3360_v12 = vld [vmem:[%s4415_s25 + $0x2a8] sm:$0xf] }
 0x164   : > { %v2361_v19 = vpop.f32.mrf.mxu2  ;;  %v2265_v24 = vpop.f32.mrf.mxu0 }
 0x165   : > { %v2410_v38 = vpop.f32.mrf.mxu3  ;;  %v2362_v21 = vadd.f32 %v2361_v19, %v2313_v15  ;;  %v2314_v25 = vpop.f32.mrf.mxu1  ;;  %v2266_v27 = vadd.f32 %v2265_v24, %v4613_v61  ;;  %v3293_v61 = vor.u32 %v4095_v31, %v3290_v32  ;;  %v4112_v15 = vld [vmem:[%s4415_s25 + $0x2ac] sm:$0xf]  ;;  %v3353_v19 = vor.u32 %v4119_v7, %v3352_v34  ;;  %v4251_v31 = vld [vmem:[%s4378_s19 + $0x300] sm:$0xff] }
 0x166   : > { %v4275_v32 = vld [vmem:[%s4378_s19 + $0x3c0] sm:$0xff]  ;;  %2638 = vmatpush.bf16.msrb.mxu0 %v4251_v31 }
 0x167   : > { %v4745_v28 = vadd.f32 %v2410_v38, %v2362_v21  ;;  %v2315_v56 = vadd.f32 %v2314_v25, %v2266_v27  ;;  %v3361_v25 = vor.u32 %v4120_v14, %v3360_v12  ;;  %v3365_v27 = vor.u32 %v4112_v15, %v3362_v16  ;;  %2785 = vmatpush.bf16.msrb.mxu3 %v4275_v32 }
 0x16c   : > { %v2363_v43 = vpop.f32.mrf.mxu2  ;;  %v2268_v46 = vpop.f32.mrf.mxu0 }
 0x16d   : > { %v2412_v44 = vpop.f32.mrf.mxu3  ;;  %v2364_v4 = vadd.f32 %v2363_v43, %v2315_v56  ;;  %v2317_v49 = vpop.f32.mrf.mxu1  ;;  %v2269_v53 = vadd.f32 %v2268_v46, %v4619_v10  ;;  %v4135_v46 = vld [vmem:[%s4415_s25 + $0x35c] sm:$0xf0] }
 0x16f   : > { %v4757_v23 = vadd.f32 %v2412_v44, %v2364_v4  ;;  %v2318_v54 = vadd.f32 %v2317_v49, %v2269_v53  ;;  %2463 = vmatmul.bf16.gmra.mxu0 %v3289_v45  ;;  %v4259_v45 = vld [vmem:[%s4378_s19 + $0x340] sm:$0xff]  ;;  %v4136_v53 = vld [vmem:[%s4415_s25 + $0x364] sm:$0xf0] }
 0x170   : > { %2512 = vmatmul.bf16.gmra.mxu1 %v3293_v61  ;;  %v3416_v4 = vld [vmem:[%s4415_s25 + $0x320] sm:$0xf]  ;;  %v4127_v49 = vld [vmem:[%s4415_s25 + $0x324] sm:$0xf] }
 0x171   : > { %2561 = vmatmul.bf16.gmra.mxu2 %v3297_v50  ;;  %v3418_v50 = vld [vmem:[%s4415_s25 + $0x360] sm:$0xf0]  ;;  %2687 = vmatpush.bf16.msrb.mxu1 %v4259_v45 }
 0x172   : > { %2610 = vmatmul.bf16.gmra.mxu3 %v3301_v51  ;;  %v3424_v51 = vld [vmem:[%s4415_s25 + $0x328] sm:$0xf] }
 0x174   : > { %v2366_v59 = vpop.f32.mrf.mxu2  ;;  %v2270_v0 = vpop.f32.mrf.mxu0 }
 0x175   : > { %v2415_v10 = vpop.f32.mrf.mxu3  ;;  %v2367_v62 = vadd.f32 %v2366_v59, %v2318_v54  ;;  %v2319_v1 = vpop.f32.mrf.mxu1  ;;  %v2271_v3 = vadd.f32 %v2270_v0, %v4631_v33  ;;  %v3357_v33 = vor.u32 %v4111_v9, %v3354_v11  ;;  %v4128_v54 = vld [vmem:[%s4415_s25 + $0x32c] sm:$0xf]  ;;  %v3417_v59 = vor.u32 %v4135_v46, %v3416_v4 }
 0x177   : > { %v4763_v5 = vadd.f32 %v2415_v10, %v2367_v62  ;;  %v2320_v26 = vadd.f32 %v2319_v1, %v2271_v3  ;;  %v3421_v10 = vor.u32 %v4127_v49, %v3418_v50  ;;  %v3425_v1 = vor.u32 %v4136_v53, %v3424_v51  ;;  %v3048_v51 = vld [vmem:[%s4415_s25 + $0x30] sm:$0xf] }
 0x178   : > { %v3429_v3 = vor.u32 %v4128_v54, %v3426_v55  ;;  %v4041_v53 = vld [vmem:[%s4415_s25 + $0x6c] sm:$0xf0]  ;;  %v4033_v54 = vld [vmem:[%s4415_s25 + $0x34] sm:$0xf] }
 0x179   : > { %v3050_v55 = vld [vmem:[%s4415_s25 + $0x70] sm:$0xf0] }
 0x17c   : > { %v2368_v17 = vpop.f32.mrf.mxu2  ;;  %v2273_v21 = vpop.f32.mrf.mxu0 }
 0x17d   : > { %v2417_v18 = vpop.f32.mrf.mxu3  ;;  %v2369_v38 = vadd.f32 %v2368_v17, %v2320_v26  ;;  %v2322_v24 = vpop.f32.mrf.mxu1  ;;  %v2274_v29 = vadd.f32 %v2273_v21, %v4637_v47  ;;  %v3480_v17 = vld [vmem:[%s4415_s25 + $0x3a0] sm:$0xf]  ;;  %v4152_v21 = vld [vmem:[%s4415_s25 + $0x3e4] sm:$0xf0] }
 0x17f   : > { %v4775_v56 = vadd.f32 %v2417_v18, %v2369_v38  ;;  %v2323_v2 = vadd.f32 %v2322_v24, %v2274_v29  ;;  %2468 = vmatmul.bf16.gmra.mxu0 %v3353_v19  ;;  %v4151_v18 = vld [vmem:[%s4415_s25 + $0x3dc] sm:$0xf0]  ;;  %v4143_v19 = vld [vmem:[%s4415_s25 + $0x3a4] sm:$0xf]  ;;  %v3488_v38 = vld [vmem:[%s4415_s25 + $0x3a8] sm:$0xf] }
 0x180   : > { %2517 = vmatmul.bf16.gmra.mxu1 %v3357_v33  ;;  %v3482_v33 = vld [vmem:[%s4415_s25 + $0x3e0] sm:$0xf0]  ;;  %v4144_v24 = vld [vmem:[%s4415_s25 + $0x3ac] sm:$0xf] }
 0x181   : > { %2566 = vmatmul.bf16.gmra.mxu2 %v3361_v25  ;;  %v3490_v25 = vld [vmem:[%s4415_s25 + $0x3e8] sm:$0xf0]  ;;  %v3485_v30 = vor.u32 %v4143_v19, %v3482_v33 }
 0x182   : > { %2615 = vmatmul.bf16.gmra.mxu3 %v3365_v27 }
 0x184   : > { %v2371_v35 = vpop.f32.mrf.mxu2  ;;  %v2275_v41 = vpop.f32.mrf.mxu0 }
 0x185   : > { %v2420_v47 = vpop.f32.mrf.mxu3  ;;  %v2372_v37 = vadd.f32 %v2371_v35, %v2323_v2  ;;  %v2324_v42 = vpop.f32.mrf.mxu1  ;;  %v2276_v43 = vadd.f32 %v2275_v41, %v4649_v8  ;;  %v3481_v2 = vor.u32 %v4151_v18, %v3480_v17 }
 0x187   : > { %v4781_v44 = vadd.f32 %v2420_v47, %v2372_v37  ;;  %v2325_v61 = vadd.f32 %v2324_v42, %v2276_v43  ;;  %v3489_v47 = vor.u32 %v4152_v21, %v3488_v38  ;;  %v3112_v38 = vld [vmem:[%s4415_s25 + $0xb0] sm:$0xf] }
 0x188   : > { %v4057_v21 = vld [vmem:[%s4415_s25 + $0xec] sm:$0xf0] }
 0x18c   : > { %v2373_v57 = vpop.f32.mrf.mxu2  ;;  %v2278_v0 = vpop.f32.mrf.mxu0 }
 0x18d   : > { %v2422_v58 = vpop.f32.mrf.mxu3  ;;  %v2374_v62 = vadd.f32 %v2373_v57, %v2325_v61  ;;  %v2327_v8 = vpop.f32.mrf.mxu1  ;;  %v2279_v6 = vadd.f32 %v2278_v0, %v4655_v20  ;;  %v3056_v57 = vld [vmem:[%s4415_s25 + $0x38] sm:$0xf] }
 0x18f   : > { %v4793_v26 = vadd.f32 %v2422_v58, %v2374_v62  ;;  %v2328_v34 = vadd.f32 %v2327_v8, %v2279_v6  ;;  %2473 = vmatmul.bf16.gmra.mxu0 %v3417_v59  ;;  %v4042_v58 = vld [vmem:[%s4415_s25 + $0x74] sm:$0xf0]  ;;  %v4034_v59 = vld [vmem:[%s4415_s25 + $0x3c] sm:$0xf]  ;;  %v3049_v8 = vor.u32 %v4041_v53, %v3048_v51 }
 0x190   : > { %2522 = vmatmul.bf16.gmra.mxu1 %v3421_v10  ;;  %v3058_v10 = vld [vmem:[%s4415_s25 + $0x78] sm:$0xf0] }
 0x191   : > { %2571 = vmatmul.bf16.gmra.mxu2 %v3425_v1  ;;  %v3053_v1 = vor.u32 %v4033_v54, %v3050_v55 }
 0x192   : > { %2620 = vmatmul.bf16.gmra.mxu3 %v3429_v3 }
 0x194   : > { %v2376_v7 = vpop.f32.mrf.mxu2  ;;  %v2280_v12 = vpop.f32.mrf.mxu0 }
 0x195   : > { %v2425_v9 = vpop.f32.mrf.mxu3  ;;  %v2377_v11 = vadd.f32 %v2376_v7, %v2328_v34  ;;  %v2329_v14 = vpop.f32.mrf.mxu1  ;;  %v2281_v20 = vadd.f32 %v2280_v12, %v4667_v48  ;;  %v3493_v48 = vor.u32 %v4144_v24, %v3490_v25  ;;  %v3057_v7 = vor.u32 %v4042_v58, %v3056_v57  ;;  %v4049_v24 = vld [vmem:[%s4415_s25 + $0xb4] sm:$0xf]  ;;  %v3176_v57 = vld [vmem:[%s4415_s25 + $0x130] sm:$0xf] }
 0x196   : > { %v3114_v25 = vld [vmem:[%s4415_s25 + $0xf0] sm:$0xf0]  ;;  %v4073_v58 = vld [vmem:[%s4415_s25 + $0x16c] sm:$0xf0] }
 0x197   : > { %v4796_v15 = vadd.f32 %v2425_v9, %v2377_v11  ;;  %v2330_v16 = vadd.f32 %v2329_v14, %v2281_v20 }
 0x19c   : > { %v2378_v27 = vpop.f32.mrf.mxu2  ;;  %v2283_v32 = vpop.f32.mrf.mxu0 }
 0x19d   : > { %v2427_v29 = vpop.f32.mrf.mxu3  ;;  %v2379_v31 = vadd.f32 %v2378_v27, %v2330_v16  ;;  %v2332_v35 = vpop.f32.mrf.mxu1  ;;  %v2284_v37 = vadd.f32 %v2283_v32, %v4673_v60  ;;  %v3120_v27 = vld [vmem:[%s4415_s25 + $0xb8] sm:$0xf] }
 0x19f   : > { %v4807_v41 = vadd.f32 %v2427_v29, %v2379_v31  ;;  %v2333_v42 = vadd.f32 %v2332_v35, %v2284_v37  ;;  %2478 = vmatmul.bf16.gmra.mxu0 %v3481_v2  ;;  %v4058_v29 = vld [vmem:[%s4415_s25 + $0xf4] sm:$0xf0]  ;;  %v4050_v2 = vld [vmem:[%s4415_s25 + $0xbc] sm:$0xf]  ;;  %v3113_v35 = vor.u32 %v4057_v21, %v3112_v38 }
 0x1a0   : > { %2527 = vmatmul.bf16.gmra.mxu1 %v3485_v30  ;;  %v3122_v30 = vld [vmem:[%s4415_s25 + $0xf8] sm:$0xf0] }
 0x1a1   : > { %2576 = vmatmul.bf16.gmra.mxu2 %v3489_v47  ;;  %v3117_v47 = vor.u32 %v4049_v24, %v3114_v25 }
 0x1a2   : > { %2625 = vmatmul.bf16.gmra.mxu3 %v3493_v48 }
 0x1a4   : > { %v2381_v43 = vpop.f32.mrf.mxu2  ;;  %v2285_v4 = vpop.f32.mrf.mxu0 }
 0x1a5   : > { %v2430_v45 = vpop.f32.mrf.mxu3  ;;  %v2382_v61 = vadd.f32 %v2381_v43, %v2333_v42  ;;  %v2334_v46 = vpop.f32.mrf.mxu1  ;;  %v2286_v60 = vadd.f32 %v2285_v4, %v4685_v22  ;;  %v3061_v22 = vor.u32 %v4034_v59, %v3058_v10  ;;  %v3121_v43 = vor.u32 %v4058_v29, %v3120_v27  ;;  %v4065_v59 = vld [vmem:[%s4415_s25 + $0x134] sm:$0xf]  ;;  %v3240_v27 = vld [vmem:[%s4415_s25 + $0x1b0] sm:$0xf] }
 0x1a6   : > { %v3178_v10 = vld [vmem:[%s4415_s25 + $0x170] sm:$0xf0]  ;;  %v4089_v29 = vld [vmem:[%s4415_s25 + $0x1ec] sm:$0xf0] }
 0x1a7   : > { %v4810_v49 = vadd.f32 %v2430_v45, %v2382_v61  ;;  %v2335_v50 = vadd.f32 %v2334_v46, %v2286_v60 }
 0x1ac   : > { %v2383_v62 = vpop.f32.mrf.mxu2  ;;  %v2444_v6 = vpop.f32.mrf.mxu0 }
 0x1ad   : > { %v2432_v0 = vpop.f32.mrf.mxu3  ;;  %v2384_v3 = vadd.f32 %v2383_v62, %v2335_v50  ;;  %v2493_v34 = vpop.f32.mrf.mxu1  ;;  %v2445_v9 = vadd.f32 %v2444_v6, %v4691_v36  ;;  %v3184_v62 = vld [vmem:[%s4415_s25 + $0x138] sm:$0xf] }
 0x1af   : > { %v4821_v11 = vadd.f32 %v2432_v0, %v2384_v3  ;;  %v2494_v12 = vadd.f32 %v2493_v34, %v2445_v9  ;;  %2639 = vmatmul.bf16.vlgmr.msrb.gmra.mxu0 %v3049_v8  ;;  %v4074_v0 = vld [vmem:[%s4415_s25 + $0x174] sm:$0xf0]  ;;  %v4066_v8 = vld [vmem:[%s4415_s25 + $0x13c] sm:$0xf]  ;;  %v3177_v34 = vor.u32 %v4073_v58, %v3176_v57 }
 0x1b0   : > { %2688 = vmatmul.bf16.vlgmr.msrb.gmra.mxu1 %v3053_v1  ;;  %v3186_v1 = vld [vmem:[%s4415_s25 + $0x178] sm:$0xf0] }
 0x1b1   : > { %2737 = vmatmul.bf16.vlgmr.msrb.gmra.mxu2 %v3057_v7  ;;  %v3181_v7 = vor.u32 %v4065_v59, %v3178_v10 }
 0x1b2   : > { %2786 = vmatmul.bf16.vlgmr.msrb.gmra.mxu3 %v3061_v22 }
 0x1b4   : > { %v2542_v14 = vpop.f32.mrf.mxu2  ;;  %v2446_v17 = vpop.f32.mrf.mxu0 }
 0x1b5   : > { %v2591_v20 = vpop.f32.mrf.mxu3  ;;  %v2543_v16 = vadd.f32 %v2542_v14, %v2494_v12  ;;  %v2495_v18 = vpop.f32.mrf.mxu1  ;;  %v2447_v36 = vadd.f32 %v2446_v17, %v4703_v63  ;;  %v3125_v63 = vor.u32 %v4050_v2, %v3122_v30  ;;  %v3185_v14 = vor.u32 %v4074_v0, %v3184_v62  ;;  %v4081_v2 = vld [vmem:[%s4415_s25 + $0x1b4] sm:$0xf]  ;;  %v3304_v62 = vld [vmem:[%s4415_s25 + $0x230] sm:$0xf] }
 0x1b6   : > { %v3242_v30 = vld [vmem:[%s4415_s25 + $0x1f0] sm:$0xf0]  ;;  %v4105_v0 = vld [vmem:[%s4415_s25 + $0x26c] sm:$0xf0] }
 0x1b7   : > { %v4824_v19 = vadd.f32 %v2591_v20, %v2543_v16  ;;  %v2496_v33 = vadd.f32 %v2495_v18, %v2447_v36 }
 0x1bc   : > { %v2544_v31 = vpop.f32.mrf.mxu2  ;;  %v2449_v37 = vpop.f32.mrf.mxu0 }
 0x1bd   : > { %v2593_v32 = vpop.f32.mrf.mxu3  ;;  %v2545_v48 = vadd.f32 %v2544_v31, %v2496_v33  ;;  %v2498_v42 = vpop.f32.mrf.mxu1  ;;  %v2450_v45 = vadd.f32 %v2449_v37, %v4709_v13  ;;  %v3248_v31 = vld [vmem:[%s4415_s25 + $0x1b8] sm:$0xf] }
 0x1bf   : > { %v4835_v61 = vadd.f32 %v2593_v32, %v2545_v48  ;;  %v2499_v4 = vadd.f32 %v2498_v42, %v2450_v45  ;;  %2644 = vmatmul.bf16.gmra.mxu0 %v3113_v35  ;;  %v4090_v32 = vld [vmem:[%s4415_s25 + $0x1f4] sm:$0xf0]  ;;  %v4082_v35 = vld [vmem:[%s4415_s25 + $0x1bc] sm:$0xf]  ;;  %v3241_v42 = vor.u32 %v4089_v29, %v3240_v27 }
 0x1c0   : > { %2693 = vmatmul.bf16.gmra.mxu1 %v3117_v47  ;;  %v3250_v47 = vld [vmem:[%s4415_s25 + $0x1f8] sm:$0xf0] }
 0x1c1   : > { %2742 = vmatmul.bf16.gmra.mxu2 %v3121_v43  ;;  %v3245_v43 = vor.u32 %v4081_v2, %v3242_v30 }
 0x1c2   : > { %2791 = vmatmul.bf16.gmra.mxu3 %v3125_v63 }
 0x1c4   : > { %v2547_v46 = vpop.f32.mrf.mxu2  ;;  %v2451_v51 = vpop.f32.mrf.mxu0 }
 0x1c5   : > { %v2596_v60 = vpop.f32.mrf.mxu3  ;;  %v2548_v50 = vadd.f32 %v2547_v46, %v2499_v4  ;;  %v2500_v53 = vpop.f32.mrf.mxu1  ;;  %v2452_v13 = vadd.f32 %v2451_v51, %v4721_v39  ;;  %v3189_v39 = vor.u32 %v4066_v8, %v3186_v1  ;;  %v3249_v46 = vor.u32 %v4090_v32, %v3248_v31  ;;  %v4097_v8 = vld [vmem:[%s4415_s25 + $0x234] sm:$0xf]  ;;  %v3368_v31 = vld [vmem:[%s4415_s25 + $0x2b0] sm:$0xf] }
 0x1c6   : > { %v3306_v1 = vld [vmem:[%s4415_s25 + $0x270] sm:$0xf0]  ;;  %v4121_v32 = vld [vmem:[%s4415_s25 + $0x2ec] sm:$0xf0] }
 0x1c7   : > { %v4838_v54 = vadd.f32 %v2596_v60, %v2548_v50  ;;  %v2501_v55 = vadd.f32 %v2500_v53, %v2452_v13 }
 0x1cc   : > { %v2549_v3 = vpop.f32.mrf.mxu2  ;;  %v2454_v9 = vpop.f32.mrf.mxu0 }
 0x1cd   : > { %v2598_v6 = vpop.f32.mrf.mxu3  ;;  %v2550_v22 = vadd.f32 %v2549_v3, %v2501_v55  ;;  %v2503_v12 = vpop.f32.mrf.mxu1  ;;  %v2455_v20 = vadd.f32 %v2454_v9, %v4727_v52  ;;  %v3312_v3 = vld [vmem:[%s4415_s25 + $0x238] sm:$0xf] }
 0x1cf   : > { %v4849_v16 = vadd.f32 %v2598_v6, %v2550_v22  ;;  %v2504_v17 = vadd.f32 %v2503_v12, %v2455_v20  ;;  %2649 = vmatmul.bf16.gmra.mxu0 %v3177_v34  ;;  %v4106_v6 = vld [vmem:[%s4415_s25 + $0x274] sm:$0xf0]  ;;  %v4098_v34 = vld [vmem:[%s4415_s25 + $0x23c] sm:$0xf]  ;;  %v3305_v12 = vor.u32 %v4105_v0, %v3304_v62 }
 0x1d0   : > { %2698 = vmatmul.bf16.gmra.mxu1 %v3181_v7  ;;  %v3314_v7 = vld [vmem:[%s4415_s25 + $0x278] sm:$0xf0] }
 0x1d1   : > { %2747 = vmatmul.bf16.gmra.mxu2 %v3185_v14  ;;  %v3309_v14 = vor.u32 %v4097_v8, %v3306_v1 }
 0x1d2   : > { %2796 = vmatmul.bf16.gmra.mxu3 %v3189_v39 }
 0x1d4   : > { %v2552_v18 = vpop.f32.mrf.mxu2  ;;  %v2456_v38 = vpop.f32.mrf.mxu0 }
 0x1d5   : > { %v2601_v36 = vpop.f32.mrf.mxu3  ;;  %v2553_v33 = vadd.f32 %v2552_v18, %v2504_v17  ;;  %v2505_v21 = vpop.f32.mrf.mxu1  ;;  %v2457_v52 = vadd.f32 %v2456_v38, %v4739_v40  ;;  %v3253_v40 = vor.u32 %v4082_v35, %v3250_v47  ;;  %v3313_v18 = vor.u32 %v4106_v6, %v3312_v3  ;;  %v4113_v35 = vld [vmem:[%s4415_s25 + $0x2b4] sm:$0xf]  ;;  %v3432_v3 = vld [vmem:[%s4415_s25 + $0x330] sm:$0xf] }
 0x1d6   : > { %v3370_v47 = vld [vmem:[%s4415_s25 + $0x2f0] sm:$0xf0]  ;;  %v4137_v6 = vld [vmem:[%s4415_s25 + $0x36c] sm:$0xf0] }
 0x1d7   : > { %v4852_v24 = vadd.f32 %v2601_v36, %v2553_v33  ;;  %v2506_v25 = vadd.f32 %v2505_v21, %v2457_v52 }
 0x1dc   : > { %v2554_v48 = vpop.f32.mrf.mxu2  ;;  %v2459_v45 = vpop.f32.mrf.mxu0 }
 0x1dd   : > { %v2603_v37 = vpop.f32.mrf.mxu3  ;;  %v2555_v63 = vadd.f32 %v2554_v48, %v2506_v25  ;;  %v2508_v4 = vpop.f32.mrf.mxu1  ;;  %v2460_v60 = vadd.f32 %v2459_v45, %v4745_v28  ;;  %v3376_v48 = vld [vmem:[%s4415_s25 + $0x2b8] sm:$0xf] }
 0x1df   : > { %v4863_v50 = vadd.f32 %v2603_v37, %v2555_v63  ;;  %v2509_v51 = vadd.f32 %v2508_v4, %v2460_v60  ;;  %2654 = vmatmul.bf16.gmra.mxu0 %v3241_v42  ;;  %v4122_v37 = vld [vmem:[%s4415_s25 + $0x2f4] sm:$0xf0]  ;;  %v4114_v42 = vld [vmem:[%s4415_s25 + $0x2bc] sm:$0xf]  ;;  %v3369_v4 = vor.u32 %v4121_v32, %v3368_v31 }
 0x1e0   : > { %2703 = vmatmul.bf16.gmra.mxu1 %v3245_v43  ;;  %v3378_v43 = vld [vmem:[%s4415_s25 + $0x2f8] sm:$0xf0] }
 0x1e1   : > { %2752 = vmatmul.bf16.gmra.mxu2 %v3249_v46  ;;  %v3373_v46 = vor.u32 %v4113_v35, %v3370_v47 }
 0x1e2   : > { %2801 = vmatmul.bf16.gmra.mxu3 %v3253_v40 }
 0x1e4   : > { %v2557_v53 = vpop.f32.mrf.mxu2  ;;  %v2461_v57 = vpop.f32.mrf.mxu0 }
 0x1e5   : > { %v2606_v13 = vpop.f32.mrf.mxu3  ;;  %v2558_v55 = vadd.f32 %v2557_v53, %v2509_v51  ;;  %v2510_v58 = vpop.f32.mrf.mxu1  ;;  %v2462_v28 = vadd.f32 %v2461_v57, %v4757_v23  ;;  %v3317_v23 = vor.u32 %v4098_v34, %v3314_v7  ;;  %v3377_v53 = vor.u32 %v4122_v37, %v3376_v48  ;;  %v4129_v34 = vld [vmem:[%s4415_s25 + $0x334] sm:$0xf]  ;;  %v3496_v48 = vld [vmem:[%s4415_s25 + $0x3b0] sm:$0xf] }
 0x1e6   : > { %v3434_v7 = vld [vmem:[%s4415_s25 + $0x370] sm:$0xf0]  ;;  %v4153_v37 = vld [vmem:[%s4415_s25 + $0x3ec] sm:$0xf0] }
 0x1e7   : > { %v4866_v59 = vadd.f32 %v2606_v13, %v2558_v55  ;;  %v2511_v10 = vadd.f32 %v2510_v58, %v2462_v28 }
 0x1ec   : > { %v2559_v22 = vpop.f32.mrf.mxu2  ;;  %v2464_v20 = vpop.f32.mrf.mxu0 }
 0x1ed   : > { %v2608_v9 = vpop.f32.mrf.mxu3  ;;  %v2560_v39 = vadd.f32 %v2559_v22, %v2511_v10  ;;  %v2513_v17 = vpop.f32.mrf.mxu1  ;;  %v2465_v36 = vadd.f32 %v2464_v20, %v4763_v5  ;;  %v3440_v22 = vld [vmem:[%s4415_s25 + $0x338] sm:$0xf] }
 0x1ef   : > { %v4877_v33 = vadd.f32 %v2608_v9, %v2560_v39  ;;  %v2514_v38 = vadd.f32 %v2513_v17, %v2465_v36  ;;  %2659 = vmatmul.bf16.gmra.mxu0 %v3305_v12  ;;  %v4138_v9 = vld [vmem:[%s4415_s25 + $0x374] sm:$0xf0]  ;;  %v4130_v12 = vld [vmem:[%s4415_s25 + $0x33c] sm:$0xf]  ;;  %v3433_v17 = vor.u32 %v4137_v6, %v3432_v3 }
 0x1f0   : > { %2708 = vmatmul.bf16.gmra.mxu1 %v3309_v14  ;;  %v3442_v14 = vld [vmem:[%s4415_s25 + $0x378] sm:$0xf0] }
 0x1f1   : > { %2757 = vmatmul.bf16.gmra.mxu2 %v3313_v18  ;;  %v3437_v18 = vor.u32 %v4129_v34, %v3434_v7 }
 0x1f2   : > { %2806 = vmatmul.bf16.gmra.mxu3 %v3317_v23 }
 0x1f4   : > { %v2562_v21 = vpop.f32.mrf.mxu2  ;;  %v2466_v27 = vpop.f32.mrf.mxu0 }
 0x1f5   : > { %v2611_v52 = vpop.f32.mrf.mxu3  ;;  %v2563_v25 = vadd.f32 %v2562_v21, %v2514_v38  ;;  %v2515_v29 = vpop.f32.mrf.mxu1  ;;  %v2467_v5 = vadd.f32 %v2466_v27, %v4775_v56  ;;  %v3381_v56 = vor.u32 %v4114_v42, %v3378_v43  ;;  %v3441_v21 = vor.u32 %v4138_v9, %v3440_v22  ;;  %v4145_v42 = vld [vmem:[%s4415_s25 + $0x3b4] sm:$0xf] }
 0x1f6   : > { %v3498_v43 = vld [vmem:[%s4415_s25 + $0x3f0] sm:$0xf0] }
 0x1f7   : > { %v4880_v2 = vadd.f32 %v2611_v52, %v2563_v25  ;;  %v2516_v30 = vadd.f32 %v2515_v29, %v2467_v5 }
 0x1fc   : > { %v2564_v63 = vpop.f32.mrf.mxu2  ;;  %v2469_v60 = vpop.f32.mrf.mxu0 }
 0x1fd   : > { %v2613_v45 = vpop.f32.mrf.mxu3  ;;  %v2565_v40 = vadd.f32 %v2564_v63, %v2516_v30  ;;  %v2518_v51 = vpop.f32.mrf.mxu1  ;;  %v2470_v13 = vadd.f32 %v2469_v60, %v4781_v44  ;;  %v3504_v63 = vld [vmem:[%s4415_s25 + $0x3b8] sm:$0xf] }
 0x1ff   : > { %v4891_v55 = vadd.f32 %v2613_v45, %v2565_v40  ;;  %v2519_v57 = vadd.f32 %v2518_v51, %v2470_v13  ;;  %2664 = vmatmul.bf16.gmra.mxu0 %v3369_v4  ;;  %v4154_v45 = vld [vmem:[%s4415_s25 + $0x3f4] sm:$0xf0]  ;;  %v4146_v4 = vld [vmem:[%s4415_s25 + $0x3bc] sm:$0xf]  ;;  %v3497_v51 = vor.u32 %v4153_v37, %v3496_v48 }
 0x200   : > { %2713 = vmatmul.bf16.gmra.mxu1 %v3373_v46  ;;  %v3506_v46 = vld [vmem:[%s4415_s25 + $0x3f8] sm:$0xf0] }
 0x201   : > { %2762 = vmatmul.bf16.gmra.mxu2 %v3377_v53  ;;  %v3501_v53 = vor.u32 %v4145_v42, %v3498_v43 }
 0x202   : > { %2811 = vmatmul.bf16.gmra.mxu3 %v3381_v56 }
 0x204   : > { %v2567_v58 = vpop.f32.mrf.mxu2  ;;  %v2471_v62 = vpop.f32.mrf.mxu0 }
 0x205   : > { %v2616_v28 = vpop.f32.mrf.mxu3  ;;  %v2568_v10 = vadd.f32 %v2567_v58, %v2519_v57  ;;  %v2520_v0 = vpop.f32.mrf.mxu1  ;;  %v2472_v44 = vadd.f32 %v2471_v62, %v4793_v26  ;;  %v3445_v26 = vor.u32 %v4130_v12, %v3442_v14  ;;  %v3505_v58 = vor.u32 %v4154_v45, %v3504_v63 }
 0x207   : > { %v4894_v8 = vadd.f32 %v2616_v28, %v2568_v10  ;;  %v2521_v1 = vadd.f32 %v2520_v0, %v2472_v44 }
 0x20c   : > { %v2569_v39 = vpop.f32.mrf.mxu2  ;;  %v2474_v36 = vpop.f32.mrf.mxu0 }
 0x20d   : > { %v2618_v20 = vpop.f32.mrf.mxu3  ;;  %v2570_v23 = vadd.f32 %v2569_v39, %v2521_v1  ;;  %v2523_v38 = vpop.f32.mrf.mxu1  ;;  %v2475_v52 = vadd.f32 %v2474_v36, %v4796_v15 }
 0x20f   : > { %v4905_v25 = vadd.f32 %v2618_v20, %v2570_v23  ;;  %v2524_v27 = vadd.f32 %v2523_v38, %v2475_v52  ;;  %2669 = vmatmul.bf16.gmra.mxu0 %v3433_v17 }
 0x210   : > { %2718 = vmatmul.bf16.gmra.mxu1 %v3437_v18 }
 0x211   : > { %2767 = vmatmul.bf16.gmra.mxu2 %v3441_v21 }
 0x212   : > { %2816 = vmatmul.bf16.gmra.mxu3 %v3445_v26 }
 0x214   : > { %v2572_v29 = vpop.f32.mrf.mxu2  ;;  %v2476_v31 = vpop.f32.mrf.mxu0 }
 0x215   : > { %v2621_v5 = vpop.f32.mrf.mxu3  ;;  %v2573_v30 = vadd.f32 %v2572_v29, %v2524_v27  ;;  %v2525_v32 = vpop.f32.mrf.mxu1  ;;  %v2477_v15 = vadd.f32 %v2476_v31, %v4807_v41  ;;  %v3509_v41 = vor.u32 %v4146_v4, %v3506_v46 }
 0x217   : > { %v4908_v35 = vadd.f32 %v2621_v5, %v2573_v30  ;;  %v2526_v47 = vadd.f32 %v2525_v32, %v2477_v15 }
 0x21c   : > { %v2574_v40 = vpop.f32.mrf.mxu2  ;;  %v2479_v13 = vpop.f32.mrf.mxu0 }
 0x21d   : > { %v2623_v60 = vpop.f32.mrf.mxu3  ;;  %v2575_v56 = vadd.f32 %v2574_v40, %v2526_v47  ;;  %v2528_v57 = vpop.f32.mrf.mxu1  ;;  %v2480_v28 = vadd.f32 %v2479_v13, %v4810_v49 }
 0x21f   : > { %v4919_v10 = vadd.f32 %v2623_v60, %v2575_v56  ;;  %v2529_v62 = vadd.f32 %v2528_v57, %v2480_v28  ;;  %2674 = vmatmul.bf16.gmra.mxu0 %v3497_v51 }
 0x220   : > { %2723 = vmatmul.bf16.gmra.mxu1 %v3501_v53 }
 0x221   : > { %2772 = vmatmul.bf16.gmra.mxu2 %v3505_v58 }
 0x222   : > { %2821 = vmatmul.bf16.gmra.mxu3 %v3509_v41 }
 0x224   : > { %v2577_v0 = vpop.f32.mrf.mxu2  ;;  %v2481_v3 = vpop.f32.mrf.mxu0 }
 0x225   : > { %v2626_v44 = vpop.f32.mrf.mxu3  ;;  %v2578_v1 = vadd.f32 %v2577_v0, %v2529_v62  ;;  %v2530_v6 = vpop.f32.mrf.mxu1  ;;  %v2482_v34 = vadd.f32 %v2481_v3, %v4821_v11 }
 0x227   : > { %v4922_v7 = vadd.f32 %v2626_v44, %v2578_v1  ;;  %v2531_v22 = vadd.f32 %v2530_v6, %v2482_v34 }
 0x22c   : > { %v2579_v9 = vpop.f32.mrf.mxu2  ;;  %v2640_v14 = vpop.f32.mrf.mxu0 }
 0x22d   : > { %v2628_v49 = vpop.f32.mrf.mxu3  ;;  %v2580_v12 = vadd.f32 %v2579_v9, %v2531_v22  ;;  %v2689_v39 = vpop.f32.mrf.mxu1  ;;  %v2641_v17 = vadd.f32 %v2640_v14, %v4824_v19 }
 0x22f   : > { %v4924_v20 = vadd.f32 %v2628_v49, %v2580_v12  ;;  %v2690_v18 = vadd.f32 %v2689_v39, %v2641_v17 }
 0x234   : > { %v2738_v23 = vpop.f32.mrf.mxu2  ;;  %v2642_v21 = vpop.f32.mrf.mxu0 }
 0x235   : > { %v2787_v36 = vpop.f32.mrf.mxu3  ;;  %v2739_v38 = vadd.f32 %v2738_v23, %v2690_v18  ;;  %v2691_v26 = vpop.f32.mrf.mxu1  ;;  %v2643_v52 = vadd.f32 %v2642_v21, %v4835_v61 }
 0x237   : > { %v2788_v11 = vadd.f32 %v2787_v36, %v2739_v38  ;;  %v2692_v29 = vadd.f32 %v2691_v26, %v2643_v52 }
 0x239   : > { %v2827_v27 = vmax.f32 %v2788_v11, 0.0 }
 0x23b   : > { %v2843_v19 = vpack.c.bf16 %v2827_v27, %v2827_v27 }
 0x23c   : > { %v2740_v5 = vpop.f32.mrf.mxu2  ;;  %v2645_v32 = vpop.f32.mrf.mxu0 }
 0x23d   : > { %v2789_v30 = vpop.f32.mrf.mxu3  ;;  %2860 = vst.msk [vmem:[%s4932_s4] sm:$0xf] %vm2859_vm0, %v2843_v19  ;;  %v2741_v31 = vadd.f32 %v2740_v5, %v2692_v29  ;;  %v2694_v15 = vpop.f32.mrf.mxu1  ;;  %v2646_v61 = vadd.f32 %v2645_v32, %v4838_v54 }
 0x23f   : > { %v2790_v47 = vadd.f32 %v2789_v30, %v2741_v31  ;;  %v2695_v42 = vadd.f32 %v2694_v15, %v2646_v61 }
 0x241   : > { %v2828_v48 = vmax.f32 %v2790_v47, 0.0 }
 0x243   : > { %v2844_v37 = vpack.c.bf16 %v2828_v48, %v2828_v48 }
 0x244   : > { %v2743_v43 = vpop.f32.mrf.mxu2  ;;  %v2647_v4 = vpop.f32.mrf.mxu0 }
 0x245   : > { %v2792_v63 = vpop.f32.mrf.mxu3  ;;  %2861 = vst.msk [vmem:[%s4932_s4 + $0x4] sm:$0xf] %vm2859_vm0, %v2844_v37  ;;  %v2744_v45 = vadd.f32 %v2743_v43, %v2695_v42  ;;  %v2696_v46 = vpop.f32.mrf.mxu1  ;;  %v2648_v60 = vadd.f32 %v2647_v4, %v4849_v16 }
 0x247   : > { %v2793_v40 = vadd.f32 %v2792_v63, %v2744_v45  ;;  %v2697_v56 = vadd.f32 %v2696_v46, %v2648_v60 }
 0x249   : > { %v2829_v51 = vmax.f32 %v2793_v40, 0.0 }
 0x24b   : > { %v2845_v53 = vpack.c.bf16 %v2829_v51, %v2829_v51 }
 0x24c   : > { %v2745_v13 = vpop.f32.mrf.mxu2  ;;  %v2650_v58 = vpop.f32.mrf.mxu0 }
 0x24d   : > { %v2794_v54 = vpop.f32.mrf.mxu3  ;;  %2862 = vst.msk [vmem:[%s4932_s4 + $0x8] sm:$0xf] %vm2859_vm0, %v2845_v53  ;;  %v2746_v57 = vadd.f32 %v2745_v13, %v2697_v56  ;;  %v2699_v41 = vpop.f32.mrf.mxu1  ;;  %v2651_v62 = vadd.f32 %v2650_v58, %v4852_v24 }
 0x24f   : > { %v2795_v28 = vadd.f32 %v2794_v54, %v2746_v57  ;;  %v2700_v1 = vadd.f32 %v2699_v41, %v2651_v62 }
 0x251   : > { %v2830_v0 = vmax.f32 %v2795_v28, 0.0 }
 0x253   : > { %v2846_v44 = vpack.c.bf16 %v2830_v0, %v2830_v0 }
 0x254   : > { %v2748_v3 = vpop.f32.mrf.mxu2  ;;  %v2652_v34 = vpop.f32.mrf.mxu0 }
 0x255   : > { %v2797_v16 = vpop.f32.mrf.mxu3  ;;  %2863 = vst.msk [vmem:[%s4932_s4 + $0xc] sm:$0xf] %vm2859_vm0, %v2846_v44  ;;  %v2749_v6 = vadd.f32 %v2748_v3, %v2700_v1  ;;  %v2701_v22 = vpop.f32.mrf.mxu1  ;;  %v2653_v49 = vadd.f32 %v2652_v34, %v4863_v50 }
 0x257   : > { %v2798_v9 = vadd.f32 %v2797_v16, %v2749_v6  ;;  %v2702_v39 = vadd.f32 %v2701_v22, %v2653_v49 }
 0x259   : > { %v2831_v12 = vmax.f32 %v2798_v9, 0.0 }
 0x25b   : > { %v2847_v14 = vpack.c.bf16 %v2831_v12, %v2831_v12 }
 0x25c   : > { %v2750_v17 = vpop.f32.mrf.mxu2  ;;  %v2655_v23 = vpop.f32.mrf.mxu0 }
 0x25d   : > { %v2799_v24 = vpop.f32.mrf.mxu3  ;;  %2864 = vst.msk [vmem:[%s4932_s4 + $0x10] sm:$0xf] %vm2859_vm0, %v2847_v14  ;;  %v2751_v18 = vadd.f32 %v2750_v17, %v2702_v39  ;;  %v2704_v36 = vpop.f32.mrf.mxu1  ;;  %v2656_v21 = vadd.f32 %v2655_v23, %v4866_v59 }
 0x25f   : > { %v2800_v38 = vadd.f32 %v2799_v24, %v2751_v18  ;;  %v2705_v52 = vadd.f32 %v2704_v36, %v2656_v21 }
 0x261   : > { %v2832_v26 = vmax.f32 %v2800_v38, 0.0 }
 0x263   : > { %v2848_v11 = vpack.c.bf16 %v2832_v26, %v2832_v26 }
 0x264   : > { %v2753_v27 = vpop.f32.mrf.mxu2  ;;  %v2657_v29 = vpop.f32.mrf.mxu0 }
 0x265   : > { %v2802_v50 = vpop.f32.mrf.mxu3  ;;  %2865 = vst.msk [vmem:[%s4932_s4 + $0x14] sm:$0xf] %vm2859_vm0, %v2848_v11  ;;  %v2754_v19 = vadd.f32 %v2753_v27, %v2705_v52  ;;  %v2706_v5 = vpop.f32.mrf.mxu1  ;;  %v2658_v31 = vadd.f32 %v2657_v29, %v4877_v33 }
 0x267   : > { %v2803_v30 = vadd.f32 %v2802_v50, %v2754_v19  ;;  %v2707_v47 = vadd.f32 %v2706_v5, %v2658_v31 }
 0x269   : > { %v2833_v32 = vmax.f32 %v2803_v30, 0.0 }
 0x26b   : > { %v2849_v15 = vpack.c.bf16 %v2833_v32, %v2833_v32 }
 0x26c   : > { %v2755_v61 = vpop.f32.mrf.mxu2  ;;  %v2660_v37 = vpop.f32.mrf.mxu0 }
 0x26d   : > { %v2804_v59 = vpop.f32.mrf.mxu3  ;;  %2866 = vst.msk [vmem:[%s4932_s4 + $0x18] sm:$0xf] %vm2859_vm0, %v2849_v15  ;;  %v2756_v48 = vadd.f32 %v2755_v61, %v2707_v47  ;;  %v2709_v42 = vpop.f32.mrf.mxu1  ;;  %v2661_v63 = vadd.f32 %v2660_v37, %v4880_v2 }
 0x26f   : > { %v2805_v43 = vadd.f32 %v2804_v59, %v2756_v48  ;;  %v2710_v46 = vadd.f32 %v2709_v42, %v2661_v63 }
 0x271   : > { %v2834_v45 = vmax.f32 %v2805_v43, 0.0 }
 0x273   : > { %v2850_v4 = vpack.c.bf16 %v2834_v45, %v2834_v45 }
 0x274   : > { %v2758_v40 = vpop.f32.mrf.mxu2  ;;  %v2662_v51 = vpop.f32.mrf.mxu0 }
 0x275   : > { %v2807_v33 = vpop.f32.mrf.mxu3  ;;  %2867 = vst.msk [vmem:[%s4932_s4 + $0x1c] sm:$0xf] %vm2859_vm0, %v2850_v4  ;;  %v2759_v60 = vadd.f32 %v2758_v40, %v2710_v46  ;;  %v2711_v53 = vpop.f32.mrf.mxu1  ;;  %v2663_v13 = vadd.f32 %v2662_v51, %v4891_v55 }
 0x277   : > { %v2808_v56 = vadd.f32 %v2807_v33, %v2759_v60  ;;  %v2712_v58 = vadd.f32 %v2711_v53, %v2663_v13 }
 0x279   : > { %v2835_v54 = vmax.f32 %v2808_v56, 0.0 }
 0x27b   : > { %v2851_v57 = vpack.c.bf16 %v2835_v54, %v2835_v54 }
 0x27c   : > { %v2760_v41 = vpop.f32.mrf.mxu2  ;;  %v2665_v62 = vpop.f32.mrf.mxu0 }
 0x27d   : > { %v2809_v2 = vpop.f32.mrf.mxu3  ;;  %2868 = vst.msk [vmem:[%s4932_s4 + $0x20] sm:$0xf] %vm2859_vm0, %v2851_v57  ;;  %v2761_v28 = vadd.f32 %v2760_v41, %v2712_v58  ;;  %v2714_v0 = vpop.f32.mrf.mxu1  ;;  %v2666_v1 = vadd.f32 %v2665_v62, %v4894_v8 }
 0x27f   : > { %v2810_v44 = vadd.f32 %v2809_v2, %v2761_v28  ;;  %v2715_v6 = vadd.f32 %v2714_v0, %v2666_v1 }
 0x281   : > { %v2836_v3 = vmax.f32 %v2810_v44, 0.0 }
 0x283   : > { %v2852_v16 = vpack.c.bf16 %v2836_v3, %v2836_v3 }
 0x284   : > { %v2763_v34 = vpop.f32.mrf.mxu2  ;;  %v2667_v9 = vpop.f32.mrf.mxu0 }
 0x285   : > { %v2812_v55 = vpop.f32.mrf.mxu3  ;;  %2869 = vst.msk [vmem:[%s4932_s4 + $0x24] sm:$0xf] %vm2859_vm0, %v2852_v16  ;;  %v2764_v22 = vadd.f32 %v2763_v34, %v2715_v6  ;;  %v2716_v49 = vpop.f32.mrf.mxu1  ;;  %v2668_v14 = vadd.f32 %v2667_v9, %v4905_v25 }
 0x287   : > { %v2813_v12 = vadd.f32 %v2812_v55, %v2764_v22  ;;  %v2717_v24 = vadd.f32 %v2716_v49, %v2668_v14 }
 0x289   : > { %v2837_v39 = vmax.f32 %v2813_v12, 0.0 }
 0x28b   : > { %v2853_v17 = vpack.c.bf16 %v2837_v39, %v2837_v39 }
 0x28c   : > { %v2765_v18 = vpop.f32.mrf.mxu2  ;;  %v2670_v36 = vpop.f32.mrf.mxu0 }
 0x28d   : > { %v2814_v8 = vpop.f32.mrf.mxu3  ;;  %2870 = vst.msk [vmem:[%s4932_s4 + $0x28] sm:$0xf] %vm2859_vm0, %v2853_v17  ;;  %v2766_v23 = vadd.f32 %v2765_v18, %v2717_v24  ;;  %v2719_v38 = vpop.f32.mrf.mxu1  ;;  %v2671_v26 = vadd.f32 %v2670_v36, %v4908_v35 }
 0x28f   : > { %v2815_v21 = vadd.f32 %v2814_v8, %v2766_v23  ;;  %v2720_v27 = vadd.f32 %v2719_v38, %v2671_v26 }
 0x291   : > { %v2838_v11 = vmax.f32 %v2815_v21, 0.0 }
 0x293   : > { %v2854_v52 = vpack.c.bf16 %v2838_v11, %v2838_v11 }
 0x294   : > { %v2768_v50 = vpop.f32.mrf.mxu2  ;;  %v2672_v29 = vpop.f32.mrf.mxu0 }
 0x295   : > { %v2817_v25 = vpop.f32.mrf.mxu3  ;;  %2871 = vst.msk [vmem:[%s4932_s4 + $0x2c] sm:$0xf] %vm2859_vm0, %v2854_v52  ;;  %v2769_v19 = vadd.f32 %v2768_v50, %v2720_v27  ;;  %v2721_v5 = vpop.f32.mrf.mxu1  ;;  %v2673_v31 = vadd.f32 %v2672_v29, %v4919_v10 }
 0x297   : > { %v2818_v30 = vadd.f32 %v2817_v25, %v2769_v19  ;;  %v2722_v47 = vadd.f32 %v2721_v5, %v2673_v31 }
 0x299   : > { %v2839_v32 = vmax.f32 %v2818_v30, 0.0 }
 0x29b   : > { %v2855_v15 = vpack.c.bf16 %v2839_v32, %v2839_v32 }
 0x29c   : > { %v2770_v61 = vpop.f32.mrf.mxu2  ;;  %v2675_v48 = vpop.f32.mrf.mxu0 }
 0x29d   : > { %v2819_v35 = vpop.f32.mrf.mxu3  ;;  %2872 = vst.msk [vmem:[%s4932_s4 + $0x30] sm:$0xf] %vm2859_vm0, %v2855_v15  ;;  %v2771_v59 = vadd.f32 %v2770_v61, %v2722_v47  ;;  %v2676_v42 = vadd.f32 %v2675_v48, %v4922_v7  ;;  %v2724_v43 = vpop.f32.mrf.mxu1 }
 0x29f   : > { %v2820_v37 = vadd.f32 %v2819_v35, %v2771_v59  ;;  %v2725_v4 = vadd.f32 %v2724_v43, %v2676_v42 }
 0x2a1   : > { %v2840_v63 = vmax.f32 %v2820_v37, 0.0 }
 0x2a3   : > { %v2856_v45 = vpack.c.bf16 %v2840_v63, %v2840_v63 }
 0x2a4   : > { %v2773_v46 = vpop.f32.mrf.mxu2  ;;  %v2677_v33 = vpop.f32.mrf.mxu0 }
 0x2a5   : > { %v2822_v10 = vpop.f32.mrf.mxu3  ;;  %2873 = vst.msk [vmem:[%s4932_s4 + $0x34] sm:$0xf] %vm2859_vm0, %v2856_v45  ;;  %v2774_v40 = vadd.f32 %v2773_v46, %v2725_v4  ;;  %v2678_v51 = vadd.f32 %v2677_v33, %v4924_v20  ;;  %v2726_v56 = vpop.f32.mrf.mxu1 }
 0x2a7   : > { %v2823_v60 = vadd.f32 %v2822_v10, %v2774_v40  ;;  %v2727_v54 = vadd.f32 %v2726_v56, %v2678_v51 }
 0x2a9   : > { %v2841_v53 = vmax.f32 %v2823_v60, 0.0 }
 0x2ab   : > { %v2857_v13 = vpack.c.bf16 %v2841_v53, %v2841_v53 }
 0x2ac   : > { %v2775_v7 = vpop.f32.mrf.mxu2 }
 0x2ad   : > { %2874 = vst.msk [vmem:[%s4932_s4 + $0x38] sm:$0xf] %vm2859_vm0, %v2857_v13  ;;  %v2776_v57 = vadd.f32 %v2775_v7, %v2727_v54  ;;  %v2824_v58 = vpop.f32.mrf.mxu3 }
 0x2af   : > { %v2825_v41 = vadd.f32 %v2824_v58, %v2776_v57 }
 0x2b1   : > { %v2842_v2 = vmax.f32 %v2825_v41, 0.0 }
 0x2b3   : > { %v2858_v28 = vpack.c.bf16 %v2842_v2, %v2842_v2 }
 0x2b5   : > { %2875 = vst.msk [vmem:[%s4932_s4 + $0x3c] sm:$0xf] %vm2859_vm0, %v2858_v28 }
 0x2b6 PF: > { %s13_s14 = sadd.s32 1, %s4330_s14   ;;  %s4993_s12 = smov %s4326_s13 }
 0x2b7   : > { %p10_p5 = scmp.ge.s32.totalorder %s13_s14, 4   ;;  %s4994_s13 = smov %s4996_s15 }
 0x2b9   :  { %12 = sbr.rel (!%p10_p5) target bundleno = 2 (0x2), region = 68 }

// kernel: twinned_q_forward.7
= control target key start
LH: loop header
LB: loop body
LE: loop exit
PB: predicated region body
PF: predicated region fallthrough
CT: control target
= control target key end

     0   :  { %s1003_s12 = smov 0   ;;  %s1005_s13 = smov 0   ;;  %s1102_s0 = inlined_call_operand.vmem [shape: bf16[2,24,512], index: 0, kind: input, shape index: {}]   ;;  %s1103_s1 = inlined_call_operand.vmem [shape: bf16[2,512,64], index: 1, kind: input, shape index: {}]   ;;  %s1104_s2 = inlined_call_operand.vmem [shape: f32[2,1,64], index: 2, kind: input, shape index: {}]   ;;  %s1105_s3 = inlined_call_operand.vmem [shape: bf16[2,24,64], index: 3, kind: output, shape index: {}]  }
   0x1   :  { %s1007_s14 = smov 0  }
   0x2 LB: > { %s25_s15 = sadd.s32 1, %s977_s13  ;;  %p744_p0 = scmp.ge.s32.totalorder %s981_s14, 1  ;;  %s981_s14 = sphi %s1007_s14, %s13_s14   ;;  %s977_s13 = sphi %s1005_s13, %s1107_s13   ;;  %s973_s12 = sphi %s1003_s12, %s1106_s12  }
   0x3   : > { %p27_p1 = scmp.ge.s32.totalorder %s25_s15, 2  ;;  %p177_p2 = scmp.lt.s32.totalorder %s981_s14, 3 }
   0x5   : > { %s1109_s15 = smov (%p27_p1, %s25_s15), 0  ;;  %p178_p3 = pnand %p744_p0, %p177_p2 }
   0x6   : > { %p219_p4 = scmp.lt.s32.totalorder (!%p178_p3), %s973_s12, 1 }
   0x7   : > { %181 = sbr.rel (%p178_p3) target bundleno = 206 (0xce), region = 32 }
   0xc   : > { %s1111_s12 = smov (!%p219_p4, %s973_s12), 1  ;;  %vm625_vm0 = vcmask 519168  }
   0xd   : > { %s895_s16 = sshll.u32 %s1111_s12, 8  ;;  %s236_s22 = scalar_lea.vmem %s1104_s2, %s1111_s12 }
   0xe   : > { %s1027_s19 = scalar_lea.vmem %s1103_s1, %s895_s16  ;;  %s932_s23 = smul.u32 48, %s1111_s12  ;;  %v958_v54 = vld [vmem:[%s236_s22] ss:$0 sm:$0xff] }
   0xf   : > { %v907_v0 = vld [vmem:[%s1027_s19 + $0x38] sm:$0xff]  ;;  %v906_v4 = vld [vmem:[%s1027_s19 + $0x30] sm:$0xff]  ;;  %v905_v8 = vld [vmem:[%s1027_s19 + $0x28] sm:$0xff]  ;;  %s933_s29 = smul.u32 12, %s1111_s12 }
  0x10   : > { %v915_v1 = vld [vmem:[%s1027_s19 + $0x78] sm:$0xff]  ;;  %547 = vmatpush.bf16.msra.mxu0 %v907_v0  ;;  %v914_v5 = vld [vmem:[%s1027_s19 + $0x70] sm:$0xff]  ;;  %v913_v9 = vld [vmem:[%s1027_s19 + $0x68] sm:$0xff]  ;;  %s1063_s26 = scalar_lea.vmem %s1102_s0, %s932_s23 }
  0x11   : > { %v923_v2 = vld [vmem:[%s1027_s19 + $0xb8] sm:$0xff]  ;;  %565 = vmatpush.bf16.msra.mxu1 %v915_v1  ;;  %v922_v6 = vld [vmem:[%s1027_s19 + $0xb0] sm:$0xff]  ;;  %v921_v10 = vld [vmem:[%s1027_s19 + $0xa8] sm:$0xff]  ;;  %s245_s5 = scalar_lea.vmem %s1105_s3, %s933_s29 }
  0x12   : > { %v931_v3 = vld [vmem:[%s1027_s19 + $0xf8] sm:$0xff]  ;;  %583 = vmatpush.bf16.msra.mxu2 %v923_v2  ;;  %v930_v7 = vld [vmem:[%s1027_s19 + $0xf0] sm:$0xff]  ;;  %v929_v11 = vld [vmem:[%s1027_s19 + $0xe8] sm:$0xff] }
  0x13   : > { %601 = vmatpush.bf16.msra.mxu3 %v931_v3  ;;  %v904_v12 = vld [vmem:[%s1027_s19 + $0x20] sm:$0xff]  ;;  %v903_v16 = vld [vmem:[%s1027_s19 + $0x18] sm:$0xff]  ;;  %v902_v20 = vld [vmem:[%s1027_s19 + $0x10] sm:$0xff] }
  0x14   : > { %548 = vmatpush.bf16.msra.mxu0 %v906_v4  ;;  %v912_v13 = vld [vmem:[%s1027_s19 + $0x60] sm:$0xff]  ;;  %v911_v17 = vld [vmem:[%s1027_s19 + $0x58] sm:$0xff]  ;;  %v910_v21 = vld [vmem:[%s1027_s19 + $0x50] sm:$0xff] }
  0x15   : > { %566 = vmatpush.bf16.msra.mxu1 %v914_v5  ;;  %v920_v14 = vld [vmem:[%s1027_s19 + $0xa0] sm:$0xff]  ;;  %v919_v18 = vld [vmem:[%s1027_s19 + $0x98] sm:$0xff]  ;;  %v918_v22 = vld [vmem:[%s1027_s19 + $0x90] sm:$0xff] }
  0x16   : > { %584 = vmatpush.bf16.msra.mxu2 %v922_v6  ;;  %v928_v15 = vld [vmem:[%s1027_s19 + $0xe0] sm:$0xff]  ;;  %v927_v19 = vld [vmem:[%s1027_s19 + $0xd8] sm:$0xff]  ;;  %v926_v23 = vld [vmem:[%s1027_s19 + $0xd0] sm:$0xff] }
  0x17   : > { %602 = vmatpush.bf16.msra.mxu3 %v930_v7  ;;  %v901_v24 = vld [vmem:[%s1027_s19 + $0x8] sm:$0xff]  ;;  %v900_v28 = vld [vmem:[%s1027_s19] sm:$0xff]  ;;  %v898_v33 = vld [vmem:[%s1063_s26 + $0xc] sm:$0xf0] }
  0x18   : > { %549 = vmatpush.bf16.msra.mxu0 %v905_v8  ;;  %v909_v25 = vld [vmem:[%s1027_s19 + $0x48] sm:$0xff]  ;;  %v908_v29 = vld [vmem:[%s1027_s19 + $0x40] sm:$0xff]  ;;  %v753_v35 = vld [vmem:[%s1063_s26 + $0x10] sm:$0xf0] }
  0x19   : > { %567 = vmatpush.bf16.msra.mxu1 %v913_v9  ;;  %v917_v26 = vld [vmem:[%s1027_s19 + $0x88] sm:$0xff]  ;;  %v916_v30 = vld [vmem:[%s1027_s19 + $0x80] sm:$0xff]  ;;  %v899_v37 = vld [vmem:[%s1063_s26 + $0x14] sm:$0xf0] }
  0x1a   : > { %585 = vmatpush.bf16.msra.mxu2 %v921_v10  ;;  %v925_v27 = vld [vmem:[%s1027_s19 + $0xc8] sm:$0xff]  ;;  %v924_v31 = vld [vmem:[%s1027_s19 + $0xc0] sm:$0xff]  ;;  %v761_v39 = vld [vmem:[%s1063_s26 + $0x18] sm:$0xf0] }
  0x1b   : > { %603 = vmatpush.bf16.msra.mxu3 %v929_v11  ;;  %v751_v32 = vld [vmem:[%s1063_s26] sm:$0xf]  ;;  %v896_v34 = vld [vmem:[%s1063_s26 + $0x4] sm:$0xf]  ;;  %v759_v36 = vld [vmem:[%s1063_s26 + $0x8] sm:$0xf] }
  0x1c   : > { %550 = vmatpush.bf16.msra.mxu0 %v904_v12  ;;  %v897_v38 = vld [vmem:[%s1063_s26 + $0xc] sm:$0xf]  ;;  %v752_v40 = vor.u32 %v898_v33, %v751_v32  ;;  %v756_v41 = vor.u32 %v896_v34, %v753_v35  ;;  %v760_v42 = vor.u32 %v899_v37, %v759_v36  ;;  %v251_v44 = vld [vmem:[%s1063_s26 + $0x20] sm:$0xff] }
  0x1d   : > { %568 = vmatpush.bf16.msra.mxu1 %v912_v13  ;;  %v764_v43 = vor.u32 %v897_v38, %v761_v39  ;;  %v252_v45 = vld [vmem:[%s1063_s26 + $0x28] sm:$0xff]  ;;  %v335_v46 = vunpack.c.l.b16 %v251_v44  ;;  %v336_v47 = vunpack.c.h.b16 %v251_v44 }
  0x1e   : > { %586 = vmatpush.bf16.msra.mxu2 %v920_v14  ;;  %v337_v48 = vunpack.c.l.b16 %v252_v45  ;;  %v338_v49 = vunpack.c.h.b16 %v252_v45 }
  0x1f   : > { %604 = vmatpush.bf16.msra.mxu3 %v928_v15  ;;  %v343_v50 = vpack.c.b16 %v335_v46, %v335_v46  ;;  %v344_v51 = vpack.c.b16 %v336_v47, %v336_v47 }
  0x20   : > { %551 = vmatpush.bf16.msra.mxu0 %v903_v16  ;;  %v345_v52 = vpack.c.b16 %v337_v48, %v337_v48  ;;  %v346_v53 = vpack.c.b16 %v338_v49, %v338_v49 }
  0x21   : > { %569 = vmatpush.bf16.msra.mxu1 %v911_v17 }
  0x22   : > { %587 = vmatpush.bf16.msra.mxu2 %v919_v18 }
  0x23   : > { %605 = vmatpush.bf16.msra.mxu3 %v927_v19 }
  0x24   : > { %552 = vmatpush.bf16.msra.mxu0 %v902_v20 }
  0x25   : > { %570 = vmatpush.bf16.msra.mxu1 %v910_v21 }
  0x26   : > { %588 = vmatpush.bf16.msra.mxu2 %v918_v22 }
  0x27   : > { %606 = vmatpush.bf16.msra.mxu3 %v926_v23 }
  0x28   : > { %553 = vmatpush.bf16.msra.mxu0 %v901_v24 }
  0x29   : > { %571 = vmatpush.bf16.msra.mxu1 %v909_v25 }
  0x2a   : > { %589 = vmatpush.bf16.msra.mxu2 %v917_v26 }
  0x2b   : > { %607 = vmatpush.bf16.msra.mxu3 %v925_v27 }
  0x2c   : > { %554 = vmatpush.bf16.msra.mxu0 %v900_v28 }
  0x2d   : > { %572 = vmatpush.bf16.msra.mxu1 %v908_v29 }
  0x2e   : > { %590 = vmatpush.bf16.msra.mxu2 %v916_v30 }
  0x2f   : > { %608 = vmatpush.bf16.msra.mxu3 %v924_v31  ;;  %555 = vmatmul.bf16.vlgmr.msra.gmra.mxu0 %v752_v40 }
  0x30   : > { %573 = vmatmul.bf16.vlgmr.msra.gmra.mxu1 %v756_v41 }
  0x31   : > { %591 = vmatmul.bf16.vlgmr.msra.gmra.mxu2 %v760_v42 }
  0x32   : > { %609 = vmatmul.bf16.vlgmr.msra.gmra.mxu3 %v764_v43 }
  0x3f   : > { %560 = vmatmul.bf16.gmra.mxu0 %v343_v50 }
  0x40   : > { %578 = vmatmul.bf16.gmra.mxu1 %v344_v51 }
  0x41   : > { %596 = vmatmul.bf16.gmra.mxu2 %v345_v52 }
  0x42   : > { %614 = vmatmul.bf16.gmra.mxu3 %v346_v53 }
  0xac   : > { %v556_v55 = vpop.f32.mrf.mxu0 }
  0xad   : > { %v574_v56 = vpop.f32.mrf.mxu1  ;;  %v557_v57 = vadd.f32 %v958_v54, %v556_v55 }
  0xaf   : > { %v575_v58 = vadd.f32 %v574_v56, %v557_v57 }
  0xb4   : > { %v592_v59 = vpop.f32.mrf.mxu2  ;;  %v558_v62 = vpop.f32.mrf.mxu0 }
  0xb5   : > { %v610_v60 = vpop.f32.mrf.mxu3  ;;  %v593_v61 = vadd.f32 %v592_v59, %v575_v58  ;;  %v576_v63 = vpop.f32.mrf.mxu1  ;;  %v559_v1 = vadd.f32 %v958_v54, %v558_v62 }
  0xb7   : > { %v611_v0 = vadd.f32 %v610_v60, %v593_v61  ;;  %v577_v4 = vadd.f32 %v576_v63, %v559_v1 }
  0xb9   : > { %v619_v2 = vmax.f32 %v611_v0, 0.0 }
  0xbb   : > { %v622_v3 = vpack.c.bf16 %v619_v2, %v619_v2 }
  0xbc   : > { %v594_v5 = vpop.f32.mrf.mxu2  ;;  %v561_v8 = vpop.f32.mrf.mxu0 }
  0xbd   : > { %v612_v6 = vpop.f32.mrf.mxu3  ;;  %626 = vst.msk [vmem:[%s245_s5] sm:$0xf] %vm625_vm0, %v622_v3  ;;  %v595_v7 = vadd.f32 %v594_v5, %v577_v4  ;;  %v579_v9 = vpop.f32.mrf.mxu1  ;;  %v562_v10 = vadd.f32 %v958_v54, %v561_v8 }
  0xbf   : > { %v613_v11 = vadd.f32 %v612_v6, %v595_v7  ;;  %v580_v13 = vadd.f32 %v579_v9, %v562_v10 }
  0xc1   : > { %v620_v12 = vmax.f32 %v613_v11, 0.0 }
  0xc3   : > { %v623_v14 = vpack.c.bf16 %v620_v12, %v620_v12 }
  0xc4   : > { %v597_v15 = vpop.f32.mrf.mxu2  ;;  %v563_v18 = vpop.f32.mrf.mxu0 }
  0xc5   : > { %v615_v16 = vpop.f32.mrf.mxu3  ;;  %627 = vst.msk [vmem:[%s245_s5 + $0x4] sm:$0xf] %vm625_vm0, %v623_v14  ;;  %v598_v17 = vadd.f32 %v597_v15, %v580_v13  ;;  %v581_v19 = vpop.f32.mrf.mxu1 }
  0xc7   : > { %v616_v20 = vadd.f32 %v615_v16, %v598_v17 }
  0xc9   : > { %v621_v21 = vmax.f32 %v616_v20, 0.0 }
  0xcb   : > { %v624_v22 = vpack.c.bf16 %v621_v21, %v621_v21 }
  0xcc   : > { %v599_v23 = vpop.f32.mrf.mxu2 }
  0xcd   : > { %v617_v24 = vpop.f32.mrf.mxu3  ;;  %628 = vst.msk [vmem:[%s245_s5 + $0x8] sm:$0xf] %vm625_vm0, %v624_v22 }
  0xce PF: > { %s13_s14 = sadd.s32 1, %s981_s14   ;;  %s1106_s12 = smov %s977_s13 }
  0xcf   : > { %p10_p5 = scmp.ge.s32.totalorder %s13_s14, 4   ;;  %s1107_s13 = smov %s1109_s15 }
  0xd1   :  { %12 = sbr.rel (!%p10_p5) target bundleno = 2 (0x2), region = 68 }

// kernel: twinned_q_forward.8
= control target key start
LH: loop header
LB: loop body
LE: loop exit
PB: predicated region body
PF: predicated region fallthrough
CT: control target
= control target key end

     0   :  { %s986_s12 = smov 0   ;;  %s988_s13 = smov 0   ;;  %s1079_s0 = inlined_call_operand.vmem [shape: bf16[2,8,576], index: 0, kind: input, shape index: {}]   ;;  %s1080_s1 = inlined_call_operand.vmem [shape: bf16[2,576,64], index: 1, kind: input, shape index: {}]   ;;  %s1081_s2 = inlined_call_operand.vmem [shape: f32[2,1,64], index: 2, kind: input, shape index: {}]   ;;  %s1082_s3 = inlined_call_operand.vmem [shape: bf16[2,8,64], index: 3, kind: output, shape index: {}]  }
   0x1   :  { %s990_s14 = smov 0  }
   0x2 LB: > { %s25_s15 = sadd.s32 1, %s960_s13  ;;  %p728_p0 = scmp.ge.s32.totalorder %s964_s14, 1  ;;  %s964_s14 = sphi %s990_s14, %s13_s14   ;;  %s960_s13 = sphi %s988_s13, %s1084_s13   ;;  %s956_s12 = sphi %s986_s12, %s1083_s12  }
   0x3   : > { %p27_p1 = scmp.ge.s32.totalorder %s25_s15, 2  ;;  %p175_p2 = scmp.lt.s32.totalorder %s964_s14, 3 }
   0x5   : > { %s1086_s15 = smov (%p27_p1, %s25_s15), 0  ;;  %p176_p3 = pnand %p728_p0, %p175_p2 }
   0x6   : > { %p213_p4 = scmp.lt.s32.totalorder (!%p176_p3), %s956_s12, 1 }
   0x7   : > { %179 = sbr.rel (%p176_p3) target bundleno = 198 (0xc6), region = 32 }
   0xc   : > { %s1088_s12 = smov (!%p213_p4, %s956_s12), 1  ;;  %vm550_vm0 = vcmask 523264   ;;  %vm621_vm1 = vcmask 519168  }
   0xd   : > { %s916_s16 = smul.u32 288, %s1088_s12  ;;  %s229_s19 = scalar_lea.vmem %s1081_s2, %s1088_s12 }
   0xe   : > { %s915_s23 = smul.u32 20, %s1088_s12  ;;  %v941_v50 = vld [vmem:[%s229_s19] ss:$0 sm:$0xff]  ;;  %s731_s29 = sshll.u32 %s1088_s12, 2 }
   0xf   : > { %s1014_s22 = scalar_lea.vmem %s1080_s1, %s916_s16  ;;  %s236_s5 = scalar_lea.vmem %s1082_s3, %s731_s29 }
  0x10   : > { %v886_v0 = vld [vmem:[%s1014_s22 + $0x38] sm:$0xff]  ;;  %v885_v4 = vld [vmem:[%s1014_s22 + $0x30] sm:$0xff]  ;;  %v884_v8 = vld [vmem:[%s1014_s22 + $0x28] sm:$0xff]  ;;  %s1044_s26 = scalar_lea.vmem %s1079_s0, %s915_s23 }
  0x11   : > { %v902_v1 = vld [vmem:[%s1014_s22 + $0xb8] sm:$0xff]  ;;  %554 = vmatpush.bf16.msra.mxu0 %v886_v0  ;;  %v901_v5 = vld [vmem:[%s1014_s22 + $0xb0] sm:$0xff]  ;;  %v900_v9 = vld [vmem:[%s1014_s22 + $0xa8] sm:$0xff] }
  0x12   : > { %v910_v2 = vld [vmem:[%s1014_s22 + $0xf8] sm:$0xff]  ;;  %580 = vmatpush.bf16.msra.mxu2 %v902_v1  ;;  %v909_v6 = vld [vmem:[%s1014_s22 + $0xf0] sm:$0xff]  ;;  %v908_v10 = vld [vmem:[%s1014_s22 + $0xe8] sm:$0xff] }
  0x13   : > { %v894_v3 = vld [vmem:[%s1014_s22 + $0x78] sm:$0xff]  ;;  %593 = vmatpush.bf16.msra.mxu3 %v910_v2  ;;  %v893_v7 = vld [vmem:[%s1014_s22 + $0x70] sm:$0xff]  ;;  %v892_v11 = vld [vmem:[%s1014_s22 + $0x68] sm:$0xff] }
  0x14   : > { %567 = vmatpush.bf16.msra.mxu1 %v894_v3  ;;  %v883_v12 = vld [vmem:[%s1014_s22 + $0x20] sm:$0xff]  ;;  %v882_v16 = vld [vmem:[%s1014_s22 + $0x18] sm:$0xff]  ;;  %v881_v20 = vld [vmem:[%s1014_s22 + $0x10] sm:$0xff] }
  0x15   : > { %555 = vmatpush.bf16.msra.mxu0 %v885_v4  ;;  %v899_v13 = vld [vmem:[%s1014_s22 + $0xa0] sm:$0xff]  ;;  %v898_v17 = vld [vmem:[%s1014_s22 + $0x98] sm:$0xff]  ;;  %v897_v21 = vld [vmem:[%s1014_s22 + $0x90] sm:$0xff] }
  0x16   : > { %581 = vmatpush.bf16.msra.mxu2 %v901_v5  ;;  %v907_v14 = vld [vmem:[%s1014_s22 + $0xe0] sm:$0xff]  ;;  %v906_v18 = vld [vmem:[%s1014_s22 + $0xd8] sm:$0xff]  ;;  %v905_v22 = vld [vmem:[%s1014_s22 + $0xd0] sm:$0xff] }
  0x17   : > { %594 = vmatpush.bf16.msra.mxu3 %v909_v6  ;;  %v891_v15 = vld [vmem:[%s1014_s22 + $0x60] sm:$0xff]  ;;  %v890_v19 = vld [vmem:[%s1014_s22 + $0x58] sm:$0xff]  ;;  %v889_v23 = vld [vmem:[%s1014_s22 + $0x50] sm:$0xff] }
  0x18   : > { %568 = vmatpush.bf16.msra.mxu1 %v893_v7  ;;  %v880_v24 = vld [vmem:[%s1014_s22 + $0x8] sm:$0xff]  ;;  %v238_v26 = vld [vmem:[%s1044_s26] sm:$0xff]  ;;  %v914_v38 = vld [vmem:[%s1014_s22 + $0x118] sm:$0xff] }
  0x19   : > { %556 = vmatpush.bf16.msra.mxu0 %v884_v8  ;;  %v896_v25 = vld [vmem:[%s1014_s22 + $0x88] sm:$0xff]  ;;  %v320_v30 = vunpack.c.l.b16 %v238_v26  ;;  %v879_v32 = vld [vmem:[%s1014_s22] sm:$0xff]  ;;  %v321_v35 = vunpack.c.h.b16 %v238_v26  ;;  %v913_v43 = vld [vmem:[%s1014_s22 + $0x110] sm:$0xff] }
  0x1a   : > { %582 = vmatpush.bf16.msra.mxu2 %v900_v9  ;;  %v239_v27 = vld [vmem:[%s1044_s26 + $0x8] sm:$0xff]  ;;  %v895_v33 = vld [vmem:[%s1014_s22 + $0x80] sm:$0xff]  ;;  %v240_v45 = vld [vmem:[%s1044_s26 + $0x10] sm:$0xf] }
  0x1b   : > { %595 = vmatpush.bf16.msra.mxu3 %v908_v10  ;;  %v904_v28 = vld [vmem:[%s1014_s22 + $0xc8] sm:$0xff]  ;;  %v322_v31 = vunpack.c.l.b16 %v239_v27  ;;  %v323_v34 = vunpack.c.h.b16 %v239_v27  ;;  %v903_v36 = vld [vmem:[%s1014_s22 + $0xc0] sm:$0xff]  ;;  %v325_v39 = vpack.c.b16 %v320_v30, %v320_v30  ;;  %v326_v42 = vpack.c.b16 %v321_v35, %v321_v35 }
  0x1c   : > { %569 = vmatpush.bf16.msra.mxu1 %v892_v11  ;;  %v888_v29 = vld [vmem:[%s1014_s22 + $0x48] sm:$0xff]  ;;  %v887_v37 = vld [vmem:[%s1014_s22 + $0x40] sm:$0xff]  ;;  %v324_v47 = vunpack.c.l.b16 %v240_v45 }
  0x1d   : > { %557 = vmatpush.bf16.msra.mxu0 %v883_v12  ;;  %v327_v40 = vpack.c.b16 %v322_v31, %v322_v31  ;;  %v328_v41 = vpack.c.b16 %v323_v34, %v323_v34  ;;  %v912_v44 = vld [vmem:[%s1014_s22 + $0x108] sm:$0xff]  ;;  %v911_v46 = vld [vmem:[%s1014_s22 + $0x100] sm:$0xff] }
  0x1e   : > { %583 = vmatpush.bf16.msra.mxu2 %v899_v13  ;;  %v329_v48 = vpack.c.b16 %v324_v47, %v324_v47 }
  0x1f   : > { %596 = vmatpush.bf16.msra.mxu3 %v907_v14 }
  0x20   : > { %570 = vmatpush.bf16.msra.mxu1 %v891_v15 }
  0x21   : > { %558 = vmatpush.bf16.msra.mxu0 %v882_v16 }
  0x22   : > { %584 = vmatpush.bf16.msra.mxu2 %v898_v17 }
  0x23   : > { %597 = vmatpush.bf16.msra.mxu3 %v906_v18 }
  0x24   : > { %571 = vmatpush.bf16.msra.mxu1 %v890_v19 }
  0x25   : > { %559 = vmatpush.bf16.msra.mxu0 %v881_v20 }
  0x26   : > { %585 = vmatpush.bf16.msra.mxu2 %v897_v21 }
  0x27   : > { %598 = vmatpush.bf16.msra.mxu3 %v905_v22 }
  0x28   : > { %572 = vmatpush.bf16.msra.mxu1 %v889_v23 }
  0x29   : > { %560 = vmatpush.bf16.msra.mxu0 %v880_v24 }
  0x2a   : > { %586 = vmatpush.bf16.msra.mxu2 %v896_v25 }
  0x2b   : > { %599 = vmatpush.bf16.msra.mxu3 %v904_v28 }
  0x2c   : > { %573 = vmatpush.bf16.msra.mxu1 %v888_v29 }
  0x2d   : > { %561 = vmatpush.bf16.msra.mxu0 %v879_v32 }
  0x2e   : > { %587 = vmatpush.bf16.msra.mxu2 %v895_v33 }
  0x2f   : > { %600 = vmatpush.bf16.msra.mxu3 %v903_v36 }
  0x30   : > { %574 = vmatpush.bf16.msra.mxu1 %v887_v37  ;;  %562 = vmatmul.bf16.vlgmr.msra.gmra.mxu0 %v325_v39 }
  0x31   : > { %610 = vmatpush.bf16.msrb.mxu0 %v914_v38  ;;  %588 = vmatmul.bf16.vlgmr.msra.gmra.mxu2 %v327_v40 }
  0x32   : > { %601 = vmatmul.bf16.vlgmr.msra.gmra.mxu3 %v328_v41 }
  0x33   : > { %575 = vmatmul.bf16.vlgmr.msra.gmra.mxu1 %v326_v42 }
  0x35   : > { %611 = vmatpush.bf16.msrb.mxu0 %v913_v43 }
  0x39   : > { %612 = vmatpush.bf16.msrb.mxu0 %v912_v44 }
  0x3d   : > { %613 = vmatpush.bf16.msrb.mxu0 %v911_v46 }
  0x40   : > { %876 = vmatmul.msk.bf16.vlgmr.msrb.gmra.mxu0 %vm550_vm0, %v329_v48 }
  0xad   : > { %v563_v49 = vpop.f32.mrf.mxu0 }
  0xae   : > { %v564_v52 = vadd.f32 %v941_v50, %v563_v49 }
  0xb0   : > { %v576_v51 = vpop.f32.mrf.mxu1 }
  0xb1   : > { %v577_v56 = vadd.f32 %v576_v51, %v564_v52 }
  0xb4   : > { %v589_v53 = vpop.f32.mrf.mxu2 }
  0xb5   : > { %v602_v54 = vpop.f32.mrf.mxu3  ;;  %v565_v55 = vpop.f32.mrf.mxu0  ;;  %v590_v58 = vadd.f32 %v589_v53, %v577_v56 }
  0xb7   : > { %v603_v60 = vadd.f32 %v602_v54, %v590_v58 }
  0xb8   : > { %v578_v57 = vpop.f32.mrf.mxu1 }
  0xbc   : > { %v591_v59 = vpop.f32.mrf.mxu2 }
  0xbd   : > { %v604_v61 = vpop.f32.mrf.mxu3  ;;  %v615_v62 = vpop.f32.mrf.mxu0 }
  0xbe   : > { %v616_v63 = vadd.f32 %v615_v62, %v603_v60 }
  0xc0   : > { %v619_v0 = vmax.f32 %v616_v63, 0.0 }
  0xc2   : > { %v620_v1 = vpack.c.bf16 %v619_v0, %v619_v0 }
  0xc4   : > { %622 = vst.msk [vmem:[%s236_s5] sm:$0xf] %vm621_vm1, %v620_v1 }
  0xc5   : > { %v617_v2 = vpop.f32.mrf.mxu0 }
  0xc6 PF: > { %s13_s14 = sadd.s32 1, %s964_s14   ;;  %s1083_s12 = smov %s960_s13 }
  0xc7   : > { %p10_p5 = scmp.ge.s32.totalorder %s13_s14, 4   ;;  %s1084_s13 = smov %s1086_s15 }
  0xc9   :  { %12 = sbr.rel (!%p10_p5) target bundleno = 2 (0x2), region = 68 }

// kernel: twinned_q_forward.9
= control target key start
LH: loop header
LB: loop body
LE: loop exit
PB: predicated region body
PF: predicated region fallthrough
CT: control target
= control target key end

     0   :  { %s1266_s18 = smov 0   ;;  %s1268_s19 = smov 0   ;;  %s1397_s0 = inlined_call_operand.vmem [shape: bf16[2,8,64], index: 0, kind: input, shape index: {}]   ;;  %s1398_s1 = inlined_call_operand.vmem [shape: bf16[2,64,512], index: 1, kind: input, shape index: {}]   ;;  %s1399_s2 = inlined_call_operand.vmem [shape: f32[2,1,512], index: 2, kind: input, shape index: {}]   ;;  %s1400_s3 = inlined_call_operand.vmem [shape: bf16[2,512,6], index: 3, kind: input, shape index: {}]   ;;  %s1401_s4 = inlined_call_operand.vmem [shape: f32[2,1,6], index: 4, kind: input, shape index: {}]   ;;  %s1402_s5 = inlined_call_operand.vmem [shape: f32[2,8,6], index: 5, kind: output, shape index: {}]  }
   0x1   :  { %s1270_s20 = smov 0  }
   0x2 LB: > { %s27_s21 = sadd.s32 1, %s1230_s19  ;;  %p931_p0 = scmp.ge.s32.totalorder %s1234_s20, 1  ;;  %s1234_s20 = sphi %s1270_s20, %s15_s20   ;;  %s1230_s19 = sphi %s1268_s19, %s1404_s19   ;;  %s1226_s18 = sphi %s1266_s18, %s1403_s18  }
   0x3   : > { %p29_p1 = scmp.ge.s32.totalorder %s27_s21, 2  ;;  %p242_p2 = scmp.lt.s32.totalorder %s1234_s20, 3 }
   0x5   : > { %s1406_s21 = smov (%p29_p1, %s27_s21), 0  ;;  %p243_p3 = pnand %p931_p0, %p242_p2 }
   0x6   : > { %p291_p4 = scmp.lt.s32.totalorder (!%p243_p3), %s1226_s18, 1 }
   0x7   : > { %246 = sbr.rel (%p243_p3) target bundleno = 312 (0x138), region = 40 }
   0xc   : > { %s1408_s18 = smov (!%p291_p4, %s1226_s18), 1  ;;  %vm430_vm0 = vcmask 523264   ;;  %vm806_vm1 = vcmask 48128  }
   0xd   : > { %s1137_s22 = sshll.u32 %s1408_s18, 7  ;;  %s1138_s26 = sshll.u32 %s1408_s18, 8 }
   0xe   : > { %s1290_s25 = scalar_lea.vmem %s1398_s1, %s1137_s22  ;;  %s1328_s29 = scalar_lea.vmem %s1400_s3, %s1138_s26 }
   0xf   : > { %v997_v0 = vld [vmem:[%s1290_s25 + $0x68] sm:$0xf]  ;;  %v1154_v1 = vld [vmem:[%s1290_s25 + $0x74] sm:$0xf0]  ;;  %v1152_v2 = vld [vmem:[%s1290_s25 + $0x6c] sm:$0xf]  ;;  %s314_s11 = scalar_lea.vmem %s1401_s4, %s1408_s18 }
  0x10   : > { %v998_v3 = vor.u32 %v1154_v1, %v997_v0  ;;  %v999_v4 = vld [vmem:[%s1290_s25 + $0x78] sm:$0xf0]  ;;  %v989_v5 = vld [vmem:[%s1290_s25 + $0x60] sm:$0xf]  ;;  %v1153_v6 = vld [vmem:[%s1290_s25 + $0x6c] sm:$0xf0] }
  0x11   : > { %v1002_v7 = vor.u32 %v1152_v2, %v999_v4  ;;  %v990_v8 = vor.u32 %v1153_v6, %v989_v5  ;;  %v1151_v9 = vld [vmem:[%s1290_s25 + $0x64] sm:$0xf]  ;;  %v991_v10 = vld [vmem:[%s1290_s25 + $0x70] sm:$0xf0]  ;;  %v981_v11 = vld [vmem:[%s1290_s25 + $0x48] sm:$0xf] }
  0x12   : > { %464 = vmatpush.bf16.msra.mxu2 %v998_v3  ;;  %v994_v12 = vor.u32 %v1151_v9, %v991_v10  ;;  %v1150_v13 = vld [vmem:[%s1290_s25 + $0x54] sm:$0xf0]  ;;  %v1148_v14 = vld [vmem:[%s1290_s25 + $0x4c] sm:$0xf]  ;;  %v983_v15 = vld [vmem:[%s1290_s25 + $0x58] sm:$0xf0] }
  0x13   : > { %477 = vmatpush.bf16.msra.mxu3 %v1002_v7  ;;  %438 = vmatpush.bf16.msra.mxu0 %v990_v8  ;;  %v982_v16 = vor.u32 %v1150_v13, %v981_v11  ;;  %v986_v17 = vor.u32 %v1148_v14, %v983_v15  ;;  %v973_v18 = vld [vmem:[%s1290_s25 + $0x40] sm:$0xf]  ;;  %v1149_v19 = vld [vmem:[%s1290_s25 + $0x4c] sm:$0xf0]  ;;  %v1147_v20 = vld [vmem:[%s1290_s25 + $0x44] sm:$0xf] }
  0x14   : > { %451 = vmatpush.bf16.msra.mxu1 %v994_v12  ;;  %v974_v21 = vor.u32 %v1149_v19, %v973_v18  ;;  %v975_v22 = vld [vmem:[%s1290_s25 + $0x50] sm:$0xf0]  ;;  %v965_v23 = vld [vmem:[%s1290_s25 + $0x28] sm:$0xf]  ;;  %v1146_v24 = vld [vmem:[%s1290_s25 + $0x34] sm:$0xf0] }
  0x15   : > { %v978_v25 = vor.u32 %v1147_v20, %v975_v22  ;;  %v1144_v26 = vld [vmem:[%s1290_s25 + $0x2c] sm:$0xf]  ;;  %v967_v27 = vld [vmem:[%s1290_s25 + $0x38] sm:$0xf0]  ;;  %v957_v28 = vld [vmem:[%s1290_s25 + $0x20] sm:$0xf]  ;;  %v966_v29 = vor.u32 %v1146_v24, %v965_v23 }
  0x16   : > { %465 = vmatpush.bf16.msra.mxu2 %v982_v16  ;;  %v1145_v30 = vld [vmem:[%s1290_s25 + $0x2c] sm:$0xf0]  ;;  %v1143_v31 = vld [vmem:[%s1290_s25 + $0x24] sm:$0xf]  ;;  %v959_v32 = vld [vmem:[%s1290_s25 + $0x30] sm:$0xf0]  ;;  %v970_v33 = vor.u32 %v1144_v26, %v967_v27 }
  0x17   : > { %478 = vmatpush.bf16.msra.mxu3 %v986_v17  ;;  %439 = vmatpush.bf16.msra.mxu0 %v974_v21  ;;  %v958_v34 = vor.u32 %v1145_v30, %v957_v28  ;;  %v949_v35 = vld [vmem:[%s1290_s25 + $0x8] sm:$0xf]  ;;  %v1142_v36 = vld [vmem:[%s1290_s25 + $0x14] sm:$0xf0]  ;;  %v1140_v37 = vld [vmem:[%s1290_s25 + $0xc] sm:$0xf]  ;;  %v962_v38 = vor.u32 %v1143_v31, %v959_v32 }
  0x18   : > { %452 = vmatpush.bf16.msra.mxu1 %v978_v25  ;;  %v951_v39 = vld [vmem:[%s1290_s25 + $0x18] sm:$0xf0]  ;;  %v941_v40 = vld [vmem:[%s1290_s25] sm:$0xf]  ;;  %v1141_v41 = vld [vmem:[%s1290_s25 + $0xc] sm:$0xf0]  ;;  %v950_v44 = vor.u32 %v1142_v36, %v949_v35 }
  0x19   : > { %s932_s30 = sshll.u32 %s1408_s18, 2  ;;  %v1139_v42 = vld [vmem:[%s1290_s25 + $0x4] sm:$0xf]  ;;  %v943_v43 = vld [vmem:[%s1290_s25 + $0x10] sm:$0xf0]  ;;  %v954_v45 = vor.u32 %v1140_v37, %v951_v39  ;;  %v942_v46 = vor.u32 %v1141_v41, %v941_v40  ;;  %v1162_v48 = vld [vmem:[%s1328_s29 + $0x38] sm:$0xff] }
  0x1a   : > { %466 = vmatpush.bf16.msra.mxu2 %v966_v29  ;;  %s297_s8 = scalar_lea.vmem %s1397_s0, %s932_s30  ;;  %v946_v47 = vor.u32 %v1139_v42, %v943_v43  ;;  %v1170_v49 = vld [vmem:[%s1328_s29 + $0x78] sm:$0xff]  ;;  %v1161_v53 = vld [vmem:[%s1328_s29 + $0x30] sm:$0xff]  ;;  %v1160_v57 = vld [vmem:[%s1328_s29 + $0x28] sm:$0xff]  ;;  %s306_s14 = scalar_lea.vmem %s1399_s2, %s932_s30 }
  0x1b   : > { %479 = vmatpush.bf16.msra.mxu3 %v970_v33  ;;  %440 = vmatpush.bf16.msra.mxu0 %v958_v34  ;;  %v323_v50 = vld [vmem:[%s297_s8] sm:$0xf]  ;;  %v1178_v51 = vld [vmem:[%s1328_s29 + $0xb8] sm:$0xff]  ;;  %v1169_v54 = vld [vmem:[%s1328_s29 + $0x70] sm:$0xff]  ;;  %s938_s17 = sshll.u32 %s1408_s18, 3 }
  0x1c   : > { %453 = vmatpush.bf16.msra.mxu1 %v962_v38  ;;  %v1186_v52 = vld [vmem:[%s1328_s29 + $0xf8] sm:$0xff]  ;;  %v1177_v55 = vld [vmem:[%s1328_s29 + $0xb0] sm:$0xff]  ;;  %v1168_v58 = vld [vmem:[%s1328_s29 + $0x68] sm:$0xff]  ;;  %s321_s24 = scalar_lea.vmem %s1402_s5, %s938_s17 }
  0x1d   : > { %v1185_v56 = vld [vmem:[%s1328_s29 + $0xf0] sm:$0xff]  ;;  %v1176_v59 = vld [vmem:[%s1328_s29 + $0xa8] sm:$0xff]  ;;  %v1159_v61 = vld [vmem:[%s1328_s29 + $0x20] sm:$0xff] }
  0x1e   : > { %467 = vmatpush.bf16.msra.mxu2 %v950_v44  ;;  %v1184_v60 = vld [vmem:[%s1328_s29 + $0xe8] sm:$0xff]  ;;  %v1167_v62 = vld [vmem:[%s1328_s29 + $0x60] sm:$0xff]  ;;  %v1158_v1 = vld [vmem:[%s1328_s29 + $0x18] sm:$0xff] }
  0x1f   : > { %480 = vmatpush.bf16.msra.mxu3 %v954_v45  ;;  %441 = vmatpush.bf16.msra.mxu0 %v942_v46  ;;  %v1175_v63 = vld [vmem:[%s1328_s29 + $0xa0] sm:$0xff]  ;;  %v1166_v2 = vld [vmem:[%s1328_s29 + $0x58] sm:$0xff]  ;;  %v1157_v5 = vld [vmem:[%s1328_s29 + $0x10] sm:$0xff] }
  0x20   : > { %454 = vmatpush.bf16.msra.mxu1 %v946_v47  ;;  %v1183_v0 = vld [vmem:[%s1328_s29 + $0xe0] sm:$0xff]  ;;  %v1174_v3 = vld [vmem:[%s1328_s29 + $0x98] sm:$0xff]  ;;  %v1165_v6 = vld [vmem:[%s1328_s29 + $0x50] sm:$0xff] }
  0x21   : > { %1005 = vmatmul.msk.bf16.vlgmr.msra.gmra.mxu2 %vm430_vm0, %v323_v50  ;;  %v1182_v4 = vld [vmem:[%s1328_s29 + $0xd8] sm:$0xff]  ;;  %v1173_v7 = vld [vmem:[%s1328_s29 + $0x90] sm:$0xff]  ;;  %v1156_v9 = vld [vmem:[%s1328_s29 + $0x8] sm:$0xff] }
  0x22   : > { %1006 = vmatmul.msk.bf16.vlgmr.msra.gmra.mxu3 %vm430_vm0, %v323_v50  ;;  %1003 = vmatmul.msk.bf16.vlgmr.msra.gmra.mxu0 %vm430_vm0, %v323_v50  ;;  %v1181_v8 = vld [vmem:[%s1328_s29 + $0xd0] sm:$0xff]  ;;  %v1164_v10 = vld [vmem:[%s1328_s29 + $0x48] sm:$0xff]  ;;  %v1155_v13 = vld [vmem:[%s1328_s29] sm:$0xff] }
  0x23   : > { %754 = vmatpush.bf16.msrb.mxu0 %v1162_v48  ;;  %1004 = vmatmul.msk.bf16.vlgmr.msra.gmra.mxu1 %vm430_vm0, %v323_v50  ;;  %v1172_v11 = vld [vmem:[%s1328_s29 + $0x88] sm:$0xff]  ;;  %v1163_v14 = vld [vmem:[%s1328_s29 + $0x40] sm:$0xff] }
  0x24   : > { %767 = vmatpush.bf16.msrb.mxu1 %v1170_v49  ;;  %780 = vmatpush.bf16.msrb.mxu2 %v1178_v51  ;;  %v1180_v12 = vld [vmem:[%s1328_s29 + $0xc8] sm:$0xff]  ;;  %v1171_v15 = vld [vmem:[%s1328_s29 + $0x80] sm:$0xff] }
  0x25   : > { %793 = vmatpush.bf16.msrb.mxu3 %v1186_v52  ;;  %v1179_v16 = vld [vmem:[%s1328_s29 + $0xc0] sm:$0xff] }
  0x26   : > { %v340_v17 = vld [vmem:[%s306_s14] sm:$0xf] }
  0x27   : > { %755 = vmatpush.bf16.msrb.mxu0 %v1161_v53  ;;  %v342_v18 = vperm.slane %v340_v17, 0  ;;  %v343_v19 = vperm.slane %v340_v17, 1  ;;  %v344_v24 = vperm.slane %v340_v17, 2  ;;  %v345_v26 = vperm.slane %v340_v17, 3  ;;  %v1211_v42 = vld [vmem:[%s314_s11] ss:$0 sm:$0xff] }
  0x28   : > { %768 = vmatpush.bf16.msrb.mxu1 %v1169_v54  ;;  %781 = vmatpush.bf16.msrb.mxu2 %v1177_v55 }
  0x29   : > { %794 = vmatpush.bf16.msrb.mxu3 %v1185_v56 }
  0x2b   : > { %756 = vmatpush.bf16.msrb.mxu0 %v1160_v57 }
  0x2c   : > { %769 = vmatpush.bf16.msrb.mxu1 %v1168_v58  ;;  %782 = vmatpush.bf16.msrb.mxu2 %v1176_v59 }
  0x2d   : > { %795 = vmatpush.bf16.msrb.mxu3 %v1184_v60 }
  0x2f   : > { %757 = vmatpush.bf16.msrb.mxu0 %v1159_v61 }
  0x30   : > { %770 = vmatpush.bf16.msrb.mxu1 %v1167_v62  ;;  %783 = vmatpush.bf16.msrb.mxu2 %v1175_v63 }
  0x31   : > { %796 = vmatpush.bf16.msrb.mxu3 %v1183_v0 }
  0x33   : > { %758 = vmatpush.bf16.msrb.mxu0 %v1158_v1 }
  0x34   : > { %771 = vmatpush.bf16.msrb.mxu1 %v1166_v2  ;;  %784 = vmatpush.bf16.msrb.mxu2 %v1174_v3 }
  0x35   : > { %797 = vmatpush.bf16.msrb.mxu3 %v1182_v4 }
  0x37   : > { %759 = vmatpush.bf16.msrb.mxu0 %v1157_v5 }
  0x38   : > { %772 = vmatpush.bf16.msrb.mxu1 %v1165_v6  ;;  %785 = vmatpush.bf16.msrb.mxu2 %v1173_v7 }
  0x39   : > { %798 = vmatpush.bf16.msrb.mxu3 %v1181_v8 }
  0x3b   : > { %760 = vmatpush.bf16.msrb.mxu0 %v1156_v9 }
  0x3c   : > { %773 = vmatpush.bf16.msrb.mxu1 %v1164_v10  ;;  %786 = vmatpush.bf16.msrb.mxu2 %v1172_v11 }
  0x3d   : > { %799 = vmatpush.bf16.msrb.mxu3 %v1180_v12 }
  0x3f   : > { %761 = vmatpush.bf16.msrb.mxu0 %v1155_v13 }
  0x40   : > { %774 = vmatpush.bf16.msrb.mxu1 %v1163_v14  ;;  %787 = vmatpush.bf16.msrb.mxu2 %v1171_v15 }
  0x41   : > { %800 = vmatpush.bf16.msrb.mxu3 %v1179_v16 }
  0x9f   : > { %v443_v20 = vpop.f32.mrf.mxu0 }
  0xa0   : > { %v444_v21 = vadd.f32 %v443_v20, %v342_v18  ;;  %v456_v22 = vpop.f32.mrf.mxu1 }
  0xa1   : > { %v457_v23 = vadd.f32 %v456_v22, %v343_v19 }
  0xa2   : > { %v486_v25 = vmax.f32 %v444_v21, 0.0 }
  0xa3   : > { %v487_v27 = vmax.f32 %v457_v23, 0.0 }
  0xa4   : > { %v490_v28 = vpack.c.bf16 %v486_v25, %v486_v25  ;;  %v469_v29 = vpop.f32.mrf.mxu2 }
  0xa5   : > { %v491_v30 = vpack.c.bf16 %v487_v27, %v487_v27  ;;  %v470_v31 = vadd.f32 %v469_v29, %v344_v24  ;;  %v482_v32 = vpop.f32.mrf.mxu3 }
  0xa6   : > { %v483_v33 = vadd.f32 %v482_v32, %v345_v26  ;;  %762 = vmatmul.bf16.vlgmr.msrb.gmra.mxu0 %v490_v28 }
  0xa7   : > { %v488_v34 = vmax.f32 %v470_v31, 0.0  ;;  %v445_v35 = vpop.f32.mrf.mxu0  ;;  %775 = vmatmul.bf16.vlgmr.msrb.gmra.mxu1 %v491_v30 }
  0xa8   : > { %v489_v36 = vmax.f32 %v483_v33, 0.0  ;;  %v458_v37 = vpop.f32.mrf.mxu1 }
  0xa9   : > { %v492_v38 = vpack.c.bf16 %v488_v34, %v488_v34 }
  0xaa   : > { %v493_v39 = vpack.c.bf16 %v489_v36, %v489_v36 }
  0xab   : > { %788 = vmatmul.bf16.vlgmr.msrb.gmra.mxu2 %v492_v38 }
  0xac   : > { %801 = vmatmul.bf16.vlgmr.msrb.gmra.mxu3 %v493_v39  ;;  %v471_v40 = vpop.f32.mrf.mxu2 }
  0xad   : > { %v484_v41 = vpop.f32.mrf.mxu3 }
 0x123   : > { %v763_v43 = vpop.f32.mrf.mxu0 }
 0x124   : > { %v776_v44 = vpop.f32.mrf.mxu1  ;;  %v764_v45 = vadd.f32 %v1211_v42, %v763_v43 }
 0x126   : > { %v777_v46 = vadd.f32 %v776_v44, %v764_v45 }
 0x12b   : > { %v765_v47 = vpop.f32.mrf.mxu0 }
 0x12c   : > { %v778_v48 = vpop.f32.mrf.mxu1 }
 0x12e   : > { %v789_v49 = vpop.f32.mrf.mxu2 }
 0x12f   : > { %v790_v50 = vadd.f32 %v789_v49, %v777_v46  ;;  %v802_v51 = vpop.f32.mrf.mxu3 }
 0x131   : > { %v803_v52 = vadd.f32 %v802_v51, %v790_v50 }
 0x133   : > { %807 = vst.msk [vmem:[%s321_s24] sm:$0xff] %vm806_vm1, %v803_v52 }
 0x136   : > { %v791_v53 = vpop.f32.mrf.mxu2 }
 0x137   : > { %v804_v54 = vpop.f32.mrf.mxu3 }
 0x138 PF: > { %s15_s20 = sadd.s32 1, %s1234_s20   ;;  %s1403_s18 = smov %s1230_s19 }
 0x139   : > { %p12_p5 = scmp.ge.s32.totalorder %s15_s20, 4   ;;  %s1404_s19 = smov %s1406_s21 }
 0x13b   :  { %14 = sbr.rel (!%p12_p5) target bundleno = 2 (0x2), region = 82 }

</bundles_post_ra>
